<compile_context>
chip_gen: v5e
topology: v5e:2x2
jax: 0.10.0
libtpu: 0.0.40
codegen_flags: <defaults>
</compile_context>

<pallas_src>
import functools

import jax
import jax.numpy as jnp
from jax.experimental import pallas as pl
from jax.experimental.pallas import tpu as pltpu


def _round_up(x, m):
    return (x + m - 1) // m * m


# Per-grid-step working-set budget (double-buffered blocks) and the scoped-VMEM limit
# requested from Mosaic.  40 MiB is safely under v7x's 64 MiB physical VMEM and raises
# v5e's 16 MiB / v6e's 32 MiB default scoped limits.
_VMEM_STEP_BUDGET = 26 * 1024 * 1024
_VMEM_LIMIT_BYTES = 40 * 1024 * 1024
_MAX_TN = 512
_TM_CANDIDATES = (8192, 4096, 2048, 1024, 512, 256, 128, 64, 32, 16)


def _choose_tile(dim, max_tile):
    """Largest t <= max_tile with t % 128 == 0 and dim % t == 0, else the full dim."""
    if dim <= max_tile or dim % 128 != 0:
        return dim
    t = 128
    while t * 2 <= max_tile and dim % (t * 2) == 0:
        t *= 2
    return t


def _pick_config(M, K, N, out_bytes):
    """Pick (tm, tn, tk, n_split, M_pad) for y = x @ w with x:(M,K), w:(K,N)."""
    base_m = _round_up(M, 16)                 # bf16 sublane-friendly row padding
    tn = _choose_tile(N, _MAX_TN)

    def step_bytes(tm, tk, with_acc):
        b = 2 * 2 * (tm * tk + tk * tn)       # double-buffered bf16 input blocks
        b += 2 * out_bytes * tm * tn          # double-buffered output block
        b += 2 * 4 * tn                       # bias block (f32)
        if with_acc:
            b += 4 * tm * tn                  # f32 accumulator scratch
        return b

    # Preferred: a single pass over K (no accumulator VMEM round trips), with the M
    # tile grown as large as the budget allows -- adaptive to K and N per layer.
    for tm in _TM_CANDIDATES:
        if tm > base_m:
            continue
        if step_bytes(tm, K, with_acc=False) <= _VMEM_STEP_BUDGET:
            return tm, tn, K, 1, _round_up(base_m, tm)

    # K has to be tiled (accumulation loop over the contraction dim).
    if K % 128 != 0:
        raise ValueError(
            f"K={K} does not fit VMEM in one pass and is not a multiple of 128; "
            "pad the contraction dim before calling matmul_bias_act.")
    for tm in _TM_CANDIDATES:
        if tm > base_m:
            continue
        m_pad = _round_up(base_m, tm)
        grid_mn = (m_pad // tm) * (N // tn)
        # No M/N parallelism (e.g. the batch-2 FC): split the reduction in two so the
        # second v7x TensorCore streams half of the weight.  Serial (harmless) on
        # single-core v5e/v6e; partials are summed by XLA afterwards.
        n_split = 2 if (grid_mn == 1 and K % 256 == 0) else 1
        kp = K // n_split
        tk, cand = 0, 128
        while cand <= kp:
            if kp % cand == 0 and step_bytes(tm, cand, with_acc=True) <= _VMEM_STEP_BUDGET:
                tk = cand
            cand += 128
        if tk:
            return tm, tn, tk, n_split, m_pad
    raise ValueError(f"no tile configuration fits VMEM for M={M} K={K} N={N}")


# ---------------------------------------------------------------------------
# Pallas kernels
# ---------------------------------------------------------------------------
def _gemm_single_pass_kernel(x_ref, w_ref, b_ref, o_ref, *, apply_relu):
    """Whole contraction in one block: dot + bias + act fused into the store."""
    out = jnp.dot(x_ref[...], w_ref[...], preferred_element_type=jnp.float32)
    out = out + b_ref[...]                       # (1, tn) broadcasts over rows
    if apply_relu:
        out = jnp.maximum(out, 0.0)
    o_ref[...] = out.astype(o_ref.dtype)


def _gemm_ktiled_kernel(x_ref, w_ref, b_ref, o_ref, acc_ref, *, apply_relu,
                        fuse_epilogue):
    """K-tiled accumulation; grid = (n_split, M/tm, N/tn, Kp/tk)."""
    k = pl.program_id(3)
    part = jnp.dot(x_ref[...], w_ref[...], preferred_element_type=jnp.float32)

    @pl.when(k == 0)
    def _init():
        acc_ref[...] = part                      # init with first dot (no zero fill)

    @pl.when(k > 0)
    def _accumulate():
        acc_ref[...] += part

    @pl.when(k == pl.num_programs(3) - 1)
    def _epilogue():
        out = acc_ref[...]
        if fuse_epilogue:                        # only when the result is final here
            out = out + b_ref[...]
            if apply_relu:
                out = jnp.maximum(out, 0.0)
        o_ref[0] = out.astype(o_ref.dtype)


def matmul_bias_act(x, w, b, *, apply_relu, out_dtype=jnp.float32):
    """y = act(x @ w + b).  x:(M,K), w:(K,N), b:(N,).

    Operands are cast to bf16 for the MXU; accumulation / bias / ReLU are f32.
    """
    M, K = x.shape
    K2, N = w.shape
    assert K == K2 and b.shape == (N,)
    out_bytes = jnp.dtype(out_dtype).itemsize

    tm, tn, tk, n_split, M_pad = _pick_config(M, K, N, out_bytes)
    grid_m, grid_n = M_pad // tm, N // tn

    x_p = x if M_pad == M else jnp.pad(x, ((0, M_pad - M), (0, 0)))
    x_p = x_p.astype(jnp.bfloat16)
    w_b = w.astype(jnp.bfloat16)
    b2 = b.reshape(1, N).astype(jnp.float32)

    if tk == K and n_split == 1:
        # --- single pass over K: no accumulator scratch, fused epilogue -----------
        out = pl.pallas_call(
            functools.partial(_gemm_single_pass_kernel, apply_relu=apply_relu),
            out_shape=jax.ShapeDtypeStruct((M_pad, N), out_dtype),
            grid_spec=pltpu.PrefetchScalarGridSpec(
                num_scalar_prefetch=0,
                grid=(grid_m, grid_n),
                in_specs=[
                    pl.BlockSpec((tm, K), lambda i, j: (i, 0)),
                    pl.BlockSpec((K, tn), lambda i, j: (0, j)),
                    pl.BlockSpec((1, tn), lambda i, j: (0, j)),
                ],
                out_specs=pl.BlockSpec((tm, tn), lambda i, j: (i, j)),
            ),
            compiler_params=pltpu.CompilerParams(
                dimension_semantics=("parallel", "parallel"),
                vmem_limit_bytes=_VMEM_LIMIT_BYTES),
        )(x_p, w_b, b2)
        return out[:M] if M_pad != M else out

    # --- K-tiled path (optionally split in two along a leading parallel axis) ----
    ksteps = (K // n_split) // tk
    fuse = n_split == 1
    part_dtype = out_dtype if fuse else jnp.float32

    partials = pl.pallas_call(
        functools.partial(_gemm_ktiled_kernel, apply_relu=apply_relu,
                          fuse_epilogue=fuse),
        out_shape=jax.ShapeDtypeStruct((n_split, M_pad, N), part_dtype),
        grid_spec=pltpu.PrefetchScalarGridSpec(
            num_scalar_prefetch=0,
            grid=(n_split, grid_m, grid_n, ksteps),
            in_specs=[
                pl.BlockSpec((tm, tk), lambda s, i, j, k: (i, s * ksteps + k)),
                pl.BlockSpec((tk, tn), lambda s, i, j, k: (s * ksteps + k, j)),
                pl.BlockSpec((1, tn), lambda s, i, j, k: (0, j)),
            ],
            out_specs=pl.BlockSpec((1, tm, tn), lambda s, i, j, k: (s, i, j)),
            scratch_shapes=[pltpu.VMEM((tm, tn), jnp.float32)],
        ),
        compiler_params=pltpu.CompilerParams(
            # split / M / N shard across cores; K is the in-place reduction.
            dimension_semantics=("parallel", "parallel", "parallel", "arbitrary"),
            vmem_limit_bytes=_VMEM_LIMIT_BYTES),
    )(x_p, w_b, b2)

    if fuse:
        out = partials[0]
    else:
        out = partials.sum(axis=0) + b.astype(jnp.float32)[None, :]
        if apply_relu:
            out = jnp.maximum(out, 0.0)
        out = out.astype(out_dtype)
    return out[:M] if M_pad != M else out


# ---------------------------------------------------------------------------
# XLA glue: im2col for kernel=3, stride=2, padding=1 (bf16, fused under jit)
# TODO(synk): replace with an in-kernel implicit GEMM to avoid the patch-matrix HBM
#             inflation at real 640x640 scale.
# ---------------------------------------------------------------------------
def im2col_s2_p1(x, k_pad_to=None):
    """x: (N, H, W, C) NHWC -> (N*Ho*Wo, 9*C) patches, feature order (kh, kw, c)."""
    N, H, W, C = x.shape
    xp = jnp.pad(x, ((0, 0), (1, 1), (1, 1), (0, 0)))
    Ho, Wo = H // 2, W // 2
    cols = []
    for kh in range(3):
        for kw in range(3):
            cols.append(xp[:, kh:kh + 2 * Ho:2, kw:kw + 2 * Wo:2, :])
    patches = jnp.stack(cols, axis=3).reshape(N * Ho * Wo, 9 * C)
    if k_pad_to is not None and k_pad_to > 9 * C:
        patches = jnp.pad(patches, ((0, 0), (0, k_pad_to - 9 * C)))
    return patches, Ho, Wo


def conv3x3_s2_relu(x, w_mat, b):
    """x: (N,H,W,Cin) NHWC (bf16); w_mat: (K_pad, Cout) rows ordered (kh,kw,cin) with
    zero rows beyond 9*Cin; b: (Cout,).  Returns bf16 NHWC output."""
    N = x.shape[0]
    patches, Ho, Wo = im2col_s2_p1(x, k_pad_to=w_mat.shape[0])
    y = matmul_bias_act(patches, w_mat, b, apply_relu=True, out_dtype=jnp.bfloat16)
    return y.reshape(N, Ho, Wo, w_mat.shape[1])


# ---------------------------------------------------------------------------
# DQN forward (semantics match the PyTorch module)
# ---------------------------------------------------------------------------
@functools.partial(jax.jit, static_argnames=("action_dim",))
def dqn_forward(x_nchw, params, *, action_dim):
    x = jnp.transpose(x_nchw, (0, 2, 3, 1)).astype(jnp.bfloat16)   # NCHW -> NHWC once
    for w, b in params["convs"]:
        x = conv3x3_s2_relu(x, w, b)
    n, ho, wo, c = x.shape
    feat = x.reshape(n, ho * wo * c)          # NHWC flatten, no runtime transpose:
    w_fc, b_fc = params["fc"]                 # FC weight is pre-permuted to NHWC order
    q = matmul_bias_act(feat, w_fc, b_fc, apply_relu=False, out_dtype=jnp.float32)
    return q[:, :action_dim]                  # drop the 128-lane output padding


def dqn_forward_ref(x_nchw, params, *, action_dim):
    """Pure-jnp reference with identical bf16 casting (numerics self-check only)."""
    x = jnp.transpose(x_nchw, (0, 2, 3, 1)).astype(jnp.bfloat16)
    for w, b in params["convs"]:
        patches, ho, wo = im2col_s2_p1(x, k_pad_to=w.shape[0])
        y = jnp.dot(patches, w.astype(jnp.bfloat16),
                    preferred_element_type=jnp.float32) + b.astype(jnp.float32)
        x = jnp.maximum(y, 0.0).astype(jnp.bfloat16).reshape(
            x.shape[0], ho, wo, w.shape[1])
    feat = x.reshape(x.shape[0], -1)
    w_fc, b_fc = params["fc"]
    q = jnp.dot(feat, w_fc.astype(jnp.bfloat16),
                preferred_element_type=jnp.float32) + b_fc.astype(jnp.float32)
    return q[:, :action_dim]


# ---------------------------------------------------------------------------
# Deterministic synthetic parameters (shapes follow DQN.__init__, scaled image).
# For real PyTorch weights: conv W (Cout,Cin,kh,kw) -> permute to (kh,kw,Cin,Cout),
# reshape to (9*Cin, Cout), zero-pad rows; FC W (A, C*H*W) -> permute columns from
# NCHW to NHWC flatten order, transpose to (F, A), zero-pad columns to 128 lanes.
# ---------------------------------------------------------------------------
def init_params(key, action_dim, img_dim):
    chans = [3, 32, 64, 128, 256]
    convs = []
    for i in range(4):
        key, k1, k2 = jax.random.split(key, 3)
        cin, cout = chans[i], chans[i + 1]
        fan_in = 9 * cin
        k_pad = _round_up(fan_in, 32)          # conv1: 27 -> 32 (zero rows)
        w = jnp.zeros((k_pad, cout), jnp.float32)
        w = w.at[:fan_in].set(
            jax.random.normal(k1, (fan_in, cout), jnp.float32)
            / jnp.sqrt(jnp.float32(fan_in)))
        b = jax.random.normal(k2, (cout,), jnp.float32) * 0.01
        convs.append((w.astype(jnp.bfloat16), b))

    feat = 256 * (img_dim // 16) ** 2          # analogue of 256*1600 for img_dim=640
    a_pad = _round_up(action_dim, 128)         # full-lane FC stores
    key, k1, k2 = jax.random.split(key, 3)
    w_fc = jnp.zeros((feat, a_pad), jnp.float32)
    w_fc = w_fc.at[:, :action_dim].set(
        jax.random.normal(k1, (action_dim, feat), jnp.float32).T
        / jnp.sqrt(jnp.float32(feat)))
    b_fc = jnp.zeros((a_pad,), jnp.float32)
    b_fc = b_fc.at[:action_dim].set(
        jax.random.normal(k2, (action_dim,), jnp.float32) * 0.01)
    return {"convs": convs, "fc": (w_fc.astype(jnp.bfloat16), b_fc)}


if __name__ == "__main__":
    batch, img_dim_small, action_dim = 2, 32, 16    # small, consistent with the module
    key = jax.random.PRNGKey(0)
    key, kx = jax.random.split(key)
    x = jax.random.normal(kx, (batch, 3, img_dim_small, img_dim_small), jnp.float32)

    params = init_params(key, action_dim, img_dim_small)

    # Full forward through the Pallas kernels.
    q_values = dqn_forward(x, params, action_dim=action_dim)       # (batch, action_dim)
    jax.block_until_ready(q_values)
    assert q_values.shape == (batch, action_dim)
    assert q_values.dtype == jnp.float32

    # Numerics check vs a pure-jnp reference using identical bf16 casting.
    q_ref = dqn_forward_ref(x, params, action_dim=action_dim)
    assert jnp.allclose(q_values, q_ref, rtol=2e-2, atol=2e-2)

    # Exercise the K-tiled + split-K GEMM path (not reachable at toy forward scale):
    # M=8, K=131072, N=128 -> grid (2, 1, 1, 2) with tk=32768 and XLA partial sum.
    key, kxt, kwt = jax.random.split(key, 3)
    Mt, Kt, Nt = 8, 131072, 128
    xt = jax.random.normal(kxt, (Mt, Kt), jnp.float32)
    wt = jax.random.normal(kwt, (Kt, Nt), jnp.float32) / jnp.sqrt(jnp.float32(Kt))
    bt = jnp.zeros((Nt,), jnp.float32)
    yt = jax.jit(functools.partial(matmul_bias_act, apply_relu=False))(xt, wt, bt)
    jax.block_until_ready(yt)
    yt_ref = jnp.dot(xt.astype(jnp.bfloat16), wt.astype(jnp.bfloat16),
                     preferred_element_type=jnp.float32)
    assert jnp.allclose(yt, yt_ref, rtol=2e-2, atol=2e-2)

    print("KERNEL_OK")
</pallas_src>

<mosaic_0001>
module attributes {stable_mosaic.version = 11 : i64} {
  func.func @_gemm_single_pass_kernel(%arg0: i32, %arg1: i32, %arg2: memref<512x32xbf16, #tpu.memory_space<vmem>>, %arg3: memref<32x32xbf16, #tpu.memory_space<vmem>>, %arg4: memref<1x32xf32, #tpu.memory_space<vmem>>, %arg5: memref<512x32xbf16, #tpu.memory_space<vmem>>) attributes {dimension_semantics = [#tpu.dimension_semantics<parallel>, #tpu.dimension_semantics<parallel>], iteration_bounds = array<i64: 1, 1>, scalar_prefetch = 0 : i64, scratch_operands = 0 : i64, tpu.core_type = #tpu.core_type<tc>, window_params = [{transform_indices = @transform_0, window_bounds = array<i64: 512, 32>}, {transform_indices = @transform_1, window_bounds = array<i64: 32, 32>}, {transform_indices = @transform_2, window_bounds = array<i64: 1, 32>}, {transform_indices = @transform_3, window_bounds = array<i64: 512, 32>}]} {
    %c0 = arith.constant 0 : index
    %c0_0 = arith.constant 0 : index
    %0 = vector.load %arg2[%c0, %c0_0] : memref<512x32xbf16, #tpu.memory_space<vmem>>, vector<512x32xbf16>
    %c0_1 = arith.constant 0 : index
    %c0_2 = arith.constant 0 : index
    %1 = vector.load %arg3[%c0_1, %c0_2] : memref<32x32xbf16, #tpu.memory_space<vmem>>, vector<32x32xbf16>
    %cst = arith.constant dense<0.000000e+00> : vector<512x32xf32>
    %2 = tpu.matmul %0, %1, %cst {dimension_numbers = #tpu.dot_dimension_numbers<[1], [0], [0], [1], [0, 0, 1, 1], [], []>} : vector<512x32xbf16>, vector<32x32xbf16>, vector<512x32xf32> -> vector<512x32xf32>
    %c0_3 = arith.constant 0 : index
    %c0_4 = arith.constant 0 : index
    %3 = vector.load %arg4[%c0_3, %c0_4] : memref<1x32xf32, #tpu.memory_space<vmem>>, vector<1x32xf32>
    %4 = vector.broadcast %3 : vector<1x32xf32> to vector<512x32xf32>
    %5 = arith.addf %2, %4 : vector<512x32xf32>
    %cst_5 = arith.constant 0.000000e+00 : f32
    %6 = vector.broadcast %cst_5 : f32 to vector<512x32xf32>
    %7 = arith.maximumf %5, %6 : vector<512x32xf32>
    %8 = arith.truncf %7 : vector<512x32xf32> to vector<512x32xbf16>
    %c0_6 = arith.constant 0 : index
    %c0_7 = arith.constant 0 : index
    %9 = vector.load %arg5[%c0_6, %c0_7] : memref<512x32xbf16, #tpu.memory_space<vmem>>, vector<512x32xbf16>
    tpu.vector_store %arg5[%c0_6, %c0_7], %8 {strides = array<i32>} : memref<512x32xbf16, #tpu.memory_space<vmem>>, vector<512x32xbf16>,
    return
  }
  func.func @transform_0(%arg0: i32, %arg1: i32) -> (i32, i32) {
    %c0_i32 = arith.constant 0 : i32
    %c0_i32_0 = arith.constant 0 : i32
    return %arg0, %c0_i32 : i32, i32
  }
  func.func @transform_1(%arg0: i32, %arg1: i32) -> (i32, i32) {
    %c0_i32 = arith.constant 0 : i32
    %c0_i32_0 = arith.constant 0 : i32
    return %c0_i32, %arg1 : i32, i32
  }
  func.func @transform_2(%arg0: i32, %arg1: i32) -> (i32, i32) {
    %c0_i32 = arith.constant 0 : i32
    %c0_i32_0 = arith.constant 0 : i32
    return %c0_i32, %arg1 : i32, i32
  }
  func.func @transform_3(%arg0: i32, %arg1: i32) -> (i32, i32) {
    %c0_i32 = arith.constant 0 : i32
    return %arg0, %arg1 : i32, i32
  }
}

module attributes {stable_mosaic.version = 11 : i64} {
  func.func @_gemm_single_pass_kernel(%arg0: i32, %arg1: i32, %arg2: memref<128x288xbf16, #tpu.memory_space<vmem>>, %arg3: memref<288x64xbf16, #tpu.memory_space<vmem>>, %arg4: memref<1x64xf32, #tpu.memory_space<vmem>>, %arg5: memref<128x64xbf16, #tpu.memory_space<vmem>>) attributes {dimension_semantics = [#tpu.dimension_semantics<parallel>, #tpu.dimension_semantics<parallel>], iteration_bounds = array<i64: 1, 1>, scalar_prefetch = 0 : i64, scratch_operands = 0 : i64, tpu.core_type = #tpu.core_type<tc>, window_params = [{transform_indices = @transform_0, window_bounds = array<i64: 128, 288>}, {transform_indices = @transform_1, window_bounds = array<i64: 288, 64>}, {transform_indices = @transform_2, window_bounds = array<i64: 1, 64>}, {transform_indices = @transform_3, window_bounds = array<i64: 128, 64>}]} {
    %c0 = arith.constant 0 : index
    %c0_0 = arith.constant 0 : index
    %0 = vector.load %arg2[%c0, %c0_0] : memref<128x288xbf16, #tpu.memory_space<vmem>>, vector<128x288xbf16>
    %c0_1 = arith.constant 0 : index
    %c0_2 = arith.constant 0 : index
    %1 = vector.load %arg3[%c0_1, %c0_2] : memref<288x64xbf16, #tpu.memory_space<vmem>>, vector<288x64xbf16>
    %cst = arith.constant dense<0.000000e+00> : vector<128x64xf32>
    %2 = tpu.matmul %0, %1, %cst {dimension_numbers = #tpu.dot_dimension_numbers<[1], [0], [0], [1], [0, 0, 1, 1], [], []>} : vector<128x288xbf16>, vector<288x64xbf16>, vector<128x64xf32> -> vector<128x64xf32>
    %c0_3 = arith.constant 0 : index
    %c0_4 = arith.constant 0 : index
    %3 = vector.load %arg4[%c0_3, %c0_4] : memref<1x64xf32, #tpu.memory_space<vmem>>, vector<1x64xf32>
    %4 = vector.broadcast %3 : vector<1x64xf32> to vector<128x64xf32>
    %5 = arith.addf %2, %4 : vector<128x64xf32>
    %cst_5 = arith.constant 0.000000e+00 : f32
    %6 = vector.broadcast %cst_5 : f32 to vector<128x64xf32>
    %7 = arith.maximumf %5, %6 : vector<128x64xf32>
    %8 = arith.truncf %7 : vector<128x64xf32> to vector<128x64xbf16>
    %c0_6 = arith.constant 0 : index
    %c0_7 = arith.constant 0 : index
    %9 = vector.load %arg5[%c0_6, %c0_7] : memref<128x64xbf16, #tpu.memory_space<vmem>>, vector<128x64xbf16>
    tpu.vector_store %arg5[%c0_6, %c0_7], %8 {strides = array<i32>} : memref<128x64xbf16, #tpu.memory_space<vmem>>, vector<128x64xbf16>,
    return
  }
  func.func @transform_0(%arg0: i32, %arg1: i32) -> (i32, i32) {
    %c0_i32 = arith.constant 0 : i32
    %c0_i32_0 = arith.constant 0 : i32
    return %arg0, %c0_i32 : i32, i32
  }
  func.func @transform_1(%arg0: i32, %arg1: i32) -> (i32, i32) {
    %c0_i32 = arith.constant 0 : i32
    %c0_i32_0 = arith.constant 0 : i32
    return %c0_i32, %arg1 : i32, i32
  }
  func.func @transform_2(%arg0: i32, %arg1: i32) -> (i32, i32) {
    %c0_i32 = arith.constant 0 : i32
    %c0_i32_0 = arith.constant 0 : i32
    return %c0_i32, %arg1 : i32, i32
  }
  func.func @transform_3(%arg0: i32, %arg1: i32) -> (i32, i32) {
    %c0_i32 = arith.constant 0 : i32
    return %arg0, %arg1 : i32, i32
  }
}

module attributes {stable_mosaic.version = 11 : i64} {
  func.func @_gemm_single_pass_kernel(%arg0: i32, %arg1: i32, %arg2: memref<32x576xbf16, #tpu.memory_space<vmem>>, %arg3: memref<576x128xbf16, #tpu.memory_space<vmem>>, %arg4: memref<1x128xf32, #tpu.memory_space<vmem>>, %arg5: memref<32x128xbf16, #tpu.memory_space<vmem>>) attributes {dimension_semantics = [#tpu.dimension_semantics<parallel>, #tpu.dimension_semantics<parallel>], iteration_bounds = array<i64: 1, 1>, scalar_prefetch = 0 : i64, scratch_operands = 0 : i64, tpu.core_type = #tpu.core_type<tc>, window_params = [{transform_indices = @transform_0, window_bounds = array<i64: 32, 576>}, {transform_indices = @transform_1, window_bounds = array<i64: 576, 128>}, {transform_indices = @transform_2, window_bounds = array<i64: 1, 128>}, {transform_indices = @transform_3, window_bounds = array<i64: 32, 128>}]} {
    %c0 = arith.constant 0 : index
    %c0_0 = arith.constant 0 : index
    %0 = vector.load %arg2[%c0, %c0_0] : memref<32x576xbf16, #tpu.memory_space<vmem>>, vector<32x576xbf16>
    %c0_1 = arith.constant 0 : index
    %c0_2 = arith.constant 0 : index
    %1 = vector.load %arg3[%c0_1, %c0_2] : memref<576x128xbf16, #tpu.memory_space<vmem>>, vector<576x128xbf16>
    %cst = arith.constant dense<0.000000e+00> : vector<32x128xf32>
    %2 = tpu.matmul %0, %1, %cst {dimension_numbers = #tpu.dot_dimension_numbers<[1], [0], [0], [1], [0, 0, 1, 1], [], []>} : vector<32x576xbf16>, vector<576x128xbf16>, vector<32x128xf32> -> vector<32x128xf32>
    %c0_3 = arith.constant 0 : index
    %c0_4 = arith.constant 0 : index
    %3 = vector.load %arg4[%c0_3, %c0_4] : memref<1x128xf32, #tpu.memory_space<vmem>>, vector<1x128xf32>
    %4 = vector.broadcast %3 : vector<1x128xf32> to vector<32x128xf32>
    %5 = arith.addf %2, %4 : vector<32x128xf32>
    %cst_5 = arith.constant 0.000000e+00 : f32
    %6 = vector.broadcast %cst_5 : f32 to vector<32x128xf32>
    %7 = arith.maximumf %5, %6 : vector<32x128xf32>
    %8 = arith.truncf %7 : vector<32x128xf32> to vector<32x128xbf16>
    %c0_6 = arith.constant 0 : index
    %c0_7 = arith.constant 0 : index
    %9 = vector.load %arg5[%c0_6, %c0_7] : memref<32x128xbf16, #tpu.memory_space<vmem>>, vector<32x128xbf16>
    tpu.vector_store %arg5[%c0_6, %c0_7], %8 {strides = array<i32>} : memref<32x128xbf16, #tpu.memory_space<vmem>>, vector<32x128xbf16>,
    return
  }
  func.func @transform_0(%arg0: i32, %arg1: i32) -> (i32, i32) {
    %c0_i32 = arith.constant 0 : i32
    %c0_i32_0 = arith.constant 0 : i32
    return %arg0, %c0_i32 : i32, i32
  }
  func.func @transform_1(%arg0: i32, %arg1: i32) -> (i32, i32) {
    %c0_i32 = arith.constant 0 : i32
    %c0_i32_0 = arith.constant 0 : i32
    return %c0_i32, %arg1 : i32, i32
  }
  func.func @transform_2(%arg0: i32, %arg1: i32) -> (i32, i32) {
    %c0_i32 = arith.constant 0 : i32
    %c0_i32_0 = arith.constant 0 : i32
    return %c0_i32, %arg1 : i32, i32
  }
  func.func @transform_3(%arg0: i32, %arg1: i32) -> (i32, i32) {
    %c0_i32 = arith.constant 0 : i32
    return %arg0, %arg1 : i32, i32
  }
}

module attributes {stable_mosaic.version = 11 : i64} {
  func.func @_gemm_single_pass_kernel(%arg0: i32, %arg1: i32, %arg2: memref<16x1152xbf16, #tpu.memory_space<vmem>>, %arg3: memref<1152x256xbf16, #tpu.memory_space<vmem>>, %arg4: memref<1x256xf32, #tpu.memory_space<vmem>>, %arg5: memref<16x256xbf16, #tpu.memory_space<vmem>>) attributes {dimension_semantics = [#tpu.dimension_semantics<parallel>, #tpu.dimension_semantics<parallel>], iteration_bounds = array<i64: 1, 1>, scalar_prefetch = 0 : i64, scratch_operands = 0 : i64, tpu.core_type = #tpu.core_type<tc>, window_params = [{transform_indices = @transform_0, window_bounds = array<i64: 16, 1152>}, {transform_indices = @transform_1, window_bounds = array<i64: 1152, 256>}, {transform_indices = @transform_2, window_bounds = array<i64: 1, 256>}, {transform_indices = @transform_3, window_bounds = array<i64: 16, 256>}]} {
    %c0 = arith.constant 0 : index
    %c0_0 = arith.constant 0 : index
    %0 = vector.load %arg2[%c0, %c0_0] : memref<16x1152xbf16, #tpu.memory_space<vmem>>, vector<16x1152xbf16>
    %c0_1 = arith.constant 0 : index
    %c0_2 = arith.constant 0 : index
    %1 = vector.load %arg3[%c0_1, %c0_2] : memref<1152x256xbf16, #tpu.memory_space<vmem>>, vector<1152x256xbf16>
    %cst = arith.constant dense<0.000000e+00> : vector<16x256xf32>
    %2 = tpu.matmul %0, %1, %cst {dimension_numbers = #tpu.dot_dimension_numbers<[1], [0], [0], [1], [0, 0, 1, 1], [], []>} : vector<16x1152xbf16>, vector<1152x256xbf16>, vector<16x256xf32> -> vector<16x256xf32>
    %c0_3 = arith.constant 0 : index
    %c0_4 = arith.constant 0 : index
    %3 = vector.load %arg4[%c0_3, %c0_4] : memref<1x256xf32, #tpu.memory_space<vmem>>, vector<1x256xf32>
    %4 = vector.broadcast %3 : vector<1x256xf32> to vector<16x256xf32>
    %5 = arith.addf %2, %4 : vector<16x256xf32>
    %cst_5 = arith.constant 0.000000e+00 : f32
    %6 = vector.broadcast %cst_5 : f32 to vector<16x256xf32>
    %7 = arith.maximumf %5, %6 : vector<16x256xf32>
    %8 = arith.truncf %7 : vector<16x256xf32> to vector<16x256xbf16>
    %c0_6 = arith.constant 0 : index
    %c0_7 = arith.constant 0 : index
    %9 = vector.load %arg5[%c0_6, %c0_7] : memref<16x256xbf16, #tpu.memory_space<vmem>>, vector<16x256xbf16>
    tpu.vector_store %arg5[%c0_6, %c0_7], %8 {strides = array<i32>} : memref<16x256xbf16, #tpu.memory_space<vmem>>, vector<16x256xbf16>,
    return
  }
  func.func @transform_0(%arg0: i32, %arg1: i32) -> (i32, i32) {
    %c0_i32 = arith.constant 0 : i32
    %c0_i32_0 = arith.constant 0 : i32
    return %arg0, %c0_i32 : i32, i32
  }
  func.func @transform_1(%arg0: i32, %arg1: i32) -> (i32, i32) {
    %c0_i32 = arith.constant 0 : i32
    %c0_i32_0 = arith.constant 0 : i32
    return %c0_i32, %arg1 : i32, i32
  }
  func.func @transform_2(%arg0: i32, %arg1: i32) -> (i32, i32) {
    %c0_i32 = arith.constant 0 : i32
    %c0_i32_0 = arith.constant 0 : i32
    return %c0_i32, %arg1 : i32, i32
  }
  func.func @transform_3(%arg0: i32, %arg1: i32) -> (i32, i32) {
    %c0_i32 = arith.constant 0 : i32
    return %arg0, %arg1 : i32, i32
  }
}

module attributes {stable_mosaic.version = 11 : i64} {
  func.func @_gemm_single_pass_kernel(%arg0: i32, %arg1: i32, %arg2: memref<16x1024xbf16, #tpu.memory_space<vmem>>, %arg3: memref<1024x128xbf16, #tpu.memory_space<vmem>>, %arg4: memref<1x128xf32, #tpu.memory_space<vmem>>, %arg5: memref<16x128xf32, #tpu.memory_space<vmem>>) attributes {dimension_semantics = [#tpu.dimension_semantics<parallel>, #tpu.dimension_semantics<parallel>], iteration_bounds = array<i64: 1, 1>, scalar_prefetch = 0 : i64, scratch_operands = 0 : i64, tpu.core_type = #tpu.core_type<tc>, window_params = [{transform_indices = @transform_0, window_bounds = array<i64: 16, 1024>}, {transform_indices = @transform_1, window_bounds = array<i64: 1024, 128>}, {transform_indices = @transform_2, window_bounds = array<i64: 1, 128>}, {transform_indices = @transform_3, window_bounds = array<i64: 16, 128>}]} {
    %c0 = arith.constant 0 : index
    %c0_0 = arith.constant 0 : index
    %0 = vector.load %arg2[%c0, %c0_0] : memref<16x1024xbf16, #tpu.memory_space<vmem>>, vector<16x1024xbf16>
    %c0_1 = arith.constant 0 : index
    %c0_2 = arith.constant 0 : index
    %1 = vector.load %arg3[%c0_1, %c0_2] : memref<1024x128xbf16, #tpu.memory_space<vmem>>, vector<1024x128xbf16>
    %cst = arith.constant dense<0.000000e+00> : vector<16x128xf32>
    %2 = tpu.matmul %0, %1, %cst {dimension_numbers = #tpu.dot_dimension_numbers<[1], [0], [0], [1], [0, 0, 1, 1], [], []>} : vector<16x1024xbf16>, vector<1024x128xbf16>, vector<16x128xf32> -> vector<16x128xf32>
    %c0_3 = arith.constant 0 : index
    %c0_4 = arith.constant 0 : index
    %3 = vector.load %arg4[%c0_3, %c0_4] : memref<1x128xf32, #tpu.memory_space<vmem>>, vector<1x128xf32>
    %4 = vector.broadcast %3 : vector<1x128xf32> to vector<16x128xf32>
    %5 = arith.addf %2, %4 : vector<16x128xf32>
    %c0_5 = arith.constant 0 : index
    %c0_6 = arith.constant 0 : index
    %6 = vector.load %arg5[%c0_5, %c0_6] : memref<16x128xf32, #tpu.memory_space<vmem>>, vector<16x128xf32>
    tpu.vector_store %arg5[%c0_5, %c0_6], %5 {strides = array<i32>} : memref<16x128xf32, #tpu.memory_space<vmem>>, vector<16x128xf32>,
    return
  }
  func.func @transform_0(%arg0: i32, %arg1: i32) -> (i32, i32) {
    %c0_i32 = arith.constant 0 : i32
    %c0_i32_0 = arith.constant 0 : i32
    return %arg0, %c0_i32 : i32, i32
  }
  func.func @transform_1(%arg0: i32, %arg1: i32) -> (i32, i32) {
    %c0_i32 = arith.constant 0 : i32
    %c0_i32_0 = arith.constant 0 : i32
    return %c0_i32, %arg1 : i32, i32
  }
  func.func @transform_2(%arg0: i32, %arg1: i32) -> (i32, i32) {
    %c0_i32 = arith.constant 0 : i32
    %c0_i32_0 = arith.constant 0 : i32
    return %c0_i32, %arg1 : i32, i32
  }
  func.func @transform_3(%arg0: i32, %arg1: i32) -> (i32, i32) {
    %c0_i32 = arith.constant 0 : i32
    return %arg0, %arg1 : i32, i32
  }
}

</mosaic_0001>

<bundles_post_ra>
// kernel: dqn_forward.5
= control target key start
LH: loop header
LB: loop body
LE: loop exit
PB: predicated region body
PF: predicated region fallthrough
CT: control target
= control target key end

     0   :  { %vm259_vm0 = vcmask 261120   ;;  %vm653_vm1 = vcmask 257024   ;;  %s1410_s1 = inlined_call_operand.vmem [shape: bf16[32,32], index: 1, kind: input, shape index: {}]   ;;  %s1411_s0 = inlined_call_operand.vmem [shape: bf16[512,32], index: 0, kind: input, shape index: {}]   ;;  %s1412_s2 = inlined_call_operand.vmem [shape: f32[1,32], index: 2, kind: input, shape index: {}]   ;;  %s1413_s3 = inlined_call_operand.vmem [shape: bf16[512,32], index: 3, kind: output, shape index: {}]  }
   0x1   :  { %v923_v0 = vld [vmem:[%s1410_s1 + $0x8] sm:$0xff]  ;;  %v922_v1 = vld [vmem:[%s1410_s1] sm:$0xff]  ;;  %v892_v10 = vld [vmem:[%s1411_s0 + $0x10] sm:$0xff] }
   0x2   :  { %362 = vmatpush.bf16.msra.mxu0 %v923_v0  ;;  %924 = vmatpush.bf16.msra.mxu1 %v923_v0  ;;  %v890_v2 = vld [vmem:[%s1411_s0] sm:$0xff]  ;;  %v891_v6 = vld [vmem:[%s1411_s0 + $0x8] sm:$0xff]  ;;  %v900_v11 = vld [vmem:[%s1411_s0 + $0x50] sm:$0xff] }
   0x3   :  { %925 = vmatpush.bf16.msra.mxu2 %v923_v0  ;;  %926 = vmatpush.bf16.msra.mxu3 %v923_v0  ;;  %v898_v3 = vld [vmem:[%s1411_s0 + $0x40] sm:$0xff]  ;;  %v899_v7 = vld [vmem:[%s1411_s0 + $0x48] sm:$0xff]  ;;  %v908_v12 = vld [vmem:[%s1411_s0 + $0x90] sm:$0xff] }
   0x4   :  { %v906_v4 = vld [vmem:[%s1411_s0 + $0x80] sm:$0xff]  ;;  %v907_v8 = vld [vmem:[%s1411_s0 + $0x88] sm:$0xff]  ;;  %v916_v13 = vld [vmem:[%s1411_s0 + $0xd0] sm:$0xff] }
   0x5   :  { %v914_v5 = vld [vmem:[%s1411_s0 + $0xc0] sm:$0xff]  ;;  %v915_v9 = vld [vmem:[%s1411_s0 + $0xc8] sm:$0xff]  ;;  %v893_v14 = vld [vmem:[%s1411_s0 + $0x18] sm:$0xff] }
   0x6   :  { %363 = vmatpush.bf16.msra.mxu0 %v922_v1  ;;  %927 = vmatpush.bf16.msra.mxu1 %v922_v1  ;;  %v901_v15 = vld [vmem:[%s1411_s0 + $0x58] sm:$0xff]  ;;  %v894_v18 = vld [vmem:[%s1411_s0 + $0x20] sm:$0xff]  ;;  %v895_v22 = vld [vmem:[%s1411_s0 + $0x28] sm:$0xff] }
   0x7   :  { %928 = vmatpush.bf16.msra.mxu2 %v922_v1  ;;  %929 = vmatpush.bf16.msra.mxu3 %v922_v1  ;;  %v909_v16 = vld [vmem:[%s1411_s0 + $0x98] sm:$0xff]  ;;  %v902_v19 = vld [vmem:[%s1411_s0 + $0x60] sm:$0xff]  ;;  %v903_v23 = vld [vmem:[%s1411_s0 + $0x68] sm:$0xff] }
   0x8   :  { %v917_v17 = vld [vmem:[%s1411_s0 + $0xd8] sm:$0xff]  ;;  %v910_v20 = vld [vmem:[%s1411_s0 + $0xa0] sm:$0xff]  ;;  %v911_v24 = vld [vmem:[%s1411_s0 + $0xa8] sm:$0xff] }
   0x9   :  { %858 = vmatmul.msk.bf16.vlgmr.msra.gmra.mxu0 %vm259_vm0, %v890_v2  ;;  %866 = vmatmul.msk.bf16.vlgmr.msra.gmra.mxu1 %vm259_vm0, %v898_v3  ;;  %v918_v21 = vld [vmem:[%s1411_s0 + $0xe0] sm:$0xff]  ;;  %v919_v25 = vld [vmem:[%s1411_s0 + $0xe8] sm:$0xff]  ;;  %v896_v26 = vld [vmem:[%s1411_s0 + $0x30] sm:$0xff] }
   0xa   :  { %874 = vmatmul.msk.bf16.vlgmr.msra.gmra.mxu2 %vm259_vm0, %v906_v4  ;;  %882 = vmatmul.msk.bf16.vlgmr.msra.gmra.mxu3 %vm259_vm0, %v914_v5  ;;  %v904_v27 = vld [vmem:[%s1411_s0 + $0x70] sm:$0xff]  ;;  %v897_v30 = vld [vmem:[%s1411_s0 + $0x38] sm:$0xff]  ;;  %v1088_v34 = vld [vmem:[%s1412_s2] ss:$0 sm:$0xff] }
   0xb   :  { %v912_v28 = vld [vmem:[%s1411_s0 + $0xb0] sm:$0xff]  ;;  %v905_v31 = vld [vmem:[%s1411_s0 + $0x78] sm:$0xff] }
   0xc   :  { %v920_v29 = vld [vmem:[%s1411_s0 + $0xf0] sm:$0xff]  ;;  %v913_v32 = vld [vmem:[%s1411_s0 + $0xb8] sm:$0xff] }
   0xd   :  { %v921_v33 = vld [vmem:[%s1411_s0 + $0xf8] sm:$0xff] }
  0x19   :  { %859 = vmatmul.msk.bf16.gmra.mxu0 %vm259_vm0, %v891_v6  ;;  %867 = vmatmul.msk.bf16.gmra.mxu1 %vm259_vm0, %v899_v7 }
  0x1a   :  { %875 = vmatmul.msk.bf16.gmra.mxu2 %vm259_vm0, %v907_v8  ;;  %883 = vmatmul.msk.bf16.gmra.mxu3 %vm259_vm0, %v915_v9 }
  0x29   :  { %860 = vmatmul.msk.bf16.gmra.mxu0 %vm259_vm0, %v892_v10  ;;  %868 = vmatmul.msk.bf16.gmra.mxu1 %vm259_vm0, %v900_v11 }
  0x2a   :  { %876 = vmatmul.msk.bf16.gmra.mxu2 %vm259_vm0, %v908_v12  ;;  %884 = vmatmul.msk.bf16.gmra.mxu3 %vm259_vm0, %v916_v13 }
  0x39   :  { %861 = vmatmul.msk.bf16.gmra.mxu0 %vm259_vm0, %v893_v14  ;;  %869 = vmatmul.msk.bf16.gmra.mxu1 %vm259_vm0, %v901_v15 }
  0x3a   :  { %877 = vmatmul.msk.bf16.gmra.mxu2 %vm259_vm0, %v909_v16  ;;  %885 = vmatmul.msk.bf16.gmra.mxu3 %vm259_vm0, %v917_v17 }
  0x49   :  { %862 = vmatmul.msk.bf16.gmra.mxu0 %vm259_vm0, %v894_v18  ;;  %870 = vmatmul.msk.bf16.gmra.mxu1 %vm259_vm0, %v902_v19 }
  0x4a   :  { %878 = vmatmul.msk.bf16.gmra.mxu2 %vm259_vm0, %v910_v20  ;;  %886 = vmatmul.msk.bf16.gmra.mxu3 %vm259_vm0, %v918_v21 }
  0x59   :  { %863 = vmatmul.msk.bf16.gmra.mxu0 %vm259_vm0, %v895_v22  ;;  %871 = vmatmul.msk.bf16.gmra.mxu1 %vm259_vm0, %v903_v23 }
  0x5a   :  { %879 = vmatmul.msk.bf16.gmra.mxu2 %vm259_vm0, %v911_v24  ;;  %887 = vmatmul.msk.bf16.gmra.mxu3 %vm259_vm0, %v919_v25 }
  0x69   :  { %864 = vmatmul.msk.bf16.gmra.mxu0 %vm259_vm0, %v896_v26  ;;  %872 = vmatmul.msk.bf16.gmra.mxu1 %vm259_vm0, %v904_v27 }
  0x6a   :  { %880 = vmatmul.msk.bf16.gmra.mxu2 %vm259_vm0, %v912_v28  ;;  %888 = vmatmul.msk.bf16.gmra.mxu3 %vm259_vm0, %v920_v29 }
  0x79   :  { %865 = vmatmul.msk.bf16.gmra.mxu0 %vm259_vm0, %v897_v30  ;;  %873 = vmatmul.msk.bf16.gmra.mxu1 %vm259_vm0, %v905_v31 }
  0x7a   :  { %881 = vmatmul.msk.bf16.gmra.mxu2 %vm259_vm0, %v913_v32  ;;  %889 = vmatmul.msk.bf16.gmra.mxu3 %vm259_vm0, %v921_v33 }
  0x86   :  { %v365_v35 = vpop.f32.mrf.mxu0  ;;  %v405_v36 = vpop.f32.mrf.mxu1 }
  0x87   :  { %v366_v37 = vadd.f32 %v1088_v34, %v365_v35  ;;  %v406_v38 = vadd.f32 %v1088_v34, %v405_v36 }
  0x89   :  { %v525_v39 = vmax.f32 %v366_v37, 0.0  ;;  %v541_v40 = vmax.f32 %v406_v38, 0.0 }
  0x8b   :  { %v589_v41 = vpack.c.bf16 %v525_v39, %v525_v39  ;;  %v605_v42 = vpack.c.bf16 %v541_v40, %v541_v40 }
  0x8d   :  { %654 = vst.msk [vmem:[%s1413_s3] sm:$0xf] %vm653_vm1, %v589_v41  ;;  %v445_v43 = vpop.f32.mrf.mxu2  ;;  %v485_v44 = vpop.f32.mrf.mxu3 }
  0x8e   :  { %670 = vst.msk [vmem:[%s1413_s3 + $0x40] sm:$0xf] %vm653_vm1, %v605_v42  ;;  %v446_v45 = vadd.f32 %v1088_v34, %v445_v43  ;;  %v486_v46 = vadd.f32 %v1088_v34, %v485_v44  ;;  %v367_v47 = vpop.f32.mrf.mxu0  ;;  %v407_v48 = vpop.f32.mrf.mxu1 }
  0x8f   :  { %v368_v49 = vadd.f32 %v1088_v34, %v367_v47  ;;  %v408_v50 = vadd.f32 %v1088_v34, %v407_v48 }
  0x90   :  { %v557_v51 = vmax.f32 %v446_v45, 0.0  ;;  %v573_v52 = vmax.f32 %v486_v46, 0.0 }
  0x91   :  { %v526_v53 = vmax.f32 %v368_v49, 0.0  ;;  %v542_v54 = vmax.f32 %v408_v50, 0.0 }
  0x92   :  { %v621_v55 = vpack.c.bf16 %v557_v51, %v557_v51  ;;  %v637_v56 = vpack.c.bf16 %v573_v52, %v573_v52 }
  0x93   :  { %v590_v57 = vpack.c.bf16 %v526_v53, %v526_v53  ;;  %v606_v58 = vpack.c.bf16 %v542_v54, %v542_v54 }
  0x94   :  { %686 = vst.msk [vmem:[%s1413_s3 + $0x80] sm:$0xf] %vm653_vm1, %v621_v55 }
  0x95   :  { %702 = vst.msk [vmem:[%s1413_s3 + $0xc0] sm:$0xf] %vm653_vm1, %v637_v56  ;;  %v447_v59 = vpop.f32.mrf.mxu2  ;;  %v487_v60 = vpop.f32.mrf.mxu3 }
  0x96   :  { %655 = vst.msk [vmem:[%s1413_s3 + $0x4] sm:$0xf] %vm653_vm1, %v590_v57  ;;  %v448_v61 = vadd.f32 %v1088_v34, %v447_v59  ;;  %v488_v62 = vadd.f32 %v1088_v34, %v487_v60  ;;  %v370_v63 = vpop.f32.mrf.mxu0  ;;  %v410_v0 = vpop.f32.mrf.mxu1 }
  0x97   :  { %671 = vst.msk [vmem:[%s1413_s3 + $0x44] sm:$0xf] %vm653_vm1, %v606_v58  ;;  %v371_v1 = vadd.f32 %v1088_v34, %v370_v63  ;;  %v411_v2 = vadd.f32 %v1088_v34, %v410_v0 }
  0x98   :  { %v558_v3 = vmax.f32 %v448_v61, 0.0  ;;  %v574_v4 = vmax.f32 %v488_v62, 0.0 }
  0x99   :  { %v527_v5 = vmax.f32 %v371_v1, 0.0  ;;  %v543_v6 = vmax.f32 %v411_v2, 0.0 }
  0x9a   :  { %v622_v7 = vpack.c.bf16 %v558_v3, %v558_v3  ;;  %v638_v8 = vpack.c.bf16 %v574_v4, %v574_v4 }
  0x9b   :  { %v591_v9 = vpack.c.bf16 %v527_v5, %v527_v5  ;;  %v607_v10 = vpack.c.bf16 %v543_v6, %v543_v6 }
  0x9c   :  { %687 = vst.msk [vmem:[%s1413_s3 + $0x84] sm:$0xf] %vm653_vm1, %v622_v7 }
  0x9d   :  { %703 = vst.msk [vmem:[%s1413_s3 + $0xc4] sm:$0xf] %vm653_vm1, %v638_v8  ;;  %v450_v11 = vpop.f32.mrf.mxu2  ;;  %v490_v12 = vpop.f32.mrf.mxu3 }
  0x9e   :  { %656 = vst.msk [vmem:[%s1413_s3 + $0x8] sm:$0xf] %vm653_vm1, %v591_v9  ;;  %v451_v13 = vadd.f32 %v1088_v34, %v450_v11  ;;  %v491_v14 = vadd.f32 %v1088_v34, %v490_v12  ;;  %v372_v15 = vpop.f32.mrf.mxu0  ;;  %v412_v16 = vpop.f32.mrf.mxu1 }
  0x9f   :  { %672 = vst.msk [vmem:[%s1413_s3 + $0x48] sm:$0xf] %vm653_vm1, %v607_v10  ;;  %v373_v17 = vadd.f32 %v1088_v34, %v372_v15  ;;  %v413_v18 = vadd.f32 %v1088_v34, %v412_v16 }
  0xa0   :  { %v559_v19 = vmax.f32 %v451_v13, 0.0  ;;  %v575_v20 = vmax.f32 %v491_v14, 0.0 }
  0xa1   :  { %v528_v21 = vmax.f32 %v373_v17, 0.0  ;;  %v544_v22 = vmax.f32 %v413_v18, 0.0 }
  0xa2   :  { %v623_v23 = vpack.c.bf16 %v559_v19, %v559_v19  ;;  %v639_v24 = vpack.c.bf16 %v575_v20, %v575_v20 }
  0xa3   :  { %v592_v25 = vpack.c.bf16 %v528_v21, %v528_v21  ;;  %v608_v26 = vpack.c.bf16 %v544_v22, %v544_v22 }
  0xa4   :  { %688 = vst.msk [vmem:[%s1413_s3 + $0x88] sm:$0xf] %vm653_vm1, %v623_v23 }
  0xa5   :  { %704 = vst.msk [vmem:[%s1413_s3 + $0xc8] sm:$0xf] %vm653_vm1, %v639_v24  ;;  %v452_v27 = vpop.f32.mrf.mxu2  ;;  %v492_v28 = vpop.f32.mrf.mxu3 }
  0xa6   :  { %657 = vst.msk [vmem:[%s1413_s3 + $0xc] sm:$0xf] %vm653_vm1, %v592_v25  ;;  %v453_v29 = vadd.f32 %v1088_v34, %v452_v27  ;;  %v493_v30 = vadd.f32 %v1088_v34, %v492_v28  ;;  %v375_v31 = vpop.f32.mrf.mxu0  ;;  %v415_v32 = vpop.f32.mrf.mxu1 }
  0xa7   :  { %673 = vst.msk [vmem:[%s1413_s3 + $0x4c] sm:$0xf] %vm653_vm1, %v608_v26  ;;  %v376_v33 = vadd.f32 %v1088_v34, %v375_v31  ;;  %v416_v35 = vadd.f32 %v1088_v34, %v415_v32 }
  0xa8   :  { %v560_v36 = vmax.f32 %v453_v29, 0.0  ;;  %v576_v37 = vmax.f32 %v493_v30, 0.0 }
  0xa9   :  { %v529_v38 = vmax.f32 %v376_v33, 0.0  ;;  %v545_v39 = vmax.f32 %v416_v35, 0.0 }
  0xaa   :  { %v624_v40 = vpack.c.bf16 %v560_v36, %v560_v36  ;;  %v640_v41 = vpack.c.bf16 %v576_v37, %v576_v37 }
  0xab   :  { %v593_v42 = vpack.c.bf16 %v529_v38, %v529_v38  ;;  %v609_v43 = vpack.c.bf16 %v545_v39, %v545_v39 }
  0xac   :  { %689 = vst.msk [vmem:[%s1413_s3 + $0x8c] sm:$0xf] %vm653_vm1, %v624_v40 }
  0xad   :  { %705 = vst.msk [vmem:[%s1413_s3 + $0xcc] sm:$0xf] %vm653_vm1, %v640_v41  ;;  %v455_v44 = vpop.f32.mrf.mxu2  ;;  %v495_v45 = vpop.f32.mrf.mxu3 }
  0xae   :  { %658 = vst.msk [vmem:[%s1413_s3 + $0x10] sm:$0xf] %vm653_vm1, %v593_v42  ;;  %v456_v46 = vadd.f32 %v1088_v34, %v455_v44  ;;  %v496_v47 = vadd.f32 %v1088_v34, %v495_v45  ;;  %v377_v48 = vpop.f32.mrf.mxu0  ;;  %v417_v49 = vpop.f32.mrf.mxu1 }
  0xaf   :  { %674 = vst.msk [vmem:[%s1413_s3 + $0x50] sm:$0xf] %vm653_vm1, %v609_v43  ;;  %v378_v50 = vadd.f32 %v1088_v34, %v377_v48  ;;  %v418_v51 = vadd.f32 %v1088_v34, %v417_v49 }
  0xb0   :  { %v561_v52 = vmax.f32 %v456_v46, 0.0  ;;  %v577_v53 = vmax.f32 %v496_v47, 0.0 }
  0xb1   :  { %v530_v54 = vmax.f32 %v378_v50, 0.0  ;;  %v546_v55 = vmax.f32 %v418_v51, 0.0 }
  0xb2   :  { %v625_v56 = vpack.c.bf16 %v561_v52, %v561_v52  ;;  %v641_v57 = vpack.c.bf16 %v577_v53, %v577_v53 }
  0xb3   :  { %v594_v58 = vpack.c.bf16 %v530_v54, %v530_v54  ;;  %v610_v59 = vpack.c.bf16 %v546_v55, %v546_v55 }
  0xb4   :  { %690 = vst.msk [vmem:[%s1413_s3 + $0x90] sm:$0xf] %vm653_vm1, %v625_v56 }
  0xb5   :  { %706 = vst.msk [vmem:[%s1413_s3 + $0xd0] sm:$0xf] %vm653_vm1, %v641_v57  ;;  %v457_v60 = vpop.f32.mrf.mxu2  ;;  %v497_v61 = vpop.f32.mrf.mxu3 }
  0xb6   :  { %659 = vst.msk [vmem:[%s1413_s3 + $0x14] sm:$0xf] %vm653_vm1, %v594_v58  ;;  %v458_v62 = vadd.f32 %v1088_v34, %v457_v60  ;;  %v498_v63 = vadd.f32 %v1088_v34, %v497_v61  ;;  %v380_v0 = vpop.f32.mrf.mxu0  ;;  %v420_v1 = vpop.f32.mrf.mxu1 }
  0xb7   :  { %675 = vst.msk [vmem:[%s1413_s3 + $0x54] sm:$0xf] %vm653_vm1, %v610_v59  ;;  %v381_v2 = vadd.f32 %v1088_v34, %v380_v0  ;;  %v421_v3 = vadd.f32 %v1088_v34, %v420_v1 }
  0xb8   :  { %v562_v4 = vmax.f32 %v458_v62, 0.0  ;;  %v578_v5 = vmax.f32 %v498_v63, 0.0 }
  0xb9   :  { %v531_v6 = vmax.f32 %v381_v2, 0.0  ;;  %v547_v7 = vmax.f32 %v421_v3, 0.0 }
  0xba   :  { %v626_v8 = vpack.c.bf16 %v562_v4, %v562_v4  ;;  %v642_v9 = vpack.c.bf16 %v578_v5, %v578_v5 }
  0xbb   :  { %v595_v10 = vpack.c.bf16 %v531_v6, %v531_v6  ;;  %v611_v11 = vpack.c.bf16 %v547_v7, %v547_v7 }
  0xbc   :  { %691 = vst.msk [vmem:[%s1413_s3 + $0x94] sm:$0xf] %vm653_vm1, %v626_v8 }
  0xbd   :  { %707 = vst.msk [vmem:[%s1413_s3 + $0xd4] sm:$0xf] %vm653_vm1, %v642_v9  ;;  %v460_v12 = vpop.f32.mrf.mxu2  ;;  %v500_v13 = vpop.f32.mrf.mxu3 }
  0xbe   :  { %660 = vst.msk [vmem:[%s1413_s3 + $0x18] sm:$0xf] %vm653_vm1, %v595_v10  ;;  %v461_v14 = vadd.f32 %v1088_v34, %v460_v12  ;;  %v501_v15 = vadd.f32 %v1088_v34, %v500_v13  ;;  %v382_v16 = vpop.f32.mrf.mxu0  ;;  %v422_v17 = vpop.f32.mrf.mxu1 }
  0xbf   :  { %676 = vst.msk [vmem:[%s1413_s3 + $0x58] sm:$0xf] %vm653_vm1, %v611_v11  ;;  %v383_v18 = vadd.f32 %v1088_v34, %v382_v16  ;;  %v423_v19 = vadd.f32 %v1088_v34, %v422_v17 }
  0xc0   :  { %v563_v20 = vmax.f32 %v461_v14, 0.0  ;;  %v579_v21 = vmax.f32 %v501_v15, 0.0 }
  0xc1   :  { %v532_v22 = vmax.f32 %v383_v18, 0.0  ;;  %v548_v23 = vmax.f32 %v423_v19, 0.0 }
  0xc2   :  { %v627_v24 = vpack.c.bf16 %v563_v20, %v563_v20  ;;  %v643_v25 = vpack.c.bf16 %v579_v21, %v579_v21 }
  0xc3   :  { %v596_v26 = vpack.c.bf16 %v532_v22, %v532_v22  ;;  %v612_v27 = vpack.c.bf16 %v548_v23, %v548_v23 }
  0xc4   :  { %692 = vst.msk [vmem:[%s1413_s3 + $0x98] sm:$0xf] %vm653_vm1, %v627_v24 }
  0xc5   :  { %708 = vst.msk [vmem:[%s1413_s3 + $0xd8] sm:$0xf] %vm653_vm1, %v643_v25  ;;  %v462_v28 = vpop.f32.mrf.mxu2  ;;  %v502_v29 = vpop.f32.mrf.mxu3 }
  0xc6   :  { %661 = vst.msk [vmem:[%s1413_s3 + $0x1c] sm:$0xf] %vm653_vm1, %v596_v26  ;;  %v463_v30 = vadd.f32 %v1088_v34, %v462_v28  ;;  %v503_v31 = vadd.f32 %v1088_v34, %v502_v29  ;;  %v385_v32 = vpop.f32.mrf.mxu0  ;;  %v425_v33 = vpop.f32.mrf.mxu1 }
  0xc7   :  { %677 = vst.msk [vmem:[%s1413_s3 + $0x5c] sm:$0xf] %vm653_vm1, %v612_v27  ;;  %v386_v35 = vadd.f32 %v1088_v34, %v385_v32  ;;  %v426_v36 = vadd.f32 %v1088_v34, %v425_v33 }
  0xc8   :  { %v564_v37 = vmax.f32 %v463_v30, 0.0  ;;  %v580_v38 = vmax.f32 %v503_v31, 0.0 }
  0xc9   :  { %v533_v39 = vmax.f32 %v386_v35, 0.0  ;;  %v549_v40 = vmax.f32 %v426_v36, 0.0 }
  0xca   :  { %v628_v41 = vpack.c.bf16 %v564_v37, %v564_v37  ;;  %v644_v42 = vpack.c.bf16 %v580_v38, %v580_v38 }
  0xcb   :  { %v597_v43 = vpack.c.bf16 %v533_v39, %v533_v39  ;;  %v613_v44 = vpack.c.bf16 %v549_v40, %v549_v40 }
  0xcc   :  { %693 = vst.msk [vmem:[%s1413_s3 + $0x9c] sm:$0xf] %vm653_vm1, %v628_v41 }
  0xcd   :  { %709 = vst.msk [vmem:[%s1413_s3 + $0xdc] sm:$0xf] %vm653_vm1, %v644_v42  ;;  %v465_v45 = vpop.f32.mrf.mxu2  ;;  %v505_v46 = vpop.f32.mrf.mxu3 }
  0xce   :  { %662 = vst.msk [vmem:[%s1413_s3 + $0x20] sm:$0xf] %vm653_vm1, %v597_v43  ;;  %v466_v47 = vadd.f32 %v1088_v34, %v465_v45  ;;  %v506_v48 = vadd.f32 %v1088_v34, %v505_v46  ;;  %v387_v49 = vpop.f32.mrf.mxu0  ;;  %v427_v50 = vpop.f32.mrf.mxu1 }
  0xcf   :  { %678 = vst.msk [vmem:[%s1413_s3 + $0x60] sm:$0xf] %vm653_vm1, %v613_v44  ;;  %v388_v51 = vadd.f32 %v1088_v34, %v387_v49  ;;  %v428_v52 = vadd.f32 %v1088_v34, %v427_v50 }
  0xd0   :  { %v565_v53 = vmax.f32 %v466_v47, 0.0  ;;  %v581_v54 = vmax.f32 %v506_v48, 0.0 }
  0xd1   :  { %v534_v55 = vmax.f32 %v388_v51, 0.0  ;;  %v550_v56 = vmax.f32 %v428_v52, 0.0 }
  0xd2   :  { %v629_v57 = vpack.c.bf16 %v565_v53, %v565_v53  ;;  %v645_v58 = vpack.c.bf16 %v581_v54, %v581_v54 }
  0xd3   :  { %v598_v59 = vpack.c.bf16 %v534_v55, %v534_v55  ;;  %v614_v60 = vpack.c.bf16 %v550_v56, %v550_v56 }
  0xd4   :  { %694 = vst.msk [vmem:[%s1413_s3 + $0xa0] sm:$0xf] %vm653_vm1, %v629_v57 }
  0xd5   :  { %710 = vst.msk [vmem:[%s1413_s3 + $0xe0] sm:$0xf] %vm653_vm1, %v645_v58  ;;  %v467_v61 = vpop.f32.mrf.mxu2  ;;  %v507_v62 = vpop.f32.mrf.mxu3 }
  0xd6   :  { %663 = vst.msk [vmem:[%s1413_s3 + $0x24] sm:$0xf] %vm653_vm1, %v598_v59  ;;  %v468_v63 = vadd.f32 %v1088_v34, %v467_v61  ;;  %v508_v0 = vadd.f32 %v1088_v34, %v507_v62  ;;  %v390_v1 = vpop.f32.mrf.mxu0  ;;  %v430_v2 = vpop.f32.mrf.mxu1 }
  0xd7   :  { %679 = vst.msk [vmem:[%s1413_s3 + $0x64] sm:$0xf] %vm653_vm1, %v614_v60  ;;  %v391_v3 = vadd.f32 %v1088_v34, %v390_v1  ;;  %v431_v4 = vadd.f32 %v1088_v34, %v430_v2 }
  0xd8   :  { %v566_v5 = vmax.f32 %v468_v63, 0.0  ;;  %v582_v6 = vmax.f32 %v508_v0, 0.0 }
  0xd9   :  { %v535_v7 = vmax.f32 %v391_v3, 0.0  ;;  %v551_v8 = vmax.f32 %v431_v4, 0.0 }
  0xda   :  { %v630_v9 = vpack.c.bf16 %v566_v5, %v566_v5  ;;  %v646_v10 = vpack.c.bf16 %v582_v6, %v582_v6 }
  0xdb   :  { %v599_v11 = vpack.c.bf16 %v535_v7, %v535_v7  ;;  %v615_v12 = vpack.c.bf16 %v551_v8, %v551_v8 }
  0xdc   :  { %695 = vst.msk [vmem:[%s1413_s3 + $0xa4] sm:$0xf] %vm653_vm1, %v630_v9 }
  0xdd   :  { %711 = vst.msk [vmem:[%s1413_s3 + $0xe4] sm:$0xf] %vm653_vm1, %v646_v10  ;;  %v470_v13 = vpop.f32.mrf.mxu2  ;;  %v510_v14 = vpop.f32.mrf.mxu3 }
  0xde   :  { %664 = vst.msk [vmem:[%s1413_s3 + $0x28] sm:$0xf] %vm653_vm1, %v599_v11  ;;  %v471_v15 = vadd.f32 %v1088_v34, %v470_v13  ;;  %v511_v16 = vadd.f32 %v1088_v34, %v510_v14  ;;  %v392_v17 = vpop.f32.mrf.mxu0  ;;  %v432_v18 = vpop.f32.mrf.mxu1 }
  0xdf   :  { %680 = vst.msk [vmem:[%s1413_s3 + $0x68] sm:$0xf] %vm653_vm1, %v615_v12  ;;  %v393_v19 = vadd.f32 %v1088_v34, %v392_v17  ;;  %v433_v20 = vadd.f32 %v1088_v34, %v432_v18 }
  0xe0   :  { %v567_v21 = vmax.f32 %v471_v15, 0.0  ;;  %v583_v22 = vmax.f32 %v511_v16, 0.0 }
  0xe1   :  { %v536_v23 = vmax.f32 %v393_v19, 0.0  ;;  %v552_v24 = vmax.f32 %v433_v20, 0.0 }
  0xe2   :  { %v631_v25 = vpack.c.bf16 %v567_v21, %v567_v21  ;;  %v647_v26 = vpack.c.bf16 %v583_v22, %v583_v22 }
  0xe3   :  { %v600_v27 = vpack.c.bf16 %v536_v23, %v536_v23  ;;  %v616_v28 = vpack.c.bf16 %v552_v24, %v552_v24 }
  0xe4   :  { %696 = vst.msk [vmem:[%s1413_s3 + $0xa8] sm:$0xf] %vm653_vm1, %v631_v25 }
  0xe5   :  { %712 = vst.msk [vmem:[%s1413_s3 + $0xe8] sm:$0xf] %vm653_vm1, %v647_v26  ;;  %v472_v29 = vpop.f32.mrf.mxu2  ;;  %v512_v30 = vpop.f32.mrf.mxu3 }
  0xe6   :  { %665 = vst.msk [vmem:[%s1413_s3 + $0x2c] sm:$0xf] %vm653_vm1, %v600_v27  ;;  %v473_v31 = vadd.f32 %v1088_v34, %v472_v29  ;;  %v513_v32 = vadd.f32 %v1088_v34, %v512_v30  ;;  %v395_v33 = vpop.f32.mrf.mxu0  ;;  %v435_v35 = vpop.f32.mrf.mxu1 }
  0xe7   :  { %681 = vst.msk [vmem:[%s1413_s3 + $0x6c] sm:$0xf] %vm653_vm1, %v616_v28  ;;  %v396_v36 = vadd.f32 %v1088_v34, %v395_v33  ;;  %v436_v37 = vadd.f32 %v1088_v34, %v435_v35 }
  0xe8   :  { %v568_v38 = vmax.f32 %v473_v31, 0.0  ;;  %v584_v39 = vmax.f32 %v513_v32, 0.0 }
  0xe9   :  { %v537_v40 = vmax.f32 %v396_v36, 0.0  ;;  %v553_v41 = vmax.f32 %v436_v37, 0.0 }
  0xea   :  { %v632_v42 = vpack.c.bf16 %v568_v38, %v568_v38  ;;  %v648_v43 = vpack.c.bf16 %v584_v39, %v584_v39 }
  0xeb   :  { %v601_v44 = vpack.c.bf16 %v537_v40, %v537_v40  ;;  %v617_v45 = vpack.c.bf16 %v553_v41, %v553_v41 }
  0xec   :  { %697 = vst.msk [vmem:[%s1413_s3 + $0xac] sm:$0xf] %vm653_vm1, %v632_v42 }
  0xed   :  { %713 = vst.msk [vmem:[%s1413_s3 + $0xec] sm:$0xf] %vm653_vm1, %v648_v43  ;;  %v475_v46 = vpop.f32.mrf.mxu2  ;;  %v515_v47 = vpop.f32.mrf.mxu3 }
  0xee   :  { %666 = vst.msk [vmem:[%s1413_s3 + $0x30] sm:$0xf] %vm653_vm1, %v601_v44  ;;  %v476_v48 = vadd.f32 %v1088_v34, %v475_v46  ;;  %v516_v49 = vadd.f32 %v1088_v34, %v515_v47  ;;  %v397_v50 = vpop.f32.mrf.mxu0  ;;  %v437_v51 = vpop.f32.mrf.mxu1 }
  0xef   :  { %682 = vst.msk [vmem:[%s1413_s3 + $0x70] sm:$0xf] %vm653_vm1, %v617_v45  ;;  %v398_v52 = vadd.f32 %v1088_v34, %v397_v50  ;;  %v438_v53 = vadd.f32 %v1088_v34, %v437_v51 }
  0xf0   :  { %v569_v54 = vmax.f32 %v476_v48, 0.0  ;;  %v585_v55 = vmax.f32 %v516_v49, 0.0 }
  0xf1   :  { %v538_v56 = vmax.f32 %v398_v52, 0.0  ;;  %v554_v57 = vmax.f32 %v438_v53, 0.0 }
  0xf2   :  { %v633_v58 = vpack.c.bf16 %v569_v54, %v569_v54  ;;  %v649_v59 = vpack.c.bf16 %v585_v55, %v585_v55 }
  0xf3   :  { %v602_v60 = vpack.c.bf16 %v538_v56, %v538_v56  ;;  %v618_v61 = vpack.c.bf16 %v554_v57, %v554_v57 }
  0xf4   :  { %698 = vst.msk [vmem:[%s1413_s3 + $0xb0] sm:$0xf] %vm653_vm1, %v633_v58 }
  0xf5   :  { %714 = vst.msk [vmem:[%s1413_s3 + $0xf0] sm:$0xf] %vm653_vm1, %v649_v59  ;;  %v477_v62 = vpop.f32.mrf.mxu2  ;;  %v517_v63 = vpop.f32.mrf.mxu3 }
  0xf6   :  { %667 = vst.msk [vmem:[%s1413_s3 + $0x34] sm:$0xf] %vm653_vm1, %v602_v60  ;;  %v478_v0 = vadd.f32 %v1088_v34, %v477_v62  ;;  %v518_v1 = vadd.f32 %v1088_v34, %v517_v63  ;;  %v400_v2 = vpop.f32.mrf.mxu0  ;;  %v440_v3 = vpop.f32.mrf.mxu1 }
  0xf7   :  { %683 = vst.msk [vmem:[%s1413_s3 + $0x74] sm:$0xf] %vm653_vm1, %v618_v61  ;;  %v401_v4 = vadd.f32 %v1088_v34, %v400_v2  ;;  %v441_v5 = vadd.f32 %v1088_v34, %v440_v3 }
  0xf8   :  { %v570_v6 = vmax.f32 %v478_v0, 0.0  ;;  %v586_v7 = vmax.f32 %v518_v1, 0.0 }
  0xf9   :  { %v539_v8 = vmax.f32 %v401_v4, 0.0  ;;  %v555_v9 = vmax.f32 %v441_v5, 0.0 }
  0xfa   :  { %v634_v10 = vpack.c.bf16 %v570_v6, %v570_v6  ;;  %v650_v11 = vpack.c.bf16 %v586_v7, %v586_v7 }
  0xfb   :  { %v603_v12 = vpack.c.bf16 %v539_v8, %v539_v8  ;;  %v619_v13 = vpack.c.bf16 %v555_v9, %v555_v9 }
  0xfc   :  { %699 = vst.msk [vmem:[%s1413_s3 + $0xb4] sm:$0xf] %vm653_vm1, %v634_v10 }
  0xfd   :  { %715 = vst.msk [vmem:[%s1413_s3 + $0xf4] sm:$0xf] %vm653_vm1, %v650_v11  ;;  %v480_v14 = vpop.f32.mrf.mxu2  ;;  %v520_v15 = vpop.f32.mrf.mxu3 }
  0xfe   :  { %668 = vst.msk [vmem:[%s1413_s3 + $0x38] sm:$0xf] %vm653_vm1, %v603_v12  ;;  %v481_v16 = vadd.f32 %v1088_v34, %v480_v14  ;;  %v521_v17 = vadd.f32 %v1088_v34, %v520_v15  ;;  %v402_v18 = vpop.f32.mrf.mxu0  ;;  %v442_v19 = vpop.f32.mrf.mxu1 }
  0xff   :  { %684 = vst.msk [vmem:[%s1413_s3 + $0x78] sm:$0xf] %vm653_vm1, %v619_v13  ;;  %v403_v20 = vadd.f32 %v1088_v34, %v402_v18  ;;  %v443_v21 = vadd.f32 %v1088_v34, %v442_v19 }
 0x100   :  { %v571_v22 = vmax.f32 %v481_v16, 0.0  ;;  %v587_v23 = vmax.f32 %v521_v17, 0.0 }
 0x101   :  { %v540_v24 = vmax.f32 %v403_v20, 0.0  ;;  %v556_v25 = vmax.f32 %v443_v21, 0.0 }
 0x102   :  { %v635_v26 = vpack.c.bf16 %v571_v22, %v571_v22  ;;  %v651_v27 = vpack.c.bf16 %v587_v23, %v587_v23 }
 0x103   :  { %v604_v28 = vpack.c.bf16 %v540_v24, %v540_v24  ;;  %v620_v29 = vpack.c.bf16 %v556_v25, %v556_v25 }
 0x104   :  { %700 = vst.msk [vmem:[%s1413_s3 + $0xb8] sm:$0xf] %vm653_vm1, %v635_v26 }
 0x105   :  { %716 = vst.msk [vmem:[%s1413_s3 + $0xf8] sm:$0xf] %vm653_vm1, %v651_v27  ;;  %v482_v30 = vpop.f32.mrf.mxu2  ;;  %v522_v31 = vpop.f32.mrf.mxu3 }
 0x106   :  { %669 = vst.msk [vmem:[%s1413_s3 + $0x3c] sm:$0xf] %vm653_vm1, %v604_v28  ;;  %v483_v32 = vadd.f32 %v1088_v34, %v482_v30  ;;  %v523_v33 = vadd.f32 %v1088_v34, %v522_v31 }
 0x107   :  { %685 = vst.msk [vmem:[%s1413_s3 + $0x7c] sm:$0xf] %vm653_vm1, %v620_v29 }
 0x108   :  { %v572_v35 = vmax.f32 %v483_v32, 0.0  ;;  %v588_v36 = vmax.f32 %v523_v33, 0.0 }
 0x10a   :  { %v636_v37 = vpack.c.bf16 %v572_v35, %v572_v35  ;;  %v652_v38 = vpack.c.bf16 %v588_v36, %v588_v36 }
 0x10c   :  { %701 = vst.msk [vmem:[%s1413_s3 + $0xbc] sm:$0xf] %vm653_vm1, %v636_v37 }
 0x10d   :  { %717 = vst.msk [vmem:[%s1413_s3 + $0xfc] sm:$0xf] %vm653_vm1, %v652_v38 }

// kernel: dqn_forward.6
= control target key start
LH: loop header
LB: loop body
LE: loop exit
PB: predicated region body
PF: predicated region fallthrough
CT: control target
= control target key end

     0   :  { %vm315_vm0 = vcmask 261120   ;;  %vm519_vm1 = vcmask 519168   ;;  %s1086_s1 = inlined_call_operand.vmem [shape: bf16[288,64], index: 1, kind: input, shape index: {}]   ;;  %s1087_s0 = inlined_call_operand.vmem [shape: bf16[128,288], index: 0, kind: input, shape index: {}]   ;;  %s1088_s2 = inlined_call_operand.vmem [shape: f32[1,64], index: 2, kind: input, shape index: {}]   ;;  %s1089_s3 = inlined_call_operand.vmem [shape: bf16[128,64], index: 3, kind: output, shape index: {}]  }
   0x1   :  { %v747_v0 = vld [vmem:[%s1086_s1 + $0x38] sm:$0xff]  ;;  %v757_v1 = vld [vmem:[%s1086_s1 + $0x88] sm:$0xff]  ;;  %v746_v3 = vld [vmem:[%s1086_s1 + $0x30] sm:$0xff] }
   0x2   :  { %v755_v2 = vld [vmem:[%s1086_s1 + $0x78] sm:$0xff]  ;;  %340 = vmatpush.bf16.msra.mxu0 %v747_v0  ;;  %758 = vmatpush.bf16.msra.mxu3 %v747_v0  ;;  %v756_v4 = vld [vmem:[%s1086_s1 + $0x80] sm:$0xff]  ;;  %v754_v5 = vld [vmem:[%s1086_s1 + $0x70] sm:$0xff] }
   0x3   :  { %444 = vmatpush.bf16.msra.mxu2 %v757_v1  ;;  %389 = vmatpush.bf16.msra.mxu1 %v755_v2  ;;  %v550_v6 = vld [vmem:[%s1087_s0 + $0x8] sm:$0xf]  ;;  %v718_v7 = vld [vmem:[%s1087_s0 + $0x10] sm:$0xf0]  ;;  %v744_v11 = vld [vmem:[%s1086_s1 + $0x20] sm:$0xff] }
   0x4   :  { %v551_v8 = vor.u32 %v718_v7, %v550_v6  ;;  %v745_v9 = vld [vmem:[%s1086_s1 + $0x28] sm:$0xff]  ;;  %v752_v12 = vld [vmem:[%s1086_s1 + $0x60] sm:$0xff]  ;;  %v743_v13 = vld [vmem:[%s1086_s1 + $0x18] sm:$0xff] }
   0x5   :  { %v753_v10 = vld [vmem:[%s1086_s1 + $0x68] sm:$0xff]  ;;  %v751_v14 = vld [vmem:[%s1086_s1 + $0x58] sm:$0xff]  ;;  %v742_v15 = vld [vmem:[%s1086_s1 + $0x10] sm:$0xff] }
   0x6   :  { %341 = vmatpush.bf16.msra.mxu0 %v746_v3  ;;  %759 = vmatpush.bf16.msra.mxu3 %v746_v3  ;;  %v750_v16 = vld [vmem:[%s1086_s1 + $0x50] sm:$0xff]  ;;  %v562_v17 = vld [vmem:[%s1087_s0 + $0x20] sm:$0xf]  ;;  %v721_v18 = vld [vmem:[%s1087_s0 + $0x28] sm:$0xf0] }
   0x7   :  { %445 = vmatpush.bf16.msra.mxu2 %v756_v4  ;;  %390 = vmatpush.bf16.msra.mxu1 %v754_v5  ;;  %v563_v19 = vor.u32 %v721_v18, %v562_v17  ;;  %v741_v20 = vld [vmem:[%s1086_s1 + $0x8] sm:$0xff]  ;;  %v740_v22 = vld [vmem:[%s1086_s1] sm:$0xff]  ;;  %v614_v26 = vld [vmem:[%s1087_s0 + $0x90] sm:$0xf] }
   0x8   :  { %v749_v21 = vld [vmem:[%s1086_s1 + $0x48] sm:$0xff]  ;;  %v748_v23 = vld [vmem:[%s1086_s1 + $0x40] sm:$0xff]  ;;  %v735_v27 = vld [vmem:[%s1087_s0 + $0x98] sm:$0xf0] }
   0x9   :  { %v542_v24 = vld [vmem:[%s1087_s0] sm:$0xf]  ;;  %v717_v25 = vld [vmem:[%s1087_s0 + $0x8] sm:$0xf0]  ;;  %v716_v28 = vld [vmem:[%s1087_s0 + $0x4] sm:$0xf]  ;;  %v615_v31 = vor.u32 %v735_v27, %v614_v26 }
   0xa   :  { %708 = vmatmul.msk.bf16.vlgmr.msra.gmra.mxu2 %vm315_vm0, %v551_v8  ;;  %342 = vmatpush.bf16.msra.mxu0 %v745_v9  ;;  %v544_v29 = vld [vmem:[%s1087_s0 + $0xc] sm:$0xf0]  ;;  %v543_v30 = vor.u32 %v717_v25, %v542_v24  ;;  %v574_v33 = vld [vmem:[%s1087_s0 + $0x38] sm:$0xf]  ;;  %v724_v34 = vld [vmem:[%s1087_s0 + $0x40] sm:$0xf0] }
   0xb   :  { %760 = vmatpush.bf16.msra.mxu3 %v745_v9  ;;  %391 = vmatpush.bf16.msra.mxu1 %v753_v10  ;;  %v547_v32 = vor.u32 %v716_v28, %v544_v29  ;;  %v575_v35 = vor.u32 %v724_v34, %v574_v33  ;;  %v554_v36 = vld [vmem:[%s1087_s0 + $0x18] sm:$0xf]  ;;  %v720_v37 = vld [vmem:[%s1087_s0 + $0x20] sm:$0xf0]  ;;  %v626_v38 = vld [vmem:[%s1087_s0 + $0xa8] sm:$0xf] }
   0xc   :  { %v738_v39 = vld [vmem:[%s1087_s0 + $0xb0] sm:$0xf0]  ;;  %v719_v40 = vld [vmem:[%s1087_s0 + $0x1c] sm:$0xf]  ;;  %v556_v41 = vld [vmem:[%s1087_s0 + $0x24] sm:$0xf0]  ;;  %v555_v42 = vor.u32 %v720_v37, %v554_v36 }
   0xd   :  { %v627_v43 = vor.u32 %v738_v39, %v626_v38  ;;  %v559_v44 = vor.u32 %v719_v40, %v556_v41  ;;  %v586_v45 = vld [vmem:[%s1087_s0 + $0x50] sm:$0xf]  ;;  %v727_v46 = vld [vmem:[%s1087_s0 + $0x58] sm:$0xf0]  ;;  %v734_v50 = vld [vmem:[%s1087_s0 + $0x94] sm:$0xf] }
   0xe   :  { %343 = vmatpush.bf16.msra.mxu0 %v744_v11  ;;  %v587_v47 = vor.u32 %v727_v46, %v586_v45  ;;  %v566_v48 = vld [vmem:[%s1087_s0 + $0x30] sm:$0xf]  ;;  %v723_v49 = vld [vmem:[%s1087_s0 + $0x38] sm:$0xf0]  ;;  %v616_v51 = vld [vmem:[%s1087_s0 + $0x9c] sm:$0xf0] }
   0xf   :  { %761 = vmatpush.bf16.msra.mxu3 %v744_v11  ;;  %392 = vmatpush.bf16.msra.mxu1 %v752_v12  ;;  %v722_v52 = vld [vmem:[%s1087_s0 + $0x34] sm:$0xf]  ;;  %v568_v53 = vld [vmem:[%s1087_s0 + $0x3c] sm:$0xf0]  ;;  %v567_v54 = vor.u32 %v723_v49, %v566_v48  ;;  %v619_v55 = vor.u32 %v734_v50, %v616_v51  ;;  %v598_v57 = vld [vmem:[%s1087_s0 + $0x68] sm:$0xf] }
  0x10   :  { %v571_v56 = vor.u32 %v722_v52, %v568_v53  ;;  %v730_v58 = vld [vmem:[%s1087_s0 + $0x70] sm:$0xf0]  ;;  %v578_v60 = vld [vmem:[%s1087_s0 + $0x48] sm:$0xf]  ;;  %v737_v62 = vld [vmem:[%s1087_s0 + $0xac] sm:$0xf] }
  0x11   :  { %v599_v59 = vor.u32 %v730_v58, %v598_v57  ;;  %v726_v61 = vld [vmem:[%s1087_s0 + $0x50] sm:$0xf0]  ;;  %v628_v63 = vld [vmem:[%s1087_s0 + $0xb4] sm:$0xf0]  ;;  %v725_v0 = vld [vmem:[%s1087_s0 + $0x4c] sm:$0xf] }
  0x12   :  { %344 = vmatpush.bf16.msra.mxu0 %v743_v13  ;;  %v580_v1 = vld [vmem:[%s1087_s0 + $0x54] sm:$0xf0]  ;;  %v631_v3 = vor.u32 %v737_v62, %v628_v63  ;;  %v733_v6 = vld [vmem:[%s1087_s0 + $0x88] sm:$0xf0]  ;;  %v590_v8 = vld [vmem:[%s1087_s0 + $0x60] sm:$0xf] }
  0x13   :  { %762 = vmatpush.bf16.msra.mxu3 %v743_v13  ;;  %393 = vmatpush.bf16.msra.mxu1 %v751_v14  ;;  %v583_v4 = vor.u32 %v725_v0, %v580_v1  ;;  %v729_v9 = vld [vmem:[%s1087_s0 + $0x68] sm:$0xf0]  ;;  %v592_v11 = vld [vmem:[%s1087_s0 + $0x6c] sm:$0xf0]  ;;  %v602_v17 = vld [vmem:[%s1087_s0 + $0x78] sm:$0xf] }
  0x14   :  { %v732_v18 = vld [vmem:[%s1087_s0 + $0x80] sm:$0xf0]  ;;  %v739_v24 = vld [vmem:[%s1087_s0 + $0xb8] sm:$0xf0]  ;;  %v1004_v28 = vld [vmem:[%s1088_s2] ss:$0 sm:$0xff] }
  0x16   :  { %345 = vmatpush.bf16.msra.mxu0 %v742_v15 }
  0x17   :  { %763 = vmatpush.bf16.msra.mxu3 %v742_v15  ;;  %394 = vmatpush.bf16.msra.mxu1 %v750_v16  ;;  %v736_v15 = vld [vmem:[%s1087_s0 + $0xa0] sm:$0xf0] }
  0x1a   :  { %709 = vmatmul.msk.bf16.gmra.mxu2 %vm315_vm0, %v563_v19  ;;  %346 = vmatpush.bf16.msra.mxu0 %v741_v20  ;;  %v731_v19 = vld [vmem:[%s1087_s0 + $0x7c] sm:$0xf] }
  0x1b   :  { %764 = vmatpush.bf16.msra.mxu3 %v741_v20  ;;  %395 = vmatpush.bf16.msra.mxu1 %v749_v21  ;;  %v604_v20 = vld [vmem:[%s1087_s0 + $0x84] sm:$0xf0] }
  0x1e   :  { %347 = vmatpush.bf16.msra.mxu0 %v740_v22 }
  0x1f   :  { %765 = vmatpush.bf16.msra.mxu3 %v740_v22  ;;  %396 = vmatpush.bf16.msra.mxu1 %v748_v23  ;;  %v607_v22 = vor.u32 %v731_v19, %v604_v20 }
  0x21   :  { %348 = vmatmul.bf16.vlgmr.msra.gmra.mxu0 %v543_v30 }
  0x22   :  { %378 = vmatmul.bf16.vlgmr.msra.gmra.mxu3 %v615_v31  ;;  %397 = vmatmul.bf16.vlgmr.msra.gmra.mxu1 %v547_v32 }
  0x23   :  { %766 = vmatpush.bf16.msrb.mxu3 %v755_v2  ;;  %v579_v2 = vor.u32 %v726_v61, %v578_v60 }
  0x27   :  { %767 = vmatpush.bf16.msrb.mxu3 %v754_v5  ;;  %v610_v5 = vld [vmem:[%s1087_s0 + $0x80] sm:$0xf] }
  0x28   :  { %v611_v7 = vor.u32 %v733_v6, %v610_v5 }
  0x2a   :  { %710 = vmatmul.msk.bf16.gmra.mxu2 %vm315_vm0, %v575_v35 }
  0x2b   :  { %768 = vmatpush.bf16.msrb.mxu3 %v753_v10  ;;  %v728_v10 = vld [vmem:[%s1087_s0 + $0x64] sm:$0xf] }
  0x2c   :  { %v595_v13 = vor.u32 %v728_v10, %v592_v11 }
  0x2f   :  { %769 = vmatpush.bf16.msrb.mxu3 %v752_v12  ;;  %v591_v12 = vor.u32 %v729_v9, %v590_v8 }
  0x31   :  { %353 = vmatmul.bf16.gmra.mxu0 %v555_v42 }
  0x32   :  { %383 = vmatmul.bf16.gmra.mxu3 %v627_v43  ;;  %402 = vmatmul.bf16.gmra.mxu1 %v559_v44 }
  0x33   :  { %770 = vmatpush.bf16.msrb.mxu3 %v751_v14  ;;  %v622_v14 = vld [vmem:[%s1087_s0 + $0x98] sm:$0xf] }
  0x37   :  { %771 = vmatpush.bf16.msrb.mxu3 %v750_v16  ;;  %v623_v16 = vor.u32 %v736_v15, %v622_v14 }
  0x3a   :  { %711 = vmatmul.msk.bf16.gmra.mxu2 %vm315_vm0, %v587_v47 }
  0x3b   :  { %772 = vmatpush.bf16.msrb.mxu3 %v749_v21  ;;  %v603_v21 = vor.u32 %v732_v18, %v602_v17 }
  0x3f   :  { %773 = vmatpush.bf16.msrb.mxu3 %v748_v23  ;;  %v634_v23 = vld [vmem:[%s1087_s0 + $0xb0] sm:$0xf] }
  0x40   :  { %v635_v25 = vor.u32 %v739_v24, %v634_v23 }
  0x41   :  { %358 = vmatmul.bf16.gmra.mxu0 %v567_v54 }
  0x42   :  { %427 = vmatmul.bf16.vlgmr.msrb.gmra.mxu3 %v619_v55  ;;  %407 = vmatmul.bf16.gmra.mxu1 %v571_v56 }
  0x4a   :  { %712 = vmatmul.msk.bf16.gmra.mxu2 %vm315_vm0, %v599_v59 }
  0x51   :  { %363 = vmatmul.bf16.gmra.mxu0 %v579_v2 }
  0x52   :  { %432 = vmatmul.bf16.gmra.mxu3 %v631_v3  ;;  %412 = vmatmul.bf16.gmra.mxu1 %v583_v4 }
  0x5a   :  { %713 = vmatmul.msk.bf16.gmra.mxu2 %vm315_vm0, %v611_v7 }
  0x61   :  { %368 = vmatmul.bf16.gmra.mxu0 %v591_v12 }
  0x62   :  { %417 = vmatmul.bf16.gmra.mxu1 %v595_v13 }
  0x6a   :  { %714 = vmatmul.msk.bf16.gmra.mxu2 %vm315_vm0, %v623_v16 }
  0x71   :  { %373 = vmatmul.bf16.gmra.mxu0 %v603_v21 }
  0x72   :  { %422 = vmatmul.bf16.gmra.mxu1 %v607_v22 }
  0x7a   :  { %715 = vmatmul.msk.bf16.gmra.mxu2 %vm315_vm0, %v635_v25 }
  0x8d   :  { %v447_v26 = vpop.f32.mrf.mxu2 }
  0x95   :  { %v449_v27 = vpop.f32.mrf.mxu2 }
  0x9d   :  { %v452_v29 = vpop.f32.mrf.mxu2 }
  0x9e   :  { %v349_v30 = vpop.f32.mrf.mxu0 }
  0x9f   :  { %v350_v31 = vadd.f32 %v1004_v28, %v349_v30  ;;  %v398_v32 = vpop.f32.mrf.mxu1 }
  0xa1   :  { %v399_v33 = vadd.f32 %v398_v32, %v350_v31 }
  0xa3   :  { %v448_v34 = vadd.f32 %v447_v26, %v399_v33 }
  0xa5   :  { %v487_v35 = vmax.f32 %v448_v34, 0.0  ;;  %v454_v36 = vpop.f32.mrf.mxu2  ;;  %v379_v58 = vpop.f32.mrf.mxu3 }
  0xa6   :  { %v351_v37 = vpop.f32.mrf.mxu0 }
  0xa7   :  { %v503_v38 = vpack.c.bf16 %v487_v35, %v487_v35  ;;  %v352_v39 = vadd.f32 %v1004_v28, %v351_v37  ;;  %v400_v40 = vpop.f32.mrf.mxu1 }
  0xa9   :  { %520 = vst.msk [vmem:[%s1089_s3] sm:$0xf] %vm519_vm1, %v503_v38  ;;  %v401_v41 = vadd.f32 %v400_v40, %v352_v39 }
  0xab   :  { %v450_v42 = vadd.f32 %v449_v27, %v401_v41 }
  0xad   :  { %v488_v43 = vmax.f32 %v450_v42, 0.0  ;;  %v457_v44 = vpop.f32.mrf.mxu2  ;;  %v381_v4 = vpop.f32.mrf.mxu3 }
  0xae   :  { %v354_v45 = vpop.f32.mrf.mxu0 }
  0xaf   :  { %v504_v46 = vpack.c.bf16 %v488_v43, %v488_v43  ;;  %v355_v47 = vadd.f32 %v1004_v28, %v354_v45  ;;  %v403_v48 = vpop.f32.mrf.mxu1 }
  0xb1   :  { %521 = vst.msk [vmem:[%s1089_s3 + $0x4] sm:$0xf] %vm519_vm1, %v504_v46  ;;  %v404_v49 = vadd.f32 %v403_v48, %v355_v47  ;;  %v380_v47 = vadd.f32 %v1004_v28, %v379_v58 }
  0xb3   :  { %v453_v50 = vadd.f32 %v452_v29, %v404_v49 }
  0xb5   :  { %v489_v51 = vmax.f32 %v453_v50, 0.0  ;;  %v459_v52 = vpop.f32.mrf.mxu2  ;;  %v384_v16 = vpop.f32.mrf.mxu3 }
  0xb6   :  { %v356_v53 = vpop.f32.mrf.mxu0 }
  0xb7   :  { %v505_v54 = vpack.c.bf16 %v489_v51, %v489_v51  ;;  %v357_v55 = vadd.f32 %v1004_v28, %v356_v53  ;;  %v405_v56 = vpop.f32.mrf.mxu1 }
  0xb9   :  { %522 = vst.msk [vmem:[%s1089_s3 + $0x8] sm:$0xf] %vm519_vm1, %v505_v54  ;;  %v406_v57 = vadd.f32 %v405_v56, %v357_v55 }
  0xbb   :  { %v455_v59 = vadd.f32 %v454_v36, %v406_v57 }
  0xbd   :  { %v490_v60 = vmax.f32 %v455_v59, 0.0  ;;  %v462_v61 = vpop.f32.mrf.mxu2  ;;  %v386_v29 = vpop.f32.mrf.mxu3 }
  0xbe   :  { %v359_v62 = vpop.f32.mrf.mxu0 }
  0xbf   :  { %v506_v63 = vpack.c.bf16 %v490_v60, %v490_v60  ;;  %v360_v0 = vadd.f32 %v1004_v28, %v359_v62  ;;  %v408_v1 = vpop.f32.mrf.mxu1  ;;  %v382_v60 = vadd.f32 %v1004_v28, %v381_v4 }
  0xc1   :  { %523 = vst.msk [vmem:[%s1089_s3 + $0xc] sm:$0xf] %vm519_vm1, %v506_v63  ;;  %v409_v2 = vadd.f32 %v408_v1, %v360_v0 }
  0xc3   :  { %v458_v3 = vadd.f32 %v457_v44, %v409_v2 }
  0xc5   :  { %v491_v5 = vmax.f32 %v458_v3, 0.0  ;;  %v464_v6 = vpop.f32.mrf.mxu2  ;;  %v428_v39 = vpop.f32.mrf.mxu3 }
  0xc6   :  { %v361_v7 = vpop.f32.mrf.mxu0  ;;  %v429_v50 = vadd.f32 %v428_v39, %v380_v47 }
  0xc7   :  { %v507_v8 = vpack.c.bf16 %v491_v5, %v491_v5  ;;  %v362_v9 = vadd.f32 %v1004_v28, %v361_v7  ;;  %v410_v10 = vpop.f32.mrf.mxu1 }
  0xc9   :  { %524 = vst.msk [vmem:[%s1089_s3 + $0x10] sm:$0xf] %vm519_vm1, %v507_v8  ;;  %v411_v11 = vadd.f32 %v410_v10, %v362_v9  ;;  %v385_v9 = vadd.f32 %v1004_v28, %v384_v16  ;;  %v387_v16 = vadd.f32 %v1004_v28, %v386_v29 }
  0xcb   :  { %v460_v12 = vadd.f32 %v459_v52, %v411_v11 }
  0xcd   :  { %v492_v13 = vmax.f32 %v460_v12, 0.0  ;;  %v467_v14 = vpop.f32.mrf.mxu2  ;;  %v430_v51 = vpop.f32.mrf.mxu3 }
  0xce   :  { %v364_v15 = vpop.f32.mrf.mxu0  ;;  %v431_v0 = vadd.f32 %v430_v51, %v382_v60 }
  0xcf   :  { %v508_v17 = vpack.c.bf16 %v492_v13, %v492_v13  ;;  %v365_v18 = vadd.f32 %v1004_v28, %v364_v15  ;;  %v413_v19 = vpop.f32.mrf.mxu1 }
  0xd1   :  { %525 = vst.msk [vmem:[%s1089_s3 + $0x14] sm:$0xf] %vm519_vm1, %v508_v17  ;;  %v414_v20 = vadd.f32 %v413_v19, %v365_v18 }
  0xd3   :  { %v463_v21 = vadd.f32 %v462_v61, %v414_v20 }
  0xd5   :  { %v493_v22 = vmax.f32 %v463_v21, 0.0  ;;  %v469_v23 = vpop.f32.mrf.mxu2  ;;  %v433_v4 = vpop.f32.mrf.mxu3 }
  0xd6   :  { %v366_v24 = vpop.f32.mrf.mxu0 }
  0xd7   :  { %v509_v25 = vpack.c.bf16 %v493_v22, %v493_v22  ;;  %v367_v26 = vadd.f32 %v1004_v28, %v366_v24  ;;  %v415_v27 = vpop.f32.mrf.mxu1 }
  0xd9   :  { %526 = vst.msk [vmem:[%s1089_s3 + $0x18] sm:$0xf] %vm519_vm1, %v509_v25  ;;  %v416_v30 = vadd.f32 %v415_v27, %v367_v26 }
  0xdb   :  { %v465_v31 = vadd.f32 %v464_v6, %v416_v30 }
  0xdd   :  { %v494_v32 = vmax.f32 %v465_v31, 0.0  ;;  %v472_v33 = vpop.f32.mrf.mxu2  ;;  %v435_v21 = vpop.f32.mrf.mxu3 }
  0xde   :  { %v369_v34 = vpop.f32.mrf.mxu0 }
  0xdf   :  { %v510_v35 = vpack.c.bf16 %v494_v32, %v494_v32  ;;  %v370_v36 = vadd.f32 %v1004_v28, %v369_v34  ;;  %v418_v37 = vpop.f32.mrf.mxu1 }
  0xe1   :  { %527 = vst.msk [vmem:[%s1089_s3 + $0x1c] sm:$0xf] %vm519_vm1, %v510_v35  ;;  %v419_v38 = vadd.f32 %v418_v37, %v370_v36 }
  0xe3   :  { %v468_v40 = vadd.f32 %v467_v14, %v419_v38  ;;  %v434_v14 = vadd.f32 %v433_v4, %v385_v9 }
  0xe5   :  { %v495_v41 = vmax.f32 %v468_v40, 0.0  ;;  %v474_v42 = vpop.f32.mrf.mxu2 }
  0xe6   :  { %v371_v43 = vpop.f32.mrf.mxu0 }
  0xe7   :  { %v511_v44 = vpack.c.bf16 %v495_v41, %v495_v41  ;;  %v372_v45 = vadd.f32 %v1004_v28, %v371_v43  ;;  %v420_v46 = vpop.f32.mrf.mxu1 }
  0xe9   :  { %528 = vst.msk [vmem:[%s1089_s3 + $0x20] sm:$0xf] %vm519_vm1, %v511_v44  ;;  %v421_v48 = vadd.f32 %v420_v46, %v372_v45 }
  0xeb   :  { %v470_v49 = vadd.f32 %v469_v23, %v421_v48  ;;  %v436_v23 = vadd.f32 %v435_v21, %v387_v16 }
  0xed   :  { %v496_v52 = vmax.f32 %v470_v49, 0.0  ;;  %v477_v53 = vpop.f32.mrf.mxu2 }
  0xee   :  { %v478_v54 = vadd.f32 %v477_v53, %v429_v50  ;;  %v374_v55 = vpop.f32.mrf.mxu0 }
  0xef   :  { %v512_v56 = vpack.c.bf16 %v496_v52, %v496_v52  ;;  %v375_v57 = vadd.f32 %v1004_v28, %v374_v55  ;;  %v423_v59 = vpop.f32.mrf.mxu1 }
  0xf0   :  { %v499_v58 = vmax.f32 %v478_v54, 0.0 }
  0xf1   :  { %529 = vst.msk [vmem:[%s1089_s3 + $0x24] sm:$0xf] %vm519_vm1, %v512_v56  ;;  %v424_v61 = vadd.f32 %v423_v59, %v375_v57 }
  0xf2   :  { %v515_v62 = vpack.c.bf16 %v499_v58, %v499_v58 }
  0xf3   :  { %v473_v63 = vadd.f32 %v472_v33, %v424_v61 }
  0xf4   :  { %532 = vst.msk [vmem:[%s1089_s3 + $0x30] sm:$0xf] %vm519_vm1, %v515_v62 }
  0xf5   :  { %v497_v1 = vmax.f32 %v473_v63, 0.0  ;;  %v479_v2 = vpop.f32.mrf.mxu2 }
  0xf6   :  { %v480_v3 = vadd.f32 %v479_v2, %v431_v0  ;;  %v376_v5 = vpop.f32.mrf.mxu0 }
  0xf7   :  { %v513_v6 = vpack.c.bf16 %v497_v1, %v497_v1  ;;  %v377_v7 = vadd.f32 %v1004_v28, %v376_v5  ;;  %v425_v8 = vpop.f32.mrf.mxu1 }
  0xf8   :  { %v500_v10 = vmax.f32 %v480_v3, 0.0 }
  0xf9   :  { %530 = vst.msk [vmem:[%s1089_s3 + $0x28] sm:$0xf] %vm519_vm1, %v513_v6  ;;  %v426_v11 = vadd.f32 %v425_v8, %v377_v7 }
  0xfa   :  { %v516_v12 = vpack.c.bf16 %v500_v10, %v500_v10 }
  0xfb   :  { %v475_v13 = vadd.f32 %v474_v42, %v426_v11 }
  0xfc   :  { %533 = vst.msk [vmem:[%s1089_s3 + $0x34] sm:$0xf] %vm519_vm1, %v516_v12 }
  0xfd   :  { %v498_v15 = vmax.f32 %v475_v13, 0.0  ;;  %v482_v17 = vpop.f32.mrf.mxu2 }
  0xfe   :  { %v483_v18 = vadd.f32 %v482_v17, %v434_v14 }
  0xff   :  { %v514_v19 = vpack.c.bf16 %v498_v15, %v498_v15 }
 0x100   :  { %v501_v20 = vmax.f32 %v483_v18, 0.0 }
 0x101   :  { %531 = vst.msk [vmem:[%s1089_s3 + $0x2c] sm:$0xf] %vm519_vm1, %v514_v19 }
 0x102   :  { %v517_v22 = vpack.c.bf16 %v501_v20, %v501_v20 }
 0x104   :  { %534 = vst.msk [vmem:[%s1089_s3 + $0x38] sm:$0xf] %vm519_vm1, %v517_v22 }
 0x105   :  { %v484_v24 = vpop.f32.mrf.mxu2 }
 0x106   :  { %v485_v25 = vadd.f32 %v484_v24, %v436_v23 }
 0x108   :  { %v502_v26 = vmax.f32 %v485_v25, 0.0 }
 0x10a   :  { %v518_v27 = vpack.c.bf16 %v502_v26, %v502_v26 }
 0x10c   :  { %535 = vst.msk [vmem:[%s1089_s3 + $0x3c] sm:$0xf] %vm519_vm1, %v518_v27 }

// kernel: dqn_forward.7
= control target key start
LH: loop header
LB: loop body
LE: loop exit
PB: predicated region body
PF: predicated region fallthrough
CT: control target
= control target key end

     0   :  { %vm369_vm0 = vcmask 523264   ;;  %s932_s1 = inlined_call_operand.vmem [shape: bf16[576,128], index: 1, kind: input, shape index: {}]   ;;  %s933_s2 = inlined_call_operand.vmem [shape: f32[1,128], index: 2, kind: input, shape index: {}]   ;;  %s934_s0 = inlined_call_operand.vmem [shape: bf16[32,576], index: 0, kind: input, shape index: {}]   ;;  %s935_s3 = inlined_call_operand.vmem [shape: bf16[32,128], index: 3, kind: output, shape index: {}]  }
   0x1   :  { %v690_v0 = vld [vmem:[%s932_s1 + $0x38] sm:$0xff]  ;;  %v689_v4 = vld [vmem:[%s932_s1 + $0x30] sm:$0xff]  ;;  %v688_v8 = vld [vmem:[%s932_s1 + $0x28] sm:$0xff] }
   0x2   :  { %v698_v1 = vld [vmem:[%s932_s1 + $0x78] sm:$0xff]  ;;  %376 = vmatpush.bf16.msra.mxu0 %v690_v0  ;;  %v697_v5 = vld [vmem:[%s932_s1 + $0x70] sm:$0xff]  ;;  %v696_v9 = vld [vmem:[%s932_s1 + $0x68] sm:$0xff] }
   0x3   :  { %v706_v2 = vld [vmem:[%s932_s1 + $0xb8] sm:$0xff]  ;;  %395 = vmatpush.bf16.msra.mxu1 %v698_v1  ;;  %v705_v6 = vld [vmem:[%s932_s1 + $0xb0] sm:$0xff]  ;;  %v704_v10 = vld [vmem:[%s932_s1 + $0xa8] sm:$0xff] }
   0x4   :  { %v714_v3 = vld [vmem:[%s932_s1 + $0xf8] sm:$0xff]  ;;  %414 = vmatpush.bf16.msra.mxu2 %v706_v2  ;;  %v713_v7 = vld [vmem:[%s932_s1 + $0xf0] sm:$0xff]  ;;  %v712_v11 = vld [vmem:[%s932_s1 + $0xe8] sm:$0xff] }
   0x5   :  { %433 = vmatpush.bf16.msra.mxu3 %v714_v3  ;;  %v687_v12 = vld [vmem:[%s932_s1 + $0x20] sm:$0xff]  ;;  %v686_v16 = vld [vmem:[%s932_s1 + $0x18] sm:$0xff]  ;;  %v685_v20 = vld [vmem:[%s932_s1 + $0x10] sm:$0xff] }
   0x6   :  { %377 = vmatpush.bf16.msra.mxu0 %v689_v4  ;;  %v695_v13 = vld [vmem:[%s932_s1 + $0x60] sm:$0xff]  ;;  %v694_v17 = vld [vmem:[%s932_s1 + $0x58] sm:$0xff]  ;;  %v693_v21 = vld [vmem:[%s932_s1 + $0x50] sm:$0xff] }
   0x7   :  { %396 = vmatpush.bf16.msra.mxu1 %v697_v5  ;;  %v703_v14 = vld [vmem:[%s932_s1 + $0xa0] sm:$0xff]  ;;  %v702_v18 = vld [vmem:[%s932_s1 + $0x98] sm:$0xff]  ;;  %v701_v22 = vld [vmem:[%s932_s1 + $0x90] sm:$0xff] }
   0x8   :  { %415 = vmatpush.bf16.msra.mxu2 %v705_v6  ;;  %v711_v15 = vld [vmem:[%s932_s1 + $0xe0] sm:$0xff]  ;;  %v710_v19 = vld [vmem:[%s932_s1 + $0xd8] sm:$0xff]  ;;  %v709_v23 = vld [vmem:[%s932_s1 + $0xd0] sm:$0xff] }
   0x9   :  { %434 = vmatpush.bf16.msra.mxu3 %v713_v7  ;;  %v684_v24 = vld [vmem:[%s932_s1 + $0x8] sm:$0xff]  ;;  %v683_v28 = vld [vmem:[%s932_s1] sm:$0xff]  ;;  %v675_v33 = vld [vmem:[%s934_s0 + $0x10] sm:$0xf0] }
   0xa   :  { %378 = vmatpush.bf16.msra.mxu0 %v688_v8  ;;  %v692_v25 = vld [vmem:[%s932_s1 + $0x48] sm:$0xff]  ;;  %v691_v29 = vld [vmem:[%s932_s1 + $0x40] sm:$0xff]  ;;  %v491_v35 = vld [vmem:[%s934_s0 + $0x14] sm:$0xf0] }
   0xb   :  { %397 = vmatpush.bf16.msra.mxu1 %v696_v9  ;;  %v700_v26 = vld [vmem:[%s932_s1 + $0x88] sm:$0xff]  ;;  %v699_v30 = vld [vmem:[%s932_s1 + $0x80] sm:$0xff]  ;;  %v676_v37 = vld [vmem:[%s934_s0 + $0x18] sm:$0xf0] }
   0xc   :  { %416 = vmatpush.bf16.msra.mxu2 %v704_v10  ;;  %v708_v27 = vld [vmem:[%s932_s1 + $0xc8] sm:$0xff]  ;;  %v707_v31 = vld [vmem:[%s932_s1 + $0xc0] sm:$0xff]  ;;  %v718_v40 = vld [vmem:[%s932_s1 + $0x118] sm:$0xff] }
   0xd   :  { %435 = vmatpush.bf16.msra.mxu3 %v712_v11  ;;  %v489_v32 = vld [vmem:[%s934_s0] sm:$0xf]  ;;  %v673_v34 = vld [vmem:[%s934_s0 + $0x4] sm:$0xf]  ;;  %v497_v36 = vld [vmem:[%s934_s0 + $0x8] sm:$0xf] }
   0xe   :  { %379 = vmatpush.bf16.msra.mxu0 %v687_v12  ;;  %v674_v38 = vld [vmem:[%s934_s0 + $0xc] sm:$0xf]  ;;  %v499_v39 = vld [vmem:[%s934_s0 + $0x1c] sm:$0xf0]  ;;  %v490_v41 = vor.u32 %v675_v33, %v489_v32  ;;  %v494_v42 = vor.u32 %v673_v34, %v491_v35  ;;  %v498_v43 = vor.u32 %v676_v37, %v497_v36  ;;  %v717_v45 = vld [vmem:[%s932_s1 + $0x110] sm:$0xff] }
   0xf   :  { %398 = vmatpush.bf16.msra.mxu1 %v695_v13  ;;  %v502_v44 = vor.u32 %v674_v38, %v499_v39  ;;  %v716_v46 = vld [vmem:[%s932_s1 + $0x108] sm:$0xff]  ;;  %v715_v47 = vld [vmem:[%s932_s1 + $0x100] sm:$0xff]  ;;  %v680_v49 = vld [vmem:[%s934_s0 + $0x38] sm:$0xf0] }
  0x10   :  { %417 = vmatpush.bf16.msra.mxu2 %v703_v14  ;;  %v509_v48 = vld [vmem:[%s934_s0 + $0x28] sm:$0xf]  ;;  %v678_v50 = vld [vmem:[%s934_s0 + $0x2c] sm:$0xf]  ;;  %v511_v51 = vld [vmem:[%s934_s0 + $0x3c] sm:$0xf0] }
  0x11   :  { %436 = vmatpush.bf16.msra.mxu3 %v711_v15  ;;  %v517_v52 = vld [vmem:[%s934_s0 + $0x30] sm:$0xf]  ;;  %v681_v53 = vld [vmem:[%s934_s0 + $0x40] sm:$0xf0]  ;;  %v679_v54 = vld [vmem:[%s934_s0 + $0x34] sm:$0xf]  ;;  %v510_v56 = vor.u32 %v680_v49, %v509_v48  ;;  %v514_v57 = vor.u32 %v678_v50, %v511_v51 }
  0x12   :  { %380 = vmatpush.bf16.msra.mxu0 %v686_v16  ;;  %v519_v55 = vld [vmem:[%s934_s0 + $0x44] sm:$0xf0]  ;;  %v518_v58 = vor.u32 %v681_v53, %v517_v52  ;;  %v505_v60 = vld [vmem:[%s934_s0 + $0x10] sm:$0xf]  ;;  %v677_v61 = vld [vmem:[%s934_s0 + $0x20] sm:$0xf0] }
  0x13   :  { %399 = vmatpush.bf16.msra.mxu1 %v694_v17  ;;  %v522_v59 = vor.u32 %v679_v54, %v519_v55  ;;  %v525_v62 = vld [vmem:[%s934_s0 + $0x38] sm:$0xf]  ;;  %v682_v63 = vld [vmem:[%s934_s0 + $0x48] sm:$0xf0]  ;;  %v506_v0 = vor.u32 %v677_v61, %v505_v60  ;;  %v734_v12 = vld [vmem:[%s933_s2] ss:$0 sm:$0xff] }
  0x14   :  { %418 = vmatpush.bf16.msra.mxu2 %v702_v18  ;;  %v526_v1 = vor.u32 %v682_v63, %v525_v62 }
  0x15   :  { %437 = vmatpush.bf16.msra.mxu3 %v710_v19 }
  0x16   :  { %381 = vmatpush.bf16.msra.mxu0 %v685_v20 }
  0x17   :  { %400 = vmatpush.bf16.msra.mxu1 %v693_v21 }
  0x18   :  { %419 = vmatpush.bf16.msra.mxu2 %v701_v22 }
  0x19   :  { %438 = vmatpush.bf16.msra.mxu3 %v709_v23 }
  0x1a   :  { %382 = vmatpush.bf16.msra.mxu0 %v684_v24 }
  0x1b   :  { %401 = vmatpush.bf16.msra.mxu1 %v692_v25 }
  0x1c   :  { %420 = vmatpush.bf16.msra.mxu2 %v700_v26 }
  0x1d   :  { %439 = vmatpush.bf16.msra.mxu3 %v708_v27 }
  0x1e   :  { %383 = vmatpush.bf16.msra.mxu0 %v683_v28 }
  0x1f   :  { %402 = vmatpush.bf16.msra.mxu1 %v691_v29 }
  0x20   :  { %421 = vmatpush.bf16.msra.mxu2 %v699_v30 }
  0x21   :  { %440 = vmatpush.bf16.msra.mxu3 %v707_v31  ;;  %384 = vmatmul.bf16.vlgmr.msra.gmra.mxu0 %v490_v41 }
  0x22   :  { %456 = vmatpush.bf16.msrb.mxu0 %v718_v40  ;;  %403 = vmatmul.bf16.vlgmr.msra.gmra.mxu1 %v494_v42 }
  0x23   :  { %730 = vmatpush.bf16.msrb.mxu1 %v718_v40  ;;  %422 = vmatmul.bf16.vlgmr.msra.gmra.mxu2 %v498_v43 }
  0x24   :  { %441 = vmatmul.bf16.vlgmr.msra.gmra.mxu3 %v502_v44 }
  0x26   :  { %457 = vmatpush.bf16.msrb.mxu0 %v717_v45 }
  0x27   :  { %731 = vmatpush.bf16.msrb.mxu1 %v717_v45 }
  0x2a   :  { %458 = vmatpush.bf16.msrb.mxu0 %v716_v46 }
  0x2b   :  { %732 = vmatpush.bf16.msrb.mxu1 %v716_v46 }
  0x2e   :  { %459 = vmatpush.bf16.msrb.mxu0 %v715_v47 }
  0x2f   :  { %733 = vmatpush.bf16.msrb.mxu1 %v715_v47 }
  0x31   :  { %389 = vmatmul.bf16.gmra.mxu0 %v510_v56 }
  0x32   :  { %408 = vmatmul.bf16.gmra.mxu1 %v514_v57 }
  0x33   :  { %427 = vmatmul.bf16.gmra.mxu2 %v518_v58 }
  0x34   :  { %446 = vmatmul.bf16.gmra.mxu3 %v522_v59 }
  0x41   :  { %671 = vmatmul.msk.bf16.vlgmr.msrb.gmra.mxu0 %vm369_vm0, %v506_v0 }
  0x42   :  { %672 = vmatmul.msk.bf16.vlgmr.msrb.gmra.mxu1 %vm369_vm0, %v526_v1 }
  0x9e   :  { %v385_v2 = vpop.f32.mrf.mxu0 }
  0x9f   :  { %v404_v3 = vpop.f32.mrf.mxu1  ;;  %v386_v16 = vadd.f32 %v734_v12, %v385_v2 }
  0xa1   :  { %v405_v21 = vadd.f32 %v404_v3, %v386_v16 }
  0xa6   :  { %v423_v4 = vpop.f32.mrf.mxu2  ;;  %v387_v6 = vpop.f32.mrf.mxu0 }
  0xa7   :  { %v442_v5 = vpop.f32.mrf.mxu3  ;;  %v406_v7 = vpop.f32.mrf.mxu1  ;;  %v388_v19 = vadd.f32 %v734_v12, %v387_v6  ;;  %v424_v26 = vadd.f32 %v423_v4, %v405_v21 }
  0xa9   :  { %v407_v27 = vadd.f32 %v406_v7, %v388_v19  ;;  %v443_v32 = vadd.f32 %v442_v5, %v424_v26 }
  0xae   :  { %v425_v8 = vpop.f32.mrf.mxu2  ;;  %v390_v9 = vpop.f32.mrf.mxu0 }
  0xaf   :  { %v409_v10 = vpop.f32.mrf.mxu1  ;;  %v444_v11 = vpop.f32.mrf.mxu3  ;;  %v391_v17 = vadd.f32 %v734_v12, %v390_v9  ;;  %v426_v30 = vadd.f32 %v425_v8, %v407_v27 }
  0xb1   :  { %v410_v22 = vadd.f32 %v409_v10, %v391_v17  ;;  %v445_v35 = vadd.f32 %v444_v11, %v426_v30 }
  0xb6   :  { %v428_v13 = vpop.f32.mrf.mxu2  ;;  %v392_v14 = vpop.f32.mrf.mxu0 }
  0xb7   :  { %v411_v15 = vpop.f32.mrf.mxu1  ;;  %v447_v18 = vpop.f32.mrf.mxu3  ;;  %v393_v20 = vadd.f32 %v734_v12, %v392_v14  ;;  %v429_v28 = vadd.f32 %v428_v13, %v410_v22 }
  0xb9   :  { %v412_v29 = vadd.f32 %v411_v15, %v393_v20  ;;  %v448_v33 = vadd.f32 %v447_v18, %v429_v28 }
  0xbe   :  { %v430_v23 = vpop.f32.mrf.mxu2  ;;  %v461_v24 = vpop.f32.mrf.mxu0 }
  0xbf   :  { %v466_v25 = vpop.f32.mrf.mxu1  ;;  %v431_v31 = vadd.f32 %v430_v23, %v412_v29  ;;  %v449_v34 = vpop.f32.mrf.mxu3  ;;  %v462_v37 = vadd.f32 %v461_v24, %v443_v32 }
  0xc0   :  { %v467_v38 = vadd.f32 %v466_v25, %v448_v33 }
  0xc1   :  { %v450_v36 = vadd.f32 %v449_v34, %v431_v31  ;;  %v471_v43 = vmax.f32 %v462_v37, 0.0 }
  0xc2   :  { %v473_v44 = vmax.f32 %v467_v38, 0.0 }
  0xc6   :  { %v463_v39 = vpop.f32.mrf.mxu0 }
  0xc7   :  { %v468_v40 = vpop.f32.mrf.mxu1  ;;  %v464_v41 = vadd.f32 %v463_v39, %v445_v35 }
  0xc8   :  { %v469_v42 = vadd.f32 %v468_v40, %v450_v36 }
  0xc9   :  { %v472_v45 = vmax.f32 %v464_v41, 0.0 }
  0xca   :  { %v474_v46 = vmax.f32 %v469_v42, 0.0 }
  0xcb   :  { %v722_v47 = vpack.c.bf16 %v472_v45, %v471_v43 }
  0xcc   :  { %v727_v48 = vpack.c.bf16 %v474_v46, %v473_v44 }
  0xcd   :  { %723 = vst [vmem:[%s935_s3] sm:$0xff] %v722_v47  }
  0xce   :  { %729 = vst [vmem:[%s935_s3 + $0x8] sm:$0xff] %v727_v48  }

// kernel: dqn_forward.9
= control target key start
LH: loop header
LB: loop body
LE: loop exit
PB: predicated region body
PF: predicated region fallthrough
CT: control target
= control target key end

     0   :  { %s1326_s1 = inlined_call_operand.vmem [shape: bf16[1024,128], index: 1, kind: input, shape index: {}]   ;;  %s1327_s2 = inlined_call_operand.vmem [shape: f32[1,128], index: 2, kind: input, shape index: {}]   ;;  %s1328_s0 = inlined_call_operand.vmem [shape: bf16[16,1024], index: 0, kind: input, shape index: {}]   ;;  %s1329_s3 = inlined_call_operand.vmem [shape: f32[16,128], index: 3, kind: output, shape index: {}]  }
   0x1   :  { %v999_v0 = vld [vmem:[%s1326_s1 + $0x38] sm:$0xff]  ;;  %v998_v4 = vld [vmem:[%s1326_s1 + $0x30] sm:$0xff]  ;;  %v997_v8 = vld [vmem:[%s1326_s1 + $0x28] sm:$0xff] }
   0x2   :  { %v1007_v1 = vld [vmem:[%s1326_s1 + $0x78] sm:$0xff]  ;;  %578 = vmatpush.bf16.msra.mxu0 %v999_v0  ;;  %v1006_v5 = vld [vmem:[%s1326_s1 + $0x70] sm:$0xff]  ;;  %v1005_v9 = vld [vmem:[%s1326_s1 + $0x68] sm:$0xff] }
   0x3   :  { %v1015_v2 = vld [vmem:[%s1326_s1 + $0xb8] sm:$0xff]  ;;  %592 = vmatpush.bf16.msra.mxu1 %v1007_v1  ;;  %v1014_v6 = vld [vmem:[%s1326_s1 + $0xb0] sm:$0xff]  ;;  %v1013_v10 = vld [vmem:[%s1326_s1 + $0xa8] sm:$0xff] }
   0x4   :  { %v1023_v3 = vld [vmem:[%s1326_s1 + $0xf8] sm:$0xff]  ;;  %606 = vmatpush.bf16.msra.mxu2 %v1015_v2  ;;  %v1022_v7 = vld [vmem:[%s1326_s1 + $0xf0] sm:$0xff]  ;;  %v1021_v11 = vld [vmem:[%s1326_s1 + $0xe8] sm:$0xff] }
   0x5   :  { %620 = vmatpush.bf16.msra.mxu3 %v1023_v3  ;;  %v996_v12 = vld [vmem:[%s1326_s1 + $0x20] sm:$0xff]  ;;  %v995_v16 = vld [vmem:[%s1326_s1 + $0x18] sm:$0xff]  ;;  %v994_v20 = vld [vmem:[%s1326_s1 + $0x10] sm:$0xff] }
   0x6   :  { %579 = vmatpush.bf16.msra.mxu0 %v998_v4  ;;  %v1004_v13 = vld [vmem:[%s1326_s1 + $0x60] sm:$0xff]  ;;  %v1003_v17 = vld [vmem:[%s1326_s1 + $0x58] sm:$0xff]  ;;  %v1002_v21 = vld [vmem:[%s1326_s1 + $0x50] sm:$0xff] }
   0x7   :  { %593 = vmatpush.bf16.msra.mxu1 %v1006_v5  ;;  %v1012_v14 = vld [vmem:[%s1326_s1 + $0xa0] sm:$0xff]  ;;  %v1011_v18 = vld [vmem:[%s1326_s1 + $0x98] sm:$0xff]  ;;  %v1010_v22 = vld [vmem:[%s1326_s1 + $0x90] sm:$0xff] }
   0x8   :  { %607 = vmatpush.bf16.msra.mxu2 %v1014_v6  ;;  %v1020_v15 = vld [vmem:[%s1326_s1 + $0xe0] sm:$0xff]  ;;  %v1019_v19 = vld [vmem:[%s1326_s1 + $0xd8] sm:$0xff]  ;;  %v1018_v23 = vld [vmem:[%s1326_s1 + $0xd0] sm:$0xff] }
   0x9   :  { %621 = vmatpush.bf16.msra.mxu3 %v1022_v7  ;;  %v993_v24 = vld [vmem:[%s1326_s1 + $0x8] sm:$0xff]  ;;  %v992_v28 = vld [vmem:[%s1326_s1] sm:$0xff]  ;;  %v1031_v32 = vld [vmem:[%s1326_s1 + $0x138] sm:$0xff] }
   0xa   :  { %580 = vmatpush.bf16.msra.mxu0 %v997_v8  ;;  %v1001_v25 = vld [vmem:[%s1326_s1 + $0x48] sm:$0xff]  ;;  %v1000_v29 = vld [vmem:[%s1326_s1 + $0x40] sm:$0xff]  ;;  %v1039_v33 = vld [vmem:[%s1326_s1 + $0x178] sm:$0xff] }
   0xb   :  { %594 = vmatpush.bf16.msra.mxu1 %v1005_v9  ;;  %v1009_v26 = vld [vmem:[%s1326_s1 + $0x88] sm:$0xff]  ;;  %v1008_v30 = vld [vmem:[%s1326_s1 + $0x80] sm:$0xff]  ;;  %v1047_v42 = vld [vmem:[%s1326_s1 + $0x1b8] sm:$0xff] }
   0xc   :  { %608 = vmatpush.bf16.msra.mxu2 %v1013_v10  ;;  %v1017_v27 = vld [vmem:[%s1326_s1 + $0xc8] sm:$0xff]  ;;  %v1016_v31 = vld [vmem:[%s1326_s1 + $0xc0] sm:$0xff]  ;;  %v1055_v43 = vld [vmem:[%s1326_s1 + $0x1f8] sm:$0xff] }
   0xd   :  { %622 = vmatpush.bf16.msra.mxu3 %v1021_v11  ;;  %v706_v34 = vld [vmem:[%s1328_s0 + $0x8] sm:$0xf]  ;;  %v698_v36 = vld [vmem:[%s1328_s0] sm:$0xf]  ;;  %v985_v38 = vld [vmem:[%s1328_s0 + $0xc] sm:$0xf] }
   0xe   :  { %581 = vmatpush.bf16.msra.mxu0 %v996_v12  ;;  %v989_v35 = vld [vmem:[%s1328_s0 + $0x24] sm:$0xf0]  ;;  %v988_v37 = vld [vmem:[%s1328_s0 + $0x1c] sm:$0xf0]  ;;  %v708_v39 = vld [vmem:[%s1328_s0 + $0x28] sm:$0xf0] }
   0xf   :  { %595 = vmatpush.bf16.msra.mxu1 %v1004_v13  ;;  %v984_v40 = vld [vmem:[%s1328_s0 + $0x4] sm:$0xf]  ;;  %v707_v44 = vor.u32 %v989_v35, %v706_v34  ;;  %v699_v45 = vor.u32 %v988_v37, %v698_v36  ;;  %v711_v46 = vor.u32 %v985_v38, %v708_v39  ;;  %v1030_v48 = vld [vmem:[%s1326_s1 + $0x130] sm:$0xff]  ;;  %v1029_v52 = vld [vmem:[%s1326_s1 + $0x128] sm:$0xff] }
  0x10   :  { %609 = vmatpush.bf16.msra.mxu2 %v1012_v14  ;;  %v700_v41 = vld [vmem:[%s1328_s0 + $0x20] sm:$0xf0]  ;;  %v1038_v49 = vld [vmem:[%s1326_s1 + $0x170] sm:$0xff]  ;;  %v1037_v53 = vld [vmem:[%s1326_s1 + $0x168] sm:$0xff] }
  0x11   :  { %623 = vmatpush.bf16.msra.mxu3 %v1020_v15  ;;  %v703_v47 = vor.u32 %v984_v40, %v700_v41  ;;  %v1046_v50 = vld [vmem:[%s1326_s1 + $0x1b0] sm:$0xff]  ;;  %v1045_v54 = vld [vmem:[%s1326_s1 + $0x1a8] sm:$0xff]  ;;  %v1028_v56 = vld [vmem:[%s1326_s1 + $0x120] sm:$0xff] }
  0x12   :  { %582 = vmatpush.bf16.msra.mxu0 %v995_v16  ;;  %v1054_v51 = vld [vmem:[%s1326_s1 + $0x1f0] sm:$0xff]  ;;  %v1053_v55 = vld [vmem:[%s1326_s1 + $0x1e8] sm:$0xff]  ;;  %v1036_v57 = vld [vmem:[%s1326_s1 + $0x160] sm:$0xff] }
  0x13   :  { %596 = vmatpush.bf16.msra.mxu1 %v1003_v17  ;;  %v1044_v58 = vld [vmem:[%s1326_s1 + $0x1a0] sm:$0xff]  ;;  %v1027_v60 = vld [vmem:[%s1326_s1 + $0x118] sm:$0xff]  ;;  %v1026_v0 = vld [vmem:[%s1326_s1 + $0x110] sm:$0xff] }
  0x14   :  { %610 = vmatpush.bf16.msra.mxu2 %v1011_v18  ;;  %v1052_v59 = vld [vmem:[%s1326_s1 + $0x1e0] sm:$0xff]  ;;  %v1035_v61 = vld [vmem:[%s1326_s1 + $0x158] sm:$0xff]  ;;  %v1034_v1 = vld [vmem:[%s1326_s1 + $0x150] sm:$0xff] }
  0x15   :  { %624 = vmatpush.bf16.msra.mxu3 %v1019_v19  ;;  %v1043_v62 = vld [vmem:[%s1326_s1 + $0x198] sm:$0xff]  ;;  %v1042_v2 = vld [vmem:[%s1326_s1 + $0x190] sm:$0xff]  ;;  %v1025_v4 = vld [vmem:[%s1326_s1 + $0x108] sm:$0xff] }
  0x16   :  { %583 = vmatpush.bf16.msra.mxu0 %v994_v20  ;;  %v1051_v63 = vld [vmem:[%s1326_s1 + $0x1d8] sm:$0xff]  ;;  %v1050_v3 = vld [vmem:[%s1326_s1 + $0x1d0] sm:$0xff]  ;;  %v1033_v5 = vld [vmem:[%s1326_s1 + $0x148] sm:$0xff] }
  0x17   :  { %597 = vmatpush.bf16.msra.mxu1 %v1002_v21  ;;  %v1041_v6 = vld [vmem:[%s1326_s1 + $0x188] sm:$0xff]  ;;  %v1024_v8 = vld [vmem:[%s1326_s1 + $0x100] sm:$0xff]  ;;  %v714_v12 = vld [vmem:[%s1328_s0 + $0x10] sm:$0xf] }
  0x18   :  { %611 = vmatpush.bf16.msra.mxu2 %v1010_v22  ;;  %v1049_v7 = vld [vmem:[%s1326_s1 + $0x1c8] sm:$0xff]  ;;  %v1032_v9 = vld [vmem:[%s1326_s1 + $0x140] sm:$0xff]  ;;  %v990_v13 = vld [vmem:[%s1328_s0 + $0x2c] sm:$0xf0] }
  0x19   :  { %625 = vmatpush.bf16.msra.mxu3 %v1018_v23  ;;  %v1040_v10 = vld [vmem:[%s1326_s1 + $0x180] sm:$0xff]  ;;  %v986_v14 = vld [vmem:[%s1328_s0 + $0x14] sm:$0xf]  ;;  %v722_v16 = vld [vmem:[%s1328_s0 + $0x18] sm:$0xf]  ;;  %v715_v20 = vor.u32 %v990_v13, %v714_v12 }
  0x1a   :  { %584 = vmatpush.bf16.msra.mxu0 %v993_v24  ;;  %v1048_v11 = vld [vmem:[%s1326_s1 + $0x1c0] sm:$0xff]  ;;  %v716_v15 = vld [vmem:[%s1328_s0 + $0x30] sm:$0xf0]  ;;  %v991_v17 = vld [vmem:[%s1328_s0 + $0x34] sm:$0xf0] }
  0x1b   :  { %598 = vmatpush.bf16.msra.mxu1 %v1001_v25  ;;  %v987_v18 = vld [vmem:[%s1328_s0 + $0x1c] sm:$0xf]  ;;  %v719_v21 = vor.u32 %v986_v14, %v716_v15  ;;  %v723_v22 = vor.u32 %v991_v17, %v722_v16  ;;  %v1056_v25 = vld [vmem:[%s1327_s2] ss:$0 sm:$0xff] }
  0x1c   :  { %612 = vmatpush.bf16.msra.mxu2 %v1009_v26  ;;  %v724_v19 = vld [vmem:[%s1328_s0 + $0x38] sm:$0xf0] }
  0x1d   :  { %626 = vmatpush.bf16.msra.mxu3 %v1017_v27  ;;  %v727_v23 = vor.u32 %v987_v18, %v724_v19 }
  0x1e   :  { %585 = vmatpush.bf16.msra.mxu0 %v992_v28 }
  0x1f   :  { %599 = vmatpush.bf16.msra.mxu1 %v1000_v29 }
  0x20   :  { %613 = vmatpush.bf16.msra.mxu2 %v1008_v30 }
  0x21   :  { %627 = vmatpush.bf16.msra.mxu3 %v1016_v31  ;;  %586 = vmatmul.bf16.vlgmr.msra.gmra.mxu0 %v699_v45 }
  0x22   :  { %634 = vmatpush.bf16.msrb.mxu0 %v1031_v32  ;;  %600 = vmatmul.bf16.vlgmr.msra.gmra.mxu1 %v703_v47 }
  0x23   :  { %648 = vmatpush.bf16.msrb.mxu1 %v1039_v33  ;;  %614 = vmatmul.bf16.vlgmr.msra.gmra.mxu2 %v707_v44 }
  0x24   :  { %662 = vmatpush.bf16.msrb.mxu2 %v1047_v42  ;;  %628 = vmatmul.bf16.vlgmr.msra.gmra.mxu3 %v711_v46 }
  0x25   :  { %676 = vmatpush.bf16.msrb.mxu3 %v1055_v43 }
  0x26   :  { %635 = vmatpush.bf16.msrb.mxu0 %v1030_v48 }
  0x27   :  { %649 = vmatpush.bf16.msrb.mxu1 %v1038_v49 }
  0x28   :  { %663 = vmatpush.bf16.msrb.mxu2 %v1046_v50 }
  0x29   :  { %677 = vmatpush.bf16.msrb.mxu3 %v1054_v51 }
  0x2a   :  { %636 = vmatpush.bf16.msrb.mxu0 %v1029_v52 }
  0x2b   :  { %650 = vmatpush.bf16.msrb.mxu1 %v1037_v53 }
  0x2c   :  { %664 = vmatpush.bf16.msrb.mxu2 %v1045_v54 }
  0x2d   :  { %678 = vmatpush.bf16.msrb.mxu3 %v1053_v55 }
  0x2e   :  { %637 = vmatpush.bf16.msrb.mxu0 %v1028_v56 }
  0x2f   :  { %651 = vmatpush.bf16.msrb.mxu1 %v1036_v57 }
  0x30   :  { %665 = vmatpush.bf16.msrb.mxu2 %v1044_v58 }
  0x31   :  { %679 = vmatpush.bf16.msrb.mxu3 %v1052_v59 }
  0x32   :  { %638 = vmatpush.bf16.msrb.mxu0 %v1027_v60 }
  0x33   :  { %652 = vmatpush.bf16.msrb.mxu1 %v1035_v61 }
  0x34   :  { %666 = vmatpush.bf16.msrb.mxu2 %v1043_v62 }
  0x35   :  { %680 = vmatpush.bf16.msrb.mxu3 %v1051_v63 }
  0x36   :  { %639 = vmatpush.bf16.msrb.mxu0 %v1026_v0 }
  0x37   :  { %653 = vmatpush.bf16.msrb.mxu1 %v1034_v1 }
  0x38   :  { %667 = vmatpush.bf16.msrb.mxu2 %v1042_v2 }
  0x39   :  { %681 = vmatpush.bf16.msrb.mxu3 %v1050_v3 }
  0x3a   :  { %640 = vmatpush.bf16.msrb.mxu0 %v1025_v4 }
  0x3b   :  { %654 = vmatpush.bf16.msrb.mxu1 %v1033_v5 }
  0x3c   :  { %668 = vmatpush.bf16.msrb.mxu2 %v1041_v6 }
  0x3d   :  { %682 = vmatpush.bf16.msrb.mxu3 %v1049_v7 }
  0x3e   :  { %641 = vmatpush.bf16.msrb.mxu0 %v1024_v8 }
  0x3f   :  { %655 = vmatpush.bf16.msrb.mxu1 %v1032_v9 }
  0x40   :  { %669 = vmatpush.bf16.msrb.mxu2 %v1040_v10 }
  0x41   :  { %683 = vmatpush.bf16.msrb.mxu3 %v1048_v11  ;;  %642 = vmatmul.bf16.vlgmr.msrb.gmra.mxu0 %v715_v20 }
  0x42   :  { %656 = vmatmul.bf16.vlgmr.msrb.gmra.mxu1 %v719_v21 }
  0x43   :  { %670 = vmatmul.bf16.vlgmr.msrb.gmra.mxu2 %v723_v22 }
  0x44   :  { %684 = vmatmul.bf16.vlgmr.msrb.gmra.mxu3 %v727_v23 }
  0x9e   :  { %v587_v24 = vpop.f32.mrf.mxu0 }
  0x9f   :  { %v601_v26 = vpop.f32.mrf.mxu1  ;;  %v588_v27 = vadd.f32 %v1056_v25, %v587_v24 }
  0xa1   :  { %v602_v30 = vadd.f32 %v601_v26, %v588_v27 }
  0xa6   :  { %v615_v28 = vpop.f32.mrf.mxu2  ;;  %v589_v31 = vpop.f32.mrf.mxu0 }
  0xa7   :  { %v629_v29 = vpop.f32.mrf.mxu3  ;;  %v603_v32 = vpop.f32.mrf.mxu1  ;;  %v616_v33 = vadd.f32 %v615_v28, %v602_v30  ;;  %v590_v34 = vadd.f32 %v1056_v25, %v589_v31 }
  0xa9   :  { %v630_v37 = vadd.f32 %v629_v29, %v616_v33  ;;  %v604_v38 = vadd.f32 %v603_v32, %v590_v34 }
  0xae   :  { %v617_v35 = vpop.f32.mrf.mxu2 }
  0xaf   :  { %v631_v36 = vpop.f32.mrf.mxu3  ;;  %v618_v42 = vadd.f32 %v617_v35, %v604_v38 }
  0xb1   :  { %v632_v46 = vadd.f32 %v631_v36, %v618_v42 }
  0xbe   :  { %v643_v39 = vpop.f32.mrf.mxu0 }
  0xbf   :  { %v644_v40 = vadd.f32 %v643_v39, %v630_v37  ;;  %v657_v41 = vpop.f32.mrf.mxu1 }
  0xc1   :  { %v658_v43 = vadd.f32 %v657_v41, %v644_v40 }
  0xc6   :  { %v671_v44 = vpop.f32.mrf.mxu2  ;;  %v645_v48 = vpop.f32.mrf.mxu0 }
  0xc7   :  { %v685_v45 = vpop.f32.mrf.mxu3  ;;  %v672_v47 = vadd.f32 %v671_v44, %v658_v43  ;;  %v646_v50 = vadd.f32 %v645_v48, %v632_v46  ;;  %v659_v51 = vpop.f32.mrf.mxu1 }
  0xc9   :  { %v686_v49 = vadd.f32 %v685_v45, %v672_v47  ;;  %v660_v52 = vadd.f32 %v659_v51, %v646_v50 }
  0xcb   :  { %690 = vst [vmem:[%s1329_s3] sm:$0xff] %v686_v49 }
  0xce   :  { %v673_v53 = vpop.f32.mrf.mxu2 }
  0xcf   :  { %v674_v54 = vadd.f32 %v673_v53, %v660_v52  ;;  %v687_v55 = vpop.f32.mrf.mxu3 }
  0xd1   :  { %v688_v56 = vadd.f32 %v687_v55, %v674_v54 }
  0xd3   :  { %691 = vst [vmem:[%s1329_s3 + $0x8] sm:$0xff] %v688_v56 }

// kernel: dqn_forward.8
= control target key start
LH: loop header
LB: loop body
LE: loop exit
PB: predicated region body
PF: predicated region fallthrough
CT: control target
= control target key end

     0   :  { %s2952_s1 = inlined_call_operand.vmem [shape: bf16[1152,256], index: 1, kind: input, shape index: {}]   ;;  %s2953_s0 = inlined_call_operand.vmem [shape: bf16[16,1152], index: 0, kind: input, shape index: {}]   ;;  %s2954_s2 = inlined_call_operand.vmem [shape: f32[1,256], index: 2, kind: input, shape index: {}]   ;;  %s2955_s3 = inlined_call_operand.vmem [shape: bf16[16,256], index: 3, kind: output, shape index: {}]  }
   0x1   :  { %v1298_v0 = vld [vmem:[%s2952_s1 + $0x70] sm:$0xf]  ;;  %v1840_v1 = vld [vmem:[%s2952_s1 + $0x74] sm:$0xf0]  ;;  %v1290_v11 = vld [vmem:[%s2952_s1 + $0x60] sm:$0xf] }
   0x2   :  { %v1362_v2 = vld [vmem:[%s2952_s1 + $0xf0] sm:$0xf]  ;;  %v1299_v3 = vor.u32 %v1840_v1, %v1298_v0  ;;  %v1856_v4 = vld [vmem:[%s2952_s1 + $0xf4] sm:$0xf0]  ;;  %v1838_v13 = vld [vmem:[%s2952_s1 + $0x64] sm:$0xf0] }
   0x3   :  { %v1426_v5 = vld [vmem:[%s2952_s1 + $0x170] sm:$0xf]  ;;  %v1872_v6 = vld [vmem:[%s2952_s1 + $0x174] sm:$0xf0]  ;;  %v1363_v7 = vor.u32 %v1856_v4, %v1362_v2  ;;  %v1354_v14 = vld [vmem:[%s2952_s1 + $0xe0] sm:$0xf]  ;;  %v1291_v16 = vor.u32 %v1838_v13, %v1290_v11 }
   0x4   :  { %v1427_v8 = vor.u32 %v1872_v6, %v1426_v5  ;;  %v1490_v9 = vld [vmem:[%s2952_s1 + $0x1f0] sm:$0xf]  ;;  %v1888_v10 = vld [vmem:[%s2952_s1 + $0x1f4] sm:$0xf0]  ;;  %940 = vmatpush.bf16.msra.mxu0 %v1299_v3  ;;  %v1854_v15 = vld [vmem:[%s2952_s1 + $0xe4] sm:$0xf0] }
   0x5   :  { %v1491_v12 = vor.u32 %v1888_v10, %v1490_v9  ;;  %954 = vmatpush.bf16.msra.mxu1 %v1363_v7  ;;  %v1355_v17 = vor.u32 %v1854_v15, %v1354_v14  ;;  %v1418_v18 = vld [vmem:[%s2952_s1 + $0x160] sm:$0xf]  ;;  %v1870_v19 = vld [vmem:[%s2952_s1 + $0x164] sm:$0xf0]  ;;  %v1282_v23 = vld [vmem:[%s2952_s1 + $0x50] sm:$0xf] }
   0x6   :  { %968 = vmatpush.bf16.msra.mxu2 %v1427_v8  ;;  %v1482_v20 = vld [vmem:[%s2952_s1 + $0x1e0] sm:$0xf]  ;;  %v1419_v21 = vor.u32 %v1870_v19, %v1418_v18  ;;  %v1886_v22 = vld [vmem:[%s2952_s1 + $0x1e4] sm:$0xf0]  ;;  %v1836_v24 = vld [vmem:[%s2952_s1 + $0x54] sm:$0xf0] }
   0x7   :  { %982 = vmatpush.bf16.msra.mxu3 %v1491_v12  ;;  %v1483_v25 = vor.u32 %v1886_v22, %v1482_v20  ;;  %v1346_v26 = vld [vmem:[%s2952_s1 + $0xd0] sm:$0xf]  ;;  %v1852_v27 = vld [vmem:[%s2952_s1 + $0xd4] sm:$0xf0]  ;;  %v1283_v29 = vor.u32 %v1836_v24, %v1282_v23  ;;  %v1274_v35 = vld [vmem:[%s2952_s1 + $0x40] sm:$0xf] }
   0x8   :  { %v1410_v28 = vld [vmem:[%s2952_s1 + $0x150] sm:$0xf]  ;;  %941 = vmatpush.bf16.msra.mxu0 %v1291_v16  ;;  %v1868_v30 = vld [vmem:[%s2952_s1 + $0x154] sm:$0xf0]  ;;  %v1347_v33 = vor.u32 %v1852_v27, %v1346_v26  ;;  %v1834_v36 = vld [vmem:[%s2952_s1 + $0x44] sm:$0xf0] }
   0x9   :  { %v1474_v31 = vld [vmem:[%s2952_s1 + $0x1d0] sm:$0xf]  ;;  %v1884_v32 = vld [vmem:[%s2952_s1 + $0x1d4] sm:$0xf0]  ;;  %955 = vmatpush.bf16.msra.mxu1 %v1355_v17  ;;  %v1411_v34 = vor.u32 %v1868_v30, %v1410_v28  ;;  %v1338_v37 = vld [vmem:[%s2952_s1 + $0xc0] sm:$0xf]  ;;  %v1275_v44 = vor.u32 %v1834_v36, %v1274_v35 }
   0xa   :  { %969 = vmatpush.bf16.msra.mxu2 %v1419_v21  ;;  %v1475_v38 = vor.u32 %v1884_v32, %v1474_v31  ;;  %v1850_v39 = vld [vmem:[%s2952_s1 + $0xc4] sm:$0xf0]  ;;  %v1402_v40 = vld [vmem:[%s2952_s1 + $0x140] sm:$0xf]  ;;  %v1266_v47 = vld [vmem:[%s2952_s1 + $0x30] sm:$0xf] }
   0xb   :  { %983 = vmatpush.bf16.msra.mxu3 %v1483_v25  ;;  %v1866_v41 = vld [vmem:[%s2952_s1 + $0x144] sm:$0xf0]  ;;  %v1466_v42 = vld [vmem:[%s2952_s1 + $0x1c0] sm:$0xf]  ;;  %v1339_v45 = vor.u32 %v1850_v39, %v1338_v37  ;;  %v1832_v48 = vld [vmem:[%s2952_s1 + $0x34] sm:$0xf0] }
   0xc   :  { %v1882_v43 = vld [vmem:[%s2952_s1 + $0x1c4] sm:$0xf0]  ;;  %942 = vmatpush.bf16.msra.mxu0 %v1283_v29  ;;  %v1403_v46 = vor.u32 %v1866_v41, %v1402_v40  ;;  %v1330_v49 = vld [vmem:[%s2952_s1 + $0xb0] sm:$0xf]  ;;  %v1848_v51 = vld [vmem:[%s2952_s1 + $0xb4] sm:$0xf0]  ;;  %v1267_v56 = vor.u32 %v1832_v48, %v1266_v47 }
   0xd   :  { %956 = vmatpush.bf16.msra.mxu1 %v1347_v33  ;;  %v1467_v50 = vor.u32 %v1882_v43, %v1466_v42  ;;  %v1394_v52 = vld [vmem:[%s2952_s1 + $0x130] sm:$0xf]  ;;  %v1864_v53 = vld [vmem:[%s2952_s1 + $0x134] sm:$0xf0]  ;;  %v1331_v57 = vor.u32 %v1848_v51, %v1330_v49  ;;  %v1258_v59 = vld [vmem:[%s2952_s1 + $0x20] sm:$0xf] }
   0xe   :  { %970 = vmatpush.bf16.msra.mxu2 %v1411_v34  ;;  %v1458_v54 = vld [vmem:[%s2952_s1 + $0x1b0] sm:$0xf]  ;;  %v1880_v55 = vld [vmem:[%s2952_s1 + $0x1b4] sm:$0xf0]  ;;  %v1395_v58 = vor.u32 %v1864_v53, %v1394_v52  ;;  %v1830_v60 = vld [vmem:[%s2952_s1 + $0x24] sm:$0xf0] }
   0xf   :  { %984 = vmatpush.bf16.msra.mxu3 %v1475_v38  ;;  %v1322_v61 = vld [vmem:[%s2952_s1 + $0xa0] sm:$0xf]  ;;  %v1459_v62 = vor.u32 %v1880_v55, %v1458_v54  ;;  %v1846_v63 = vld [vmem:[%s2952_s1 + $0xa4] sm:$0xf0]  ;;  %v1259_v4 = vor.u32 %v1830_v60, %v1258_v59  ;;  %v1250_v7 = vld [vmem:[%s2952_s1 + $0x10] sm:$0xf] }
  0x10   :  { %943 = vmatpush.bf16.msra.mxu0 %v1275_v44  ;;  %v1386_v0 = vld [vmem:[%s2952_s1 + $0x120] sm:$0xf]  ;;  %v1862_v1 = vld [vmem:[%s2952_s1 + $0x124] sm:$0xf0]  ;;  %v1323_v5 = vor.u32 %v1846_v63, %v1322_v61  ;;  %v1828_v8 = vld [vmem:[%s2952_s1 + $0x14] sm:$0xf0] }
  0x11   :  { %957 = vmatpush.bf16.msra.mxu1 %v1339_v45  ;;  %v1450_v2 = vld [vmem:[%s2952_s1 + $0x1a0] sm:$0xf]  ;;  %v1878_v3 = vld [vmem:[%s2952_s1 + $0x1a4] sm:$0xf0]  ;;  %v1387_v6 = vor.u32 %v1862_v1, %v1386_v0  ;;  %v1314_v9 = vld [vmem:[%s2952_s1 + $0x90] sm:$0xf]  ;;  %v1251_v16 = vor.u32 %v1828_v8, %v1250_v7 }
  0x12   :  { %971 = vmatpush.bf16.msra.mxu2 %v1403_v46  ;;  %v1451_v10 = vor.u32 %v1878_v3, %v1450_v2  ;;  %v1844_v11 = vld [vmem:[%s2952_s1 + $0x94] sm:$0xf0]  ;;  %v1378_v12 = vld [vmem:[%s2952_s1 + $0x110] sm:$0xf]  ;;  %v1242_v17 = vld [vmem:[%s2952_s1] sm:$0xf] }
  0x13   :  { %985 = vmatpush.bf16.msra.mxu3 %v1467_v50  ;;  %v1860_v13 = vld [vmem:[%s2952_s1 + $0x114] sm:$0xf0]  ;;  %v1442_v14 = vld [vmem:[%s2952_s1 + $0x190] sm:$0xf]  ;;  %v1826_v18 = vld [vmem:[%s2952_s1 + $0x4] sm:$0xf0]  ;;  %v1315_v19 = vor.u32 %v1844_v11, %v1314_v9 }
  0x14   :  { %944 = vmatpush.bf16.msra.mxu0 %v1267_v56  ;;  %v1876_v15 = vld [vmem:[%s2952_s1 + $0x194] sm:$0xf0]  ;;  %v1379_v20 = vor.u32 %v1860_v13, %v1378_v12  ;;  %v1306_v21 = vld [vmem:[%s2952_s1 + $0x80] sm:$0xf]  ;;  %v1842_v22 = vld [vmem:[%s2952_s1 + $0x84] sm:$0xf0]  ;;  %v1243_v31 = vor.u32 %v1826_v18, %v1242_v17 }
  0x15   :  { %958 = vmatpush.bf16.msra.mxu1 %v1331_v57  ;;  %v1370_v23 = vld [vmem:[%s2952_s1 + $0x100] sm:$0xf]  ;;  %v1443_v24 = vor.u32 %v1876_v15, %v1442_v14  ;;  %v1858_v25 = vld [vmem:[%s2952_s1 + $0x104] sm:$0xf0]  ;;  %v1554_v26 = vld [vmem:[%s2952_s1 + $0x270] sm:$0xf]  ;;  %v1307_v35 = vor.u32 %v1842_v22, %v1306_v21 }
  0x16   :  { %972 = vmatpush.bf16.msra.mxu2 %v1395_v58  ;;  %v1904_v27 = vld [vmem:[%s2952_s1 + $0x274] sm:$0xf0]  ;;  %v1618_v28 = vld [vmem:[%s2952_s1 + $0x2f0] sm:$0xf]  ;;  %v1434_v33 = vld [vmem:[%s2952_s1 + $0x180] sm:$0xf]  ;;  %v1371_v36 = vor.u32 %v1858_v25, %v1370_v23 }
  0x17   :  { %986 = vmatpush.bf16.msra.mxu3 %v1459_v62  ;;  %v1920_v29 = vld [vmem:[%s2952_s1 + $0x2f4] sm:$0xf0]  ;;  %v1682_v30 = vld [vmem:[%s2952_s1 + $0x370] sm:$0xf]  ;;  %v1874_v34 = vld [vmem:[%s2952_s1 + $0x184] sm:$0xf0]  ;;  %v1555_v39 = vor.u32 %v1904_v27, %v1554_v26 }
  0x18   :  { %945 = vmatpush.bf16.msra.mxu0 %v1259_v4  ;;  %v1936_v32 = vld [vmem:[%s2952_s1 + $0x374] sm:$0xf0]  ;;  %v1746_v37 = vld [vmem:[%s2952_s1 + $0x3f0] sm:$0xf]  ;;  %v1619_v40 = vor.u32 %v1920_v29, %v1618_v28  ;;  %v1546_v41 = vld [vmem:[%s2952_s1 + $0x260] sm:$0xf]  ;;  %v1435_v44 = vor.u32 %v1874_v34, %v1434_v33 }
  0x19   :  { %959 = vmatpush.bf16.msra.mxu1 %v1323_v5  ;;  %v1952_v38 = vld [vmem:[%s2952_s1 + $0x3f4] sm:$0xf0]  ;;  %v1902_v42 = vld [vmem:[%s2952_s1 + $0x264] sm:$0xf0]  ;;  %v1683_v43 = vor.u32 %v1936_v32, %v1682_v30  ;;  %v1610_v45 = vld [vmem:[%s2952_s1 + $0x2e0] sm:$0xf] }
  0x1a   :  { %973 = vmatpush.bf16.msra.mxu2 %v1387_v6  ;;  %v1918_v46 = vld [vmem:[%s2952_s1 + $0x2e4] sm:$0xf0]  ;;  %v1674_v47 = vld [vmem:[%s2952_s1 + $0x360] sm:$0xf]  ;;  %v1747_v48 = vor.u32 %v1952_v38, %v1746_v37  ;;  %v1538_v52 = vld [vmem:[%s2952_s1 + $0x250] sm:$0xf]  ;;  %v1547_v56 = vor.u32 %v1902_v42, %v1546_v41 }
  0x1b   :  { %987 = vmatpush.bf16.msra.mxu3 %v1451_v10  ;;  %v1934_v49 = vld [vmem:[%s2952_s1 + $0x364] sm:$0xf0]  ;;  %v1738_v50 = vld [vmem:[%s2952_s1 + $0x3e0] sm:$0xf]  ;;  %v1820_v54 = vld [vmem:[%s2953_s0 + $0x20] sm:$0xf0]  ;;  %v1611_v57 = vor.u32 %v1918_v46, %v1610_v45 }
  0x1c   :  { %946 = vmatpush.bf16.msra.mxu0 %v1251_v16  ;;  %v1950_v51 = vld [vmem:[%s2952_s1 + $0x3e4] sm:$0xf0]  ;;  %v1206_v53 = vld [vmem:[%s2953_s0] sm:$0xf]  ;;  %v1900_v58 = vld [vmem:[%s2952_s1 + $0x254] sm:$0xf0]  ;;  %v1675_v62 = vor.u32 %v1934_v49, %v1674_v47 }
  0x1d   :  { %960 = vmatpush.bf16.msra.mxu1 %v1315_v19  ;;  %v1214_v55 = vld [vmem:[%s2953_s0 + $0x8] sm:$0xf]  ;;  %v1602_v59 = vld [vmem:[%s2952_s1 + $0x2d0] sm:$0xf]  ;;  %v2247_v60 = vor.u32 %v1820_v54, %v1206_v53  ;;  %v1821_v61 = vld [vmem:[%s2953_s0 + $0x28] sm:$0xf0]  ;;  %v1739_v3 = vor.u32 %v1950_v51, %v1738_v50  ;;  %v1539_v11 = vor.u32 %v1900_v58, %v1538_v52 }
  0x1e   :  { %974 = vmatpush.bf16.msra.mxu2 %v1379_v20  ;;  %v1916_v63 = vld [vmem:[%s2952_s1 + $0x2d4] sm:$0xf0]  ;;  %v1666_v0 = vld [vmem:[%s2952_s1 + $0x350] sm:$0xf]  ;;  %v2261_v2 = vor.u32 %v1821_v61, %v1214_v55  ;;  %v1816_v5 = vld [vmem:[%s2953_s0 + $0x4] sm:$0xf] }
  0x1f   :  { %988 = vmatpush.bf16.msra.mxu3 %v1443_v24  ;;  %v1932_v1 = vld [vmem:[%s2952_s1 + $0x354] sm:$0xf0]  ;;  %v1730_v4 = vld [vmem:[%s2952_s1 + $0x3d0] sm:$0xf]  ;;  %v1208_v6 = vld [vmem:[%s2953_s0 + $0x24] sm:$0xf0]  ;;  %v1603_v12 = vor.u32 %v1916_v63, %v1602_v59 }
  0x20   :  { %947 = vmatpush.bf16.msra.mxu0 %v1243_v31  ;;  %v1948_v7 = vld [vmem:[%s2952_s1 + $0x3d4] sm:$0xf0]  ;;  %v2277_v8 = vor.u32 %v1816_v5, %v1208_v6  ;;  %v1817_v9 = vld [vmem:[%s2953_s0 + $0xc] sm:$0xf]  ;;  %v1216_v10 = vld [vmem:[%s2953_s0 + $0x2c] sm:$0xf0]  ;;  %v1667_v15 = vor.u32 %v1932_v1, %v1666_v0 }
  0x21   :  { %961 = vmatpush.bf16.msra.mxu1 %v1307_v35  ;;  %v1530_v13 = vld [vmem:[%s2952_s1 + $0x240] sm:$0xf]  ;;  %v2288_v14 = vor.u32 %v1817_v9, %v1216_v10  ;;  %v1898_v16 = vld [vmem:[%s2952_s1 + $0x244] sm:$0xf0]  ;;  %v1731_v19 = vor.u32 %v1948_v7, %v1730_v4  ;;  %v1522_v26 = vld [vmem:[%s2952_s1 + $0x230] sm:$0xf] }
  0x22   :  { %975 = vmatpush.bf16.msra.mxu2 %v1371_v36  ;;  %v1594_v17 = vld [vmem:[%s2952_s1 + $0x2c0] sm:$0xf]  ;;  %v1914_v18 = vld [vmem:[%s2952_s1 + $0x2c4] sm:$0xf0]  ;;  %v1531_v24 = vor.u32 %v1898_v16, %v1530_v13  ;;  %v1896_v28 = vld [vmem:[%s2952_s1 + $0x234] sm:$0xf0] }
  0x23   :  { %989 = vmatpush.bf16.msra.mxu3 %v1435_v44  ;;  %948 = vmatmul.bf16.vlgmr.msra.gmra.mxu0 %v2247_v60  ;;  %v1658_v20 = vld [vmem:[%s2952_s1 + $0x340] sm:$0xf]  ;;  %v1930_v21 = vld [vmem:[%s2952_s1 + $0x344] sm:$0xf0]  ;;  %v1595_v25 = vor.u32 %v1914_v18, %v1594_v17  ;;  %v1586_v29 = vld [vmem:[%s2952_s1 + $0x2b0] sm:$0xf]  ;;  %v1523_v36 = vor.u32 %v1896_v28, %v1522_v26 }
  0x24   :  { %996 = vmatpush.bf16.msrb.mxu0 %v1555_v39  ;;  %962 = vmatmul.bf16.vlgmr.msra.gmra.mxu1 %v2277_v8  ;;  %v1722_v22 = vld [vmem:[%s2952_s1 + $0x3c0] sm:$0xf]  ;;  %v1946_v23 = vld [vmem:[%s2952_s1 + $0x3c4] sm:$0xf0]  ;;  %v1659_v27 = vor.u32 %v1930_v21, %v1658_v20  ;;  %v1912_v30 = vld [vmem:[%s2952_s1 + $0x2b4] sm:$0xf0] }
  0x25   :  { %1010 = vmatpush.bf16.msrb.mxu1 %v1619_v40  ;;  %976 = vmatmul.bf16.vlgmr.msra.gmra.mxu2 %v2261_v2  ;;  %v1723_v31 = vor.u32 %v1946_v23, %v1722_v22  ;;  %v1650_v32 = vld [vmem:[%s2952_s1 + $0x330] sm:$0xf]  ;;  %v1928_v33 = vld [vmem:[%s2952_s1 + $0x334] sm:$0xf0]  ;;  %v1587_v37 = vor.u32 %v1912_v30, %v1586_v29  ;;  %v1514_v38 = vld [vmem:[%s2952_s1 + $0x220] sm:$0xf] }
  0x26   :  { %1024 = vmatpush.bf16.msrb.mxu2 %v1683_v43  ;;  %990 = vmatmul.bf16.vlgmr.msra.gmra.mxu3 %v2288_v14  ;;  %v1714_v34 = vld [vmem:[%s2952_s1 + $0x3b0] sm:$0xf]  ;;  %v1944_v35 = vld [vmem:[%s2952_s1 + $0x3b4] sm:$0xf0]  ;;  %v1651_v39 = vor.u32 %v1928_v33, %v1650_v32  ;;  %v1894_v40 = vld [vmem:[%s2952_s1 + $0x224] sm:$0xf0] }
  0x27   :  { %1038 = vmatpush.bf16.msrb.mxu3 %v1747_v48  ;;  %v1578_v41 = vld [vmem:[%s2952_s1 + $0x2a0] sm:$0xf]  ;;  %v1910_v42 = vld [vmem:[%s2952_s1 + $0x2a4] sm:$0xf0]  ;;  %v1715_v43 = vor.u32 %v1944_v35, %v1714_v34  ;;  %v1515_v48 = vor.u32 %v1894_v40, %v1514_v38  ;;  %v1506_v50 = vld [vmem:[%s2952_s1 + $0x210] sm:$0xf] }
  0x28   :  { %997 = vmatpush.bf16.msrb.mxu0 %v1547_v56  ;;  %v1642_v44 = vld [vmem:[%s2952_s1 + $0x320] sm:$0xf]  ;;  %v1926_v45 = vld [vmem:[%s2952_s1 + $0x324] sm:$0xf0]  ;;  %v1579_v49 = vor.u32 %v1910_v42, %v1578_v41  ;;  %v1892_v51 = vld [vmem:[%s2952_s1 + $0x214] sm:$0xf0] }
  0x29   :  { %1011 = vmatpush.bf16.msrb.mxu1 %v1611_v57  ;;  %v1706_v46 = vld [vmem:[%s2952_s1 + $0x3a0] sm:$0xf]  ;;  %v1942_v47 = vld [vmem:[%s2952_s1 + $0x3a4] sm:$0xf0]  ;;  %v1643_v52 = vor.u32 %v1926_v45, %v1642_v44  ;;  %v1570_v53 = vld [vmem:[%s2952_s1 + $0x290] sm:$0xf]  ;;  %v1507_v1 = vor.u32 %v1892_v51, %v1506_v50 }
  0x2a   :  { %1025 = vmatpush.bf16.msrb.mxu2 %v1675_v62  ;;  %v1908_v54 = vld [vmem:[%s2952_s1 + $0x294] sm:$0xf0]  ;;  %v1634_v55 = vld [vmem:[%s2952_s1 + $0x310] sm:$0xf]  ;;  %v1707_v56 = vor.u32 %v1942_v47, %v1706_v46  ;;  %v1498_v61 = vld [vmem:[%s2952_s1 + $0x200] sm:$0xf] }
  0x2b   :  { %1039 = vmatpush.bf16.msrb.mxu3 %v1739_v3  ;;  %v1924_v57 = vld [vmem:[%s2952_s1 + $0x314] sm:$0xf0]  ;;  %v1698_v58 = vld [vmem:[%s2952_s1 + $0x390] sm:$0xf]  ;;  %v1890_v62 = vld [vmem:[%s2952_s1 + $0x204] sm:$0xf0]  ;;  %v1571_v3 = vor.u32 %v1908_v54, %v1570_v53 }
  0x2c   :  { %998 = vmatpush.bf16.msrb.mxu0 %v1539_v11  ;;  %v1940_v59 = vld [vmem:[%s2952_s1 + $0x394] sm:$0xf0]  ;;  %v1562_v63 = vld [vmem:[%s2952_s1 + $0x280] sm:$0xf]  ;;  %v1906_v0 = vld [vmem:[%s2952_s1 + $0x284] sm:$0xf0]  ;;  %v1635_v7 = vor.u32 %v1924_v57, %v1634_v55  ;;  %v1499_v20 = vor.u32 %v1890_v62, %v1498_v61 }
  0x2d   :  { %1012 = vmatpush.bf16.msrb.mxu1 %v1603_v12  ;;  %v1626_v4 = vld [vmem:[%s2952_s1 + $0x300] sm:$0xf]  ;;  %v1922_v5 = vld [vmem:[%s2952_s1 + $0x304] sm:$0xf0]  ;;  %v1810_v6 = vld [vmem:[%s2952_s1 + $0x470] sm:$0xf]  ;;  %v1699_v12 = vor.u32 %v1940_v59, %v1698_v58  ;;  %v1563_v21 = vor.u32 %v1906_v0, %v1562_v63 }
  0x2e   :  { %1026 = vmatpush.bf16.msrb.mxu2 %v1667_v15  ;;  %v1968_v9 = vld [vmem:[%s2952_s1 + $0x474] sm:$0xf0]  ;;  %v1839_v10 = vld [vmem:[%s2952_s1 + $0x74] sm:$0xf]  ;;  %v1300_v11 = vld [vmem:[%s2952_s1 + $0x78] sm:$0xf0] }
  0x2f   :  { %1040 = vmatpush.bf16.msrb.mxu3 %v1731_v19  ;;  %v1855_v13 = vld [vmem:[%s2952_s1 + $0xf4] sm:$0xf]  ;;  %v1364_v15 = vld [vmem:[%s2952_s1 + $0xf8] sm:$0xf0]  ;;  %v1690_v16 = vld [vmem:[%s2952_s1 + $0x380] sm:$0xf]  ;;  %v1811_v26 = vor.u32 %v1968_v9, %v1810_v6  ;;  %v1303_v30 = vor.u32 %v1839_v10, %v1300_v11 }
  0x30   :  { %999 = vmatpush.bf16.msrb.mxu0 %v1531_v24  ;;  %v1938_v17 = vld [vmem:[%s2952_s1 + $0x384] sm:$0xf0]  ;;  %v1222_v18 = vld [vmem:[%s2953_s0 + $0x10] sm:$0xf]  ;;  %v1822_v19 = vld [vmem:[%s2953_s0 + $0x30] sm:$0xf0] }
  0x31   :  { %1013 = vmatpush.bf16.msrb.mxu1 %v1595_v25  ;;  %v1230_v22 = vld [vmem:[%s2953_s0 + $0x18] sm:$0xf]  ;;  %v1823_v23 = vld [vmem:[%s2953_s0 + $0x38] sm:$0xf0]  ;;  %v1871_v24 = vld [vmem:[%s2952_s1 + $0x174] sm:$0xf]  ;;  %v1627_v25 = vor.u32 %v1922_v5, %v1626_v4  ;;  %v1691_v35 = vor.u32 %v1938_v17, %v1690_v16 }
  0x32   :  { %1027 = vmatpush.bf16.msrb.mxu2 %v1659_v27  ;;  %v1428_v27 = vld [vmem:[%s2952_s1 + $0x178] sm:$0xf0]  ;;  %v1818_v28 = vld [vmem:[%s2953_s0 + $0x14] sm:$0xf]  ;;  %v1224_v29 = vld [vmem:[%s2953_s0 + $0x34] sm:$0xf0]  ;;  %v2471_v40 = vor.u32 %v1823_v23, %v1230_v22 }
  0x33   :  { %1041 = vmatpush.bf16.msrb.mxu3 %v1723_v31  ;;  %v1367_v31 = vor.u32 %v1855_v13, %v1364_v15  ;;  %v1819_v32 = vld [vmem:[%s2953_s0 + $0x1c] sm:$0xf]  ;;  %v1802_v33 = vld [vmem:[%s2952_s1 + $0x460] sm:$0xf]  ;;  %v1966_v34 = vld [vmem:[%s2952_s1 + $0x464] sm:$0xf0]  ;;  %v1431_v41 = vor.u32 %v1871_v24, %v1428_v27  ;;  %v2479_v44 = vor.u32 %v1818_v28, %v1224_v29 }
  0x34   :  { %1000 = vmatpush.bf16.msrb.mxu0 %v1523_v36  ;;  %v2460_v36 = vor.u32 %v1822_v19, %v1222_v18  ;;  %v1837_v38 = vld [vmem:[%s2952_s1 + $0x64] sm:$0xf]  ;;  %v1803_v45 = vor.u32 %v1966_v34, %v1802_v33  ;;  %v1420_v47 = vld [vmem:[%s2952_s1 + $0x168] sm:$0xf0]  ;;  %v1794_v50 = vld [vmem:[%s2952_s1 + $0x450] sm:$0xf] }
  0x35   :  { %1014 = vmatpush.bf16.msrb.mxu1 %v1587_v37  ;;  %v1232_v37 = vld [vmem:[%s2953_s0 + $0x3c] sm:$0xf0]  ;;  %v1853_v42 = vld [vmem:[%s2952_s1 + $0xe4] sm:$0xf]  ;;  %v1964_v51 = vld [vmem:[%s2952_s1 + $0x454] sm:$0xf0] }
  0x36   :  { %1028 = vmatpush.bf16.msrb.mxu2 %v1651_v39  ;;  %v1292_v39 = vld [vmem:[%s2952_s1 + $0x68] sm:$0xf0]  ;;  %v1869_v46 = vld [vmem:[%s2952_s1 + $0x164] sm:$0xf]  ;;  %v1835_v53 = vld [vmem:[%s2952_s1 + $0x54] sm:$0xf]  ;;  %v1795_v58 = vor.u32 %v1964_v51, %v1794_v50 }
  0x37   :  { %1042 = vmatpush.bf16.msrb.mxu3 %v1715_v43  ;;  %v1356_v43 = vld [vmem:[%s2952_s1 + $0xe8] sm:$0xf0]  ;;  %v1284_v54 = vld [vmem:[%s2952_s1 + $0x58] sm:$0xf0]  ;;  %v1423_v55 = vor.u32 %v1869_v46, %v1420_v47  ;;  %v1867_v59 = vld [vmem:[%s2952_s1 + $0x154] sm:$0xf] }
  0x38   :  { %1001 = vmatpush.bf16.msrb.mxu0 %v1515_v48  ;;  %v2487_v48 = vor.u32 %v1819_v32, %v1232_v37  ;;  %v1348_v57 = vld [vmem:[%s2952_s1 + $0xd8] sm:$0xf0]  ;;  %v1287_v62 = vor.u32 %v1835_v53, %v1284_v54  ;;  %v1786_v63 = vld [vmem:[%s2952_s1 + $0x440] sm:$0xf]  ;;  %v1962_v0 = vld [vmem:[%s2952_s1 + $0x444] sm:$0xf0] }
  0x39   :  { %1015 = vmatpush.bf16.msrb.mxu1 %v1579_v49  ;;  %v1295_v49 = vor.u32 %v1837_v38, %v1292_v39  ;;  %v1412_v61 = vld [vmem:[%s2952_s1 + $0x158] sm:$0xf0]  ;;  %v1276_v4 = vld [vmem:[%s2952_s1 + $0x48] sm:$0xf0]  ;;  %v1849_v6 = vld [vmem:[%s2952_s1 + $0xc4] sm:$0xf]  ;;  %v1787_v9 = vor.u32 %v1962_v0, %v1786_v63 }
  0x3a   :  { %1029 = vmatpush.bf16.msrb.mxu2 %v1643_v52  ;;  %v1359_v52 = vor.u32 %v1853_v42, %v1356_v43  ;;  %v1415_v5 = vor.u32 %v1867_v59, %v1412_v61  ;;  %v1865_v10 = vld [vmem:[%s2952_s1 + $0x144] sm:$0xf]  ;;  %v1404_v11 = vld [vmem:[%s2952_s1 + $0x148] sm:$0xf0]  ;;  %v1778_v13 = vld [vmem:[%s2952_s1 + $0x430] sm:$0xf] }
  0x3b   :  { %1043 = vmatpush.bf16.msrb.mxu3 %v1707_v56  ;;  %v1851_v56 = vld [vmem:[%s2952_s1 + $0xd4] sm:$0xf]  ;;  %v1960_v15 = vld [vmem:[%s2952_s1 + $0x434] sm:$0xf0]  ;;  %v1268_v18 = vld [vmem:[%s2952_s1 + $0x38] sm:$0xf0]  ;;  %v1407_v19 = vor.u32 %v1865_v10, %v1404_v11 }
  0x3c   :  { %1002 = vmatpush.bf16.msrb.mxu0 %v1507_v1  ;;  %v1351_v1 = vor.u32 %v1851_v56, %v1348_v57  ;;  %v1831_v17 = vld [vmem:[%s2952_s1 + $0x34] sm:$0xf]  ;;  %v1779_v22 = vor.u32 %v1960_v15, %v1778_v13  ;;  %v1396_v24 = vld [vmem:[%s2952_s1 + $0x138] sm:$0xf0]  ;;  %v1958_v27 = vld [vmem:[%s2952_s1 + $0x424] sm:$0xf0] }
  0x3d   :  { %1016 = vmatpush.bf16.msrb.mxu1 %v1571_v3  ;;  %v1833_v3 = vld [vmem:[%s2952_s1 + $0x44] sm:$0xf]  ;;  %v1863_v23 = vld [vmem:[%s2952_s1 + $0x134] sm:$0xf]  ;;  %v1324_v33 = vld [vmem:[%s2952_s1 + $0xa8] sm:$0xf0] }
  0x3e   :  { %1030 = vmatpush.bf16.msrb.mxu2 %v1635_v7  ;;  %v1340_v7 = vld [vmem:[%s2952_s1 + $0xc8] sm:$0xf0]  ;;  %v1829_v29 = vld [vmem:[%s2952_s1 + $0x24] sm:$0xf]  ;;  %v1762_v39 = vld [vmem:[%s2952_s1 + $0x410] sm:$0xf] }
  0x3f   :  { %1044 = vmatpush.bf16.msrb.mxu3 %v1699_v12  ;;  %v1279_v12 = vor.u32 %v1833_v3, %v1276_v4  ;;  %v1343_v16 = vor.u32 %v1849_v6, %v1340_v7  ;;  %v1845_v32 = vld [vmem:[%s2952_s1 + $0xa4] sm:$0xf]  ;;  %v1388_v37 = vld [vmem:[%s2952_s1 + $0x128] sm:$0xf0]  ;;  %v1827_v43 = vld [vmem:[%s2952_s1 + $0x14] sm:$0xf] }
  0x40   :  { %1003 = vmatpush.bf16.msrb.mxu0 %v1499_v20  ;;  %v1847_v20 = vld [vmem:[%s2952_s1 + $0xb4] sm:$0xf]  ;;  %v1327_v42 = vor.u32 %v1845_v32, %v1324_v33  ;;  %v1380_v51 = vld [vmem:[%s2952_s1 + $0x118] sm:$0xf0]  ;;  %v1754_v53 = vld [vmem:[%s2952_s1 + $0x400] sm:$0xf] }
  0x41   :  { %1017 = vmatpush.bf16.msrb.mxu1 %v1563_v21  ;;  %v1332_v21 = vld [vmem:[%s2952_s1 + $0xb8] sm:$0xf0]  ;;  %v1843_v46 = vld [vmem:[%s2952_s1 + $0x94] sm:$0xf]  ;;  %v1954_v54 = vld [vmem:[%s2952_s1 + $0x404] sm:$0xf0] }
  0x42   :  { %1031 = vmatpush.bf16.msrb.mxu2 %v1627_v25  ;;  %v1271_v25 = vor.u32 %v1831_v17, %v1268_v18  ;;  %v1335_v28 = vor.u32 %v1847_v20, %v1332_v21  ;;  %v1859_v50 = vld [vmem:[%s2952_s1 + $0x114] sm:$0xf]  ;;  %v1244_v57 = vld [vmem:[%s2952_s1 + $0x8] sm:$0xf0]  ;;  %v1492_v63 = vld [vmem:[%s2952_s1 + $0x1f8] sm:$0xf0]  ;;  %v1755_v6 = vor.u32 %v1954_v54, %v1754_v53 }
  0x43   :  { %1045 = vmatpush.bf16.msrb.mxu3 %v1691_v35  ;;  %1004 = vmatmul.bf16.vlgmr.msrb.gmra.mxu0 %v2460_v36  ;;  %v1861_v35 = vld [vmem:[%s2952_s1 + $0x124] sm:$0xf]  ;;  %v1308_v59 = vld [vmem:[%s2952_s1 + $0x88] sm:$0xf0]  ;;  %v1903_v0 = vld [vmem:[%s2952_s1 + $0x274] sm:$0xf] }
  0x44   :  { %1052 = vmatpush.bf16.msra.mxu0 %v1811_v26  ;;  %1018 = vmatmul.bf16.vlgmr.msrb.gmra.mxu1 %v2479_v44  ;;  %v1770_v26 = vld [vmem:[%s2952_s1 + $0x420] sm:$0xf]  ;;  %v1391_v47 = vor.u32 %v1861_v35, %v1388_v37  ;;  %v1556_v3 = vld [vmem:[%s2952_s1 + $0x278] sm:$0xf0]  ;;  %v1919_v4 = vld [vmem:[%s2952_s1 + $0x2f4] sm:$0xf] }
  0x45   :  { %1066 = vmatpush.bf16.msra.mxu1 %v1303_v30  ;;  %1032 = vmatmul.bf16.vlgmr.msrb.gmra.mxu2 %v2471_v40  ;;  %v1260_v30 = vld [vmem:[%s2952_s1 + $0x28] sm:$0xf0]  ;;  %v1771_v34 = vor.u32 %v1958_v27, %v1770_v26  ;;  %v1857_v7 = vld [vmem:[%s2952_s1 + $0x104] sm:$0xf]  ;;  %v1238_v10 = vld [vmem:[%s2953_s0 + $0x20] sm:$0xf]  ;;  %v1559_v18 = vor.u32 %v1903_v0, %v1556_v3 }
  0x46   :  { %1080 = vmatpush.bf16.msra.mxu2 %v1367_v31  ;;  %1046 = vmatmul.bf16.vlgmr.msrb.gmra.mxu3 %v2487_v48  ;;  %v1399_v31 = vor.u32 %v1863_v23, %v1396_v24  ;;  %v1263_v38 = vor.u32 %v1829_v29, %v1260_v30  ;;  %v1824_v13 = vld [vmem:[%s2953_s0 + $0x40] sm:$0xf0]  ;;  %v1935_v15 = vld [vmem:[%s2952_s1 + $0x374] sm:$0xf]  ;;  %v1484_v20 = vld [vmem:[%s2952_s1 + $0x1e8] sm:$0xf0] }
  0x47   :  { %1094 = vmatpush.bf16.msra.mxu3 %v1431_v41  ;;  %v1956_v41 = vld [vmem:[%s2952_s1 + $0x414] sm:$0xf0]  ;;  %v1901_v23 = vld [vmem:[%s2952_s1 + $0x264] sm:$0xf]  ;;  %v1548_v24 = vld [vmem:[%s2952_s1 + $0x268] sm:$0xf0] }
  0x48   :  { %1053 = vmatpush.bf16.msra.mxu0 %v1803_v45  ;;  %v1252_v45 = vld [vmem:[%s2952_s1 + $0x18] sm:$0xf0]  ;;  %v1917_v27 = vld [vmem:[%s2952_s1 + $0x2e4] sm:$0xf]  ;;  %v1551_v32 = vor.u32 %v1901_v23, %v1548_v24  ;;  %v1883_v33 = vld [vmem:[%s2952_s1 + $0x1d4] sm:$0xf] }
  0x49   :  { %1067 = vmatpush.bf16.msra.mxu1 %v1295_v49  ;;  %v1316_v49 = vld [vmem:[%s2952_s1 + $0x98] sm:$0xf0]  ;;  %v1255_v56 = vor.u32 %v1827_v43, %v1252_v45  ;;  %v1933_v30 = vld [vmem:[%s2952_s1 + $0x364] sm:$0xf]  ;;  %v1899_v37 = vld [vmem:[%s2952_s1 + $0x254] sm:$0xf] }
  0x4a   :  { %1081 = vmatpush.bf16.msra.mxu2 %v1359_v52  ;;  %v1763_v52 = vor.u32 %v1956_v41, %v1762_v39  ;;  %v1319_v61 = vor.u32 %v1843_v46, %v1316_v49  ;;  %v1915_v41 = vld [vmem:[%s2952_s1 + $0x2d4] sm:$0xf]  ;;  %v1668_v46 = vld [vmem:[%s2952_s1 + $0x358] sm:$0xf0]  ;;  %v1881_v49 = vld [vmem:[%s2952_s1 + $0x1c4] sm:$0xf] }
  0x4b   :  { %1095 = vmatpush.bf16.msra.mxu3 %v1423_v55  ;;  %v1825_v55 = vld [vmem:[%s2952_s1 + $0x4] sm:$0xf]  ;;  %v1931_v45 = vld [vmem:[%s2952_s1 + $0x354] sm:$0xf]  ;;  %v1588_v3 = vld [vmem:[%s2952_s1 + $0x2b8] sm:$0xf0] }
  0x4c   :  { %1054 = vmatpush.bf16.msra.mxu0 %v1795_v58  ;;  %v1841_v58 = vld [vmem:[%s2952_s1 + $0x84] sm:$0xf]  ;;  %v1247_v11 = vor.u32 %v1825_v55, %v1244_v57  ;;  %v1671_v53 = vor.u32 %v1931_v45, %v1668_v46  ;;  %v1444_v23 = vld [vmem:[%s2952_s1 + $0x198] sm:$0xf0] }
  0x4d   :  { %1068 = vmatpush.bf16.msra.mxu1 %v1287_v62  ;;  %v1887_v62 = vld [vmem:[%s2952_s1 + $0x1f4] sm:$0xf]  ;;  %v1311_v17 = vor.u32 %v1841_v58, %v1308_v59  ;;  %v1913_v54 = vld [vmem:[%s2952_s1 + $0x2c4] sm:$0xf]  ;;  %v1460_v59 = vld [vmem:[%s2952_s1 + $0x1b8] sm:$0xf0] }
  0x4e   :  { %1082 = vmatpush.bf16.msra.mxu2 %v1351_v1  ;;  %v1383_v1 = vor.u32 %v1859_v50, %v1380_v51  ;;  %v1468_v50 = vld [vmem:[%s2952_s1 + $0x1c8] sm:$0xf0]  ;;  %v1879_v58 = vld [vmem:[%s2952_s1 + $0x1b4] sm:$0xf]  ;;  %v1748_v45 = vld [vmem:[%s2952_s1 + $0x3f8] sm:$0xf0] }
  0x4f   :  { %1096 = vmatpush.bf16.msra.mxu3 %v1415_v5  ;;  %v1620_v5 = vld [vmem:[%s2952_s1 + $0x2f8] sm:$0xf0]  ;;  %v1471_v55 = vor.u32 %v1881_v49, %v1468_v50  ;;  %v1967_v49 = vld [vmem:[%s2952_s1 + $0x474] sm:$0xf] }
  0x50   :  { %1055 = vmatpush.bf16.msra.mxu0 %v1787_v9  ;;  %v1372_v9 = vld [vmem:[%s2952_s1 + $0x108] sm:$0xf0]  ;;  %v1623_v21 = vor.u32 %v1919_v4, %v1620_v5  ;;  %v1463_v4 = vor.u32 %v1879_v58, %v1460_v59  ;;  %v1927_v5 = vld [vmem:[%s2952_s1 + $0x334] sm:$0xf]  ;;  %v1812_v50 = vld [vmem:[%s2952_s1 + $0x478] sm:$0xf0] }
  0x51   :  { %1069 = vmatpush.bf16.msra.mxu1 %v1279_v12  ;;  %v1495_v12 = vor.u32 %v1887_v62, %v1492_v63  ;;  %v1895_v62 = vld [vmem:[%s2952_s1 + $0x234] sm:$0xf]  ;;  %v1524_v63 = vld [vmem:[%s2952_s1 + $0x238] sm:$0xf0]  ;;  %v1965_v58 = vld [vmem:[%s2952_s1 + $0x464] sm:$0xf] }
  0x52   :  { %1083 = vmatpush.bf16.msra.mxu2 %v1343_v16  ;;  %v1684_v16 = vld [vmem:[%s2952_s1 + $0x378] sm:$0xf0]  ;;  %v1804_v59 = vld [vmem:[%s2952_s1 + $0x468] sm:$0xf0] }
  0x53   :  { %1097 = vmatpush.bf16.msra.mxu3 %v1407_v19  ;;  %v1885_v19 = vld [vmem:[%s2952_s1 + $0x1e4] sm:$0xf]  ;;  %v1687_v26 = vor.u32 %v1935_v15, %v1684_v16 }
  0x54   :  { %1056 = vmatpush.bf16.msra.mxu0 %v1779_v22  ;;  %v1375_v22 = vor.u32 %v1857_v7, %v1372_v9  ;;  %v1487_v29 = vor.u32 %v1885_v19, %v1484_v20  ;;  %v1527_v7 = vor.u32 %v1895_v62, %v1524_v63  ;;  %v1877_v9 = vld [vmem:[%s2952_s1 + $0x1a4] sm:$0xf]  ;;  %v1644_v20 = vld [vmem:[%s2952_s1 + $0x328] sm:$0xf0]  ;;  %v1807_v62 = vor.u32 %v1965_v58, %v1804_v59  ;;  %v1947_v63 = vld [vmem:[%s2952_s1 + $0x3d4] sm:$0xf] }
  0x55   :  { %1070 = vmatpush.bf16.msra.mxu1 %v1271_v25  ;;  %v2679_v25 = vor.u32 %v1824_v13, %v1238_v10  ;;  %v1452_v10 = vld [vmem:[%s2952_s1 + $0x1a8] sm:$0xf0]  ;;  %v1909_v16 = vld [vmem:[%s2952_s1 + $0x2a4] sm:$0xf] }
  0x56   :  { %1084 = vmatpush.bf16.msra.mxu2 %v1335_v28  ;;  %v1612_v28 = vld [vmem:[%s2952_s1 + $0x2e8] sm:$0xf0]  ;;  %v1925_v19 = vld [vmem:[%s2952_s1 + $0x324] sm:$0xf] }
  0x57   :  { %1098 = vmatpush.bf16.msra.mxu3 %v1399_v31  ;;  %v1676_v31 = vld [vmem:[%s2952_s1 + $0x368] sm:$0xf0]  ;;  %v1615_v35 = vor.u32 %v1917_v27, %v1612_v28  ;;  %v1508_v27 = vld [vmem:[%s2952_s1 + $0x218] sm:$0xf0]  ;;  %v1647_v28 = vor.u32 %v1925_v19, %v1644_v20 }
  0x58   :  { %1057 = vmatpush.bf16.msra.mxu0 %v1771_v34  ;;  %v1476_v34 = vld [vmem:[%s2952_s1 + $0x1d8] sm:$0xf0]  ;;  %v1679_v39 = vor.u32 %v1933_v30, %v1676_v31  ;;  %v1516_v13 = vld [vmem:[%s2952_s1 + $0x228] sm:$0xf0] }
  0x59   :  { %1071 = vmatpush.bf16.msra.mxu1 %v1263_v38  ;;  %v1540_v38 = vld [vmem:[%s2952_s1 + $0x258] sm:$0xf0]  ;;  %v1479_v43 = vor.u32 %v1883_v33, %v1476_v34  ;;  %v1873_v34 = vld [vmem:[%s2952_s1 + $0x184] sm:$0xf]  ;;  %v1772_v19 = vld [vmem:[%s2952_s1 + $0x428] sm:$0xf0] }
  0x5a   :  { %1085 = vmatpush.bf16.msra.mxu2 %v1327_v42  ;;  %v1604_v42 = vld [vmem:[%s2952_s1 + $0x2d8] sm:$0xf0] }
  0x5b   :  { %1099 = vmatpush.bf16.msra.mxu3 %v1391_v47  ;;  %v1543_v47 = vor.u32 %v1899_v37, %v1540_v38  ;;  %v1607_v51 = vor.u32 %v1915_v41, %v1604_v42  ;;  %v1572_v30 = vld [vmem:[%s2952_s1 + $0x298] sm:$0xf0]  ;;  %v1436_v37 = vld [vmem:[%s2952_s1 + $0x188] sm:$0xf0]  ;;  %v1889_v38 = vld [vmem:[%s2952_s1 + $0x204] sm:$0xf] }
  0x5c   :  { %1058 = vmatpush.bf16.msra.mxu0 %v1763_v52  ;;  %v1897_v52 = vld [vmem:[%s2952_s1 + $0x244] sm:$0xf]  ;;  %v1636_v33 = vld [vmem:[%s2952_s1 + $0x318] sm:$0xf0] }
  0x5d   :  { %1072 = vmatpush.bf16.msra.mxu1 %v1255_v56  ;;  %v1929_v56 = vld [vmem:[%s2952_s1 + $0x344] sm:$0xf] }
  0x5e   :  { %1086 = vmatpush.bf16.msra.mxu2 %v1319_v61  ;;  %v1905_v42 = vld [vmem:[%s2952_s1 + $0x284] sm:$0xf] }
  0x5f   :  { %1100 = vmatpush.bf16.msra.mxu3 %v1383_v1  ;;  %v1911_v1 = vld [vmem:[%s2952_s1 + $0x2b4] sm:$0xf] }
  0x60   :  { %1059 = vmatpush.bf16.msra.mxu0 %v1755_v6  ;;  %v1652_v6 = vld [vmem:[%s2952_s1 + $0x338] sm:$0xf0] }
  0x61   :  { %1073 = vmatpush.bf16.msra.mxu1 %v1247_v11  ;;  %v1591_v11 = vor.u32 %v1911_v1, %v1588_v3  ;;  %v1655_v15 = vor.u32 %v1927_v5, %v1652_v6  ;;  %v1963_v1 = vld [vmem:[%s2952_s1 + $0x454] sm:$0xf]  ;;  %v1796_v3 = vld [vmem:[%s2952_s1 + $0x458] sm:$0xf0]  ;;  %v1724_v6 = vld [vmem:[%s2952_s1 + $0x3c8] sm:$0xf0] }
  0x62   :  { %1087 = vmatpush.bf16.msra.mxu2 %v1311_v17  ;;  %v1580_v17 = vld [vmem:[%s2952_s1 + $0x2a8] sm:$0xf0]  ;;  %v1799_v5 = vor.u32 %v1963_v1, %v1796_v3 }
  0x63   :  { %1101 = vmatpush.bf16.msra.mxu3 %v1375_v22  ;;  %1060 = vmatmul.bf16.vlgmr.msra.gmra.mxu0 %v2679_v25  ;;  %v1875_v22 = vld [vmem:[%s2952_s1 + $0x194] sm:$0xf]  ;;  %v1583_v24 = vor.u32 %v1909_v16, %v1580_v17  ;;  %v1941_v16 = vld [vmem:[%s2952_s1 + $0x3a4] sm:$0xf]  ;;  %v1708_v17 = vld [vmem:[%s2952_s1 + $0x3a8] sm:$0xf0] }
  0x64   :  { %1108 = vmatpush.bf16.msrb.mxu0 %v1495_v12  ;;  %1074 = vmatmul.bf16.vlgmr.msra.gmra.mxu1 %v2247_v60  ;;  %v1660_v60 = vld [vmem:[%s2952_s1 + $0x348] sm:$0xf0]  ;;  %v1893_v12 = vld [vmem:[%s2952_s1 + $0x224] sm:$0xf]  ;;  %v1447_v31 = vor.u32 %v1875_v22, %v1444_v23  ;;  %v1711_v20 = vor.u32 %v1941_v16, %v1708_v17  ;;  %v1939_v22 = vld [vmem:[%s2952_s1 + $0x394] sm:$0xf] }
  0x65   :  { %1122 = vmatpush.bf16.msrb.mxu1 %v1559_v18  ;;  %1088 = vmatmul.bf16.vlgmr.msra.gmra.mxu2 %v2277_v8  ;;  %v1532_v8 = vld [vmem:[%s2952_s1 + $0x248] sm:$0xf0]  ;;  %v1663_v0 = vor.u32 %v1929_v56, %v1660_v60  ;;  %v1455_v18 = vor.u32 %v1877_v9, %v1452_v10  ;;  %v1949_v56 = vld [vmem:[%s2952_s1 + $0x3e4] sm:$0xf]  ;;  %v1943_v9 = vld [vmem:[%s2952_s1 + $0x3b4] sm:$0xf] }
  0x66   :  { %1136 = vmatpush.bf16.msrb.mxu2 %v1623_v21  ;;  %1102 = vmatmul.bf16.vlgmr.msra.gmra.mxu3 %v2261_v2  ;;  %v1596_v2 = vld [vmem:[%s2952_s1 + $0x2c8] sm:$0xf0]  ;;  %v1535_v57 = vor.u32 %v1897_v52, %v1532_v8  ;;  %v1519_v21 = vor.u32 %v1893_v12, %v1516_v13  ;;  %v1921_v52 = vld [vmem:[%s2952_s1 + $0x304] sm:$0xf]  ;;  %v1716_v10 = vld [vmem:[%s2952_s1 + $0x3b8] sm:$0xf0] }
  0x67   :  { %1150 = vmatpush.bf16.msrb.mxu3 %v1687_v26  ;;  %v1599_v61 = vor.u32 %v1913_v54, %v1596_v2  ;;  %v1891_v26 = vld [vmem:[%s2952_s1 + $0x214] sm:$0xf]  ;;  %v1628_v8 = vld [vmem:[%s2952_s1 + $0x308] sm:$0xf0]  ;;  %v1780_v12 = vld [vmem:[%s2952_s1 + $0x438] sm:$0xf0]  ;;  %v1719_v13 = vor.u32 %v1943_v9, %v1716_v10 }
  0x68   :  { %1109 = vmatpush.bf16.msrb.mxu0 %v1487_v29  ;;  %v1907_v29 = vld [vmem:[%s2952_s1 + $0x294] sm:$0xf]  ;;  %v1740_v60 = vld [vmem:[%s2952_s1 + $0x3e8] sm:$0xf0]  ;;  %v1700_v23 = vld [vmem:[%s2952_s1 + $0x398] sm:$0xf0] }
  0x69   :  { %1123 = vmatpush.bf16.msrb.mxu1 %v1551_v32  ;;  %v1923_v32 = vld [vmem:[%s2952_s1 + $0x314] sm:$0xf]  ;;  %v1575_v41 = vor.u32 %v1907_v29, %v1572_v30  ;;  %v1937_v29 = vld [vmem:[%s2952_s1 + $0x384] sm:$0xf]  ;;  %v1692_v30 = vld [vmem:[%s2952_s1 + $0x388] sm:$0xf0] }
  0x6a   :  { %1137 = vmatpush.bf16.msrb.mxu2 %v1615_v35  ;;  %v1511_v35 = vor.u32 %v1891_v26, %v1508_v27  ;;  %v1639_v46 = vor.u32 %v1923_v32, %v1636_v33  ;;  %v1764_v26 = vld [vmem:[%s2952_s1 + $0x418] sm:$0xf0]  ;;  %v1703_v27 = vor.u32 %v1939_v22, %v1700_v23  ;;  %v1756_v32 = vld [vmem:[%s2952_s1 + $0x408] sm:$0xf0]  ;;  %v1695_v33 = vor.u32 %v1937_v29, %v1692_v30 }
  0x6b   :  { %1151 = vmatpush.bf16.msrb.mxu3 %v1679_v39  ;;  %v1500_v39 = vld [vmem:[%s2952_s1 + $0x208] sm:$0xf0] }
  0x6c   :  { %1110 = vmatpush.bf16.msrb.mxu0 %v1479_v43  ;;  %v1951_v43 = vld [vmem:[%s2952_s1 + $0x3f4] sm:$0xf] }
  0x6d   :  { %1124 = vmatpush.bf16.msrb.mxu1 %v1543_v47  ;;  %v1564_v47 = vld [vmem:[%s2952_s1 + $0x288] sm:$0xf0]  ;;  %v1751_v54 = vor.u32 %v1951_v43, %v1748_v45 }
  0x6e   :  { %1138 = vmatpush.bf16.msrb.mxu2 %v1607_v51  ;;  %v1439_v51 = vor.u32 %v1873_v34, %v1436_v37  ;;  %v1567_v2 = vor.u32 %v1905_v42, %v1564_v47 }
  0x6f   :  { %1152 = vmatpush.bf16.msrb.mxu3 %v1671_v53  ;;  %v1503_v53 = vor.u32 %v1889_v38, %v1500_v39 }
  0x70   :  { %1111 = vmatpush.bf16.msrb.mxu0 %v1471_v55  ;;  %v1815_v55 = vor.u32 %v1967_v49, %v1812_v50 }
  0x71   :  { %1125 = vmatpush.bf16.msrb.mxu1 %v1535_v57  ;;  %v1631_v57 = vor.u32 %v1921_v52, %v1628_v8 }
  0x72   :  { %1139 = vmatpush.bf16.msrb.mxu2 %v1599_v61  ;;  %v1743_v61 = vor.u32 %v1949_v56, %v1740_v60 }
  0x73   :  { %1153 = vmatpush.bf16.msrb.mxu3 %v1663_v0  ;;  %v1732_v0 = vld [vmem:[%s2952_s1 + $0x3d8] sm:$0xf0] }
  0x74   :  { %1112 = vmatpush.bf16.msrb.mxu0 %v1463_v4  ;;  %v1735_v4 = vor.u32 %v1947_v63, %v1732_v0 }
  0x75   :  { %1126 = vmatpush.bf16.msrb.mxu1 %v1527_v7 }
  0x76   :  { %1140 = vmatpush.bf16.msrb.mxu2 %v1591_v11  ;;  %v1959_v11 = vld [vmem:[%s2952_s1 + $0x434] sm:$0xf] }
  0x77   :  { %1154 = vmatpush.bf16.msrb.mxu3 %v1655_v15  ;;  %v1783_v15 = vor.u32 %v1959_v11, %v1780_v12 }
  0x78   :  { %1113 = vmatpush.bf16.msrb.mxu0 %v1455_v18  ;;  %v1957_v18 = vld [vmem:[%s2952_s1 + $0x424] sm:$0xf] }
  0x79   :  { %1127 = vmatpush.bf16.msrb.mxu1 %v1519_v21  ;;  %v1775_v21 = vor.u32 %v1957_v18, %v1772_v19 }
  0x7a   :  { %1141 = vmatpush.bf16.msrb.mxu2 %v1583_v24  ;;  %v1955_v24 = vld [vmem:[%s2952_s1 + $0x414] sm:$0xf] }
  0x7b   :  { %1155 = vmatpush.bf16.msrb.mxu3 %v1647_v28  ;;  %v1767_v28 = vor.u32 %v1955_v24, %v1764_v26 }
  0x7c   :  { %1114 = vmatpush.bf16.msrb.mxu0 %v1447_v31  ;;  %v1953_v31 = vld [vmem:[%s2952_s1 + $0x404] sm:$0xf] }
  0x7d   :  { %1128 = vmatpush.bf16.msrb.mxu1 %v1511_v35  ;;  %v1759_v34 = vor.u32 %v1953_v31, %v1756_v32 }
  0x7e   :  { %1142 = vmatpush.bf16.msrb.mxu2 %v1575_v41 }
  0x7f   :  { %1156 = vmatpush.bf16.msrb.mxu3 %v1639_v46 }
  0x80   :  { %1115 = vmatpush.bf16.msrb.mxu0 %v1439_v51 }
  0x81   :  { %1129 = vmatpush.bf16.msrb.mxu1 %v1503_v53 }
  0x82   :  { %1143 = vmatpush.bf16.msrb.mxu2 %v1567_v2 }
  0x83   :  { %1157 = vmatpush.bf16.msrb.mxu3 %v1631_v57  ;;  %1116 = vmatmul.bf16.vlgmr.msrb.gmra.mxu0 %v2288_v14  ;;  %v1945_v14 = vld [vmem:[%s2952_s1 + $0x3c4] sm:$0xf] }
  0x84   :  { %1164 = vmatpush.bf16.msra.mxu0 %v1751_v54  ;;  %1130 = vmatmul.bf16.vlgmr.msrb.gmra.mxu1 %v2460_v36  ;;  %v1961_v36 = vld [vmem:[%s2952_s1 + $0x444] sm:$0xf] }
  0x85   :  { %1178 = vmatpush.bf16.msra.mxu1 %v1815_v55  ;;  %1144 = vmatmul.bf16.vlgmr.msrb.gmra.mxu2 %v2479_v44  ;;  %v1788_v44 = vld [vmem:[%s2952_s1 + $0x448] sm:$0xf0] }
  0x86   :  { %1158 = vmatmul.bf16.vlgmr.msrb.gmra.mxu3 %v2471_v40  ;;  %v1727_v40 = vor.u32 %v1945_v14, %v1724_v6  ;;  %v1791_v7 = vor.u32 %v1961_v36, %v1788_v44 }
  0x88   :  { %1165 = vmatpush.bf16.msra.mxu0 %v1743_v61 }
  0x89   :  { %1179 = vmatpush.bf16.msra.mxu1 %v1807_v62 }
  0x8c   :  { %1166 = vmatpush.bf16.msra.mxu0 %v1735_v4 }
  0x8d   :  { %1180 = vmatpush.bf16.msra.mxu1 %v1799_v5 }
  0x90   :  { %1167 = vmatpush.bf16.msra.mxu0 %v1727_v40 }
  0x91   :  { %1181 = vmatpush.bf16.msra.mxu1 %v1791_v7 }
  0x94   :  { %1168 = vmatpush.bf16.msra.mxu0 %v1719_v13 }
  0x95   :  { %1182 = vmatpush.bf16.msra.mxu1 %v1783_v15 }
  0x98   :  { %1169 = vmatpush.bf16.msra.mxu0 %v1711_v20 }
  0x99   :  { %1183 = vmatpush.bf16.msra.mxu1 %v1775_v21 }
  0x9c   :  { %1170 = vmatpush.bf16.msra.mxu0 %v1703_v27 }
  0x9d   :  { %1184 = vmatpush.bf16.msra.mxu1 %v1767_v28 }
  0xa0   :  { %1171 = vmatpush.bf16.msra.mxu0 %v1695_v33  ;;  %v949_v37 = vpop.f32.mrf.mxu0 }
  0xa1   :  { %1185 = vmatpush.bf16.msra.mxu1 %v1759_v34  ;;  %v963_v35 = vpop.f32.mrf.mxu1 }
  0xa3   :  { %1172 = vmatmul.bf16.vlgmr.msra.gmra.mxu0 %v2487_v48  ;;  %v168_v48 = vld [vmem:[%s2954_s2] sm:$0x3] }
  0xa4   :  { %1186 = vmatmul.bf16.vlgmr.msra.gmra.mxu1 %v2679_v25  ;;  %v170_v2 = vperm.slane %v168_v48, 0  ;;  %v171_v60 = vperm.slane %v168_v48, 1 }
  0xa6   :  { %v950_v56 = vadd.f32 %v949_v37, %v170_v2 }
  0xa8   :  { %v977_v38 = vpop.f32.mrf.mxu2  ;;  %v951_v41 = vpop.f32.mrf.mxu0  ;;  %v964_v61 = vadd.f32 %v963_v35, %v950_v56 }
  0xa9   :  { %v965_v39 = vpop.f32.mrf.mxu1  ;;  %v991_v42 = vpop.f32.mrf.mxu3  ;;  %v952_v4 = vadd.f32 %v951_v41, %v170_v2 }
  0xaa   :  { %v978_v63 = vadd.f32 %v977_v38, %v964_v61 }
  0xab   :  { %v966_v44 = vadd.f32 %v965_v39, %v952_v4 }
  0xac   :  { %v992_v5 = vadd.f32 %v991_v42, %v978_v63 }
  0xb0   :  { %v979_v43 = vpop.f32.mrf.mxu2 }
  0xb1   :  { %v993_v46 = vpop.f32.mrf.mxu3  ;;  %v980_v11 = vadd.f32 %v979_v43, %v966_v44 }
  0xb3   :  { %v994_v19 = vadd.f32 %v993_v46, %v980_v11 }
  0xc0   :  { %v1005_v47 = vpop.f32.mrf.mxu0 }
  0xc1   :  { %v1019_v45 = vpop.f32.mrf.mxu1  ;;  %v1006_v40 = vadd.f32 %v1005_v47, %v992_v5 }
  0xc3   :  { %v1020_v12 = vadd.f32 %v1019_v45, %v1006_v40 }
  0xc8   :  { %v1033_v49 = vpop.f32.mrf.mxu2  ;;  %v1007_v51 = vpop.f32.mrf.mxu0 }
  0xc9   :  { %v1021_v50 = vpop.f32.mrf.mxu1  ;;  %v1047_v52 = vpop.f32.mrf.mxu3  ;;  %v1034_v20 = vadd.f32 %v1033_v49, %v1020_v12  ;;  %v1008_v23 = vadd.f32 %v1007_v51, %v994_v19 }
  0xcb   :  { %v1048_v26 = vadd.f32 %v1047_v52, %v1034_v20  ;;  %v1022_v30 = vadd.f32 %v1021_v50, %v1008_v23 }
  0xd0   :  { %v1035_v8 = vpop.f32.mrf.mxu2 }
  0xd1   :  { %v1049_v54 = vpop.f32.mrf.mxu3  ;;  %v1036_v35 = vadd.f32 %v1035_v8, %v1022_v30 }
  0xd3   :  { %v1050_v43 = vadd.f32 %v1049_v54, %v1036_v35 }
  0xe0   :  { %v1061_v25 = vpop.f32.mrf.mxu0 }
  0xe1   :  { %v1075_v53 = vpop.f32.mrf.mxu1  ;;  %v1062_v31 = vadd.f32 %v1061_v25, %v1048_v26 }
  0xe2   :  { %v1076_v62 = vadd.f32 %v1075_v53, %v171_v60 }
  0xe3   :  { %v1192_v41 = vmax.f32 %v1062_v31, 0.0 }
  0xe8   :  { %v1089_v55 = vpop.f32.mrf.mxu2  ;;  %v1063_v58 = vpop.f32.mrf.mxu0 }
  0xe9   :  { %v1077_v57 = vpop.f32.mrf.mxu1  ;;  %v1103_v59 = vpop.f32.mrf.mxu3  ;;  %v1090_v0 = vadd.f32 %v1089_v55, %v1076_v62  ;;  %v1064_v49 = vadd.f32 %v1063_v58, %v1050_v43 }
  0xea   :  { %v1078_v7 = vadd.f32 %v1077_v57, %v171_v60 }
  0xeb   :  { %v1104_v14 = vadd.f32 %v1103_v59, %v1090_v0  ;;  %v1194_v53 = vmax.f32 %v1064_v49, 0.0 }
  0xf0   :  { %v1091_v1 = vpop.f32.mrf.mxu2 }
  0xf1   :  { %v1105_v36 = vpop.f32.mrf.mxu3  ;;  %v1092_v13 = vadd.f32 %v1091_v1, %v1078_v7 }
  0xf3   :  { %v1106_v21 = vadd.f32 %v1105_v36, %v1092_v13 }
 0x100   :  { %v1117_v3 = vpop.f32.mrf.mxu0 }
 0x101   :  { %v1131_v6 = vpop.f32.mrf.mxu1  ;;  %v1118_v9 = vadd.f32 %v1117_v3, %v1104_v14 }
 0x103   :  { %v1132_v15 = vadd.f32 %v1131_v6, %v1118_v9 }
 0x108   :  { %v1145_v10 = vpop.f32.mrf.mxu2  ;;  %v1119_v16 = vpop.f32.mrf.mxu0 }
 0x109   :  { %v1133_v17 = vpop.f32.mrf.mxu1  ;;  %v1159_v18 = vpop.f32.mrf.mxu3  ;;  %v1146_v22 = vadd.f32 %v1145_v10, %v1132_v15  ;;  %v1120_v24 = vadd.f32 %v1119_v16, %v1106_v21 }
 0x10b   :  { %v1160_v27 = vadd.f32 %v1159_v18, %v1146_v22  ;;  %v1134_v32 = vadd.f32 %v1133_v17, %v1120_v24 }
 0x110   :  { %v1147_v28 = vpop.f32.mrf.mxu2 }
 0x111   :  { %v1148_v37 = vadd.f32 %v1147_v28, %v1134_v32  ;;  %v1161_v39 = vpop.f32.mrf.mxu3 }
 0x113   :  { %v1162_v45 = vadd.f32 %v1161_v39, %v1148_v37 }
 0x120   :  { %v1173_v29 = vpop.f32.mrf.mxu0 }
 0x121   :  { %v1174_v33 = vadd.f32 %v1173_v29, %v1160_v27  ;;  %v1187_v34 = vpop.f32.mrf.mxu1 }
 0x123   :  { %v1188_v38 = vadd.f32 %v1187_v34, %v1174_v33 }
 0x125   :  { %v1193_v42 = vmax.f32 %v1188_v38, 0.0 }
 0x127   :  { %v1196_v46 = vpack.c.bf16 %v1193_v42, %v1192_v41 }
 0x128   :  { %v1175_v47 = vpop.f32.mrf.mxu0 }
 0x129   :  { %1198 = vst [vmem:[%s2955_s3] sm:$0xff] %v1196_v46  ;;  %v1176_v50 = vadd.f32 %v1175_v47, %v1162_v45  ;;  %v1189_v51 = vpop.f32.mrf.mxu1 }
 0x12b   :  { %v1190_v52 = vadd.f32 %v1189_v51, %v1176_v50 }
 0x12d   :  { %v1195_v48 = vmax.f32 %v1190_v52, 0.0 }
 0x12f   :  { %v1197_v8 = vpack.c.bf16 %v1195_v48, %v1194_v53 }
 0x131   :  { %1199 = vst [vmem:[%s2955_s3 + $0x8] sm:$0xff] %v1197_v8 }

</bundles_post_ra>
